<compile_context>
chip_gen: v6e
topology: v6e:2x2x1
jax: 0.10.0
libtpu: 0.0.40
codegen_flags: <defaults>
</compile_context>

<pallas_src>
import functools

import jax
import jax.numpy as jnp
import numpy as np
from jax.experimental import pallas as pl
from jax.experimental.pallas import tpu as pltpu


def _make_kernel(N, H, W, Cin, Cout, KH, KW, Hpad):
    WC = W * Cout

    def conv_bn_relu_kernel(x_ref, w_ref, bias_ref, o_ref):
        # x_ref:    [Cin, N*Hpad, Wpad*Cout]  Cout-replicated, zero-padded input
        # w_ref:    [T, W*Cout]               folded (conv * BN-scale) weights
        # bias_ref: [1, W*Cout]               folded conv-bias + BN affine
        # o_ref:    [N*H, W*Cout]             lane-dense output (full-lane vst)
        for n in range(N):
            # Bias-initialized f32 accumulator (2 vregs per sample).
            acc = jnp.broadcast_to(bias_ref[...], (H, WC))
            for kh in range(KH):
                for cin in range(Cin):
                    # One sublane-shifted row block per (kh, cin): (H, Wpad*Cout).
                    rows = x_ref[cin, pl.ds(n * Hpad + kh, H), :]
                    for kw in range(KW):
                        t = (kh * KW + kw) * Cin + cin
                        # kw*Cout lane shift lines the tap up with the
                        # lane-dense (w*Cout + co) output layout.
                        tap = rows[:, kw * Cout:kw * Cout + WC]
                        acc = acc + tap * w_ref[pl.ds(t, 1), :]
            o_ref[pl.ds(n * H, H), :] = jnp.maximum(acc, 0.0).astype(o_ref.dtype)

    return conv_bn_relu_kernel


@functools.partial(jax.jit, static_argnames=("stride", "padding"))
def conv_bn_relu(x_nchw, w_oihw, conv_bias, gamma, beta,
                 running_mean, running_var, eps=1e-5, stride=1, padding=1):
    N, Cin, H, W = x_nchw.shape
    Cout, _, KH, KW = w_oihw.shape
    assert stride == 1 and padding == (KH - 1) // 2 == (KW - 1) // 2, (
        "kernel assumes stride 1 and 'same' padding (odd square kernel)")

    # ---- glue (plain JAX, all tiny): BN folding + lane-dense layout ----
    scale = gamma / jnp.sqrt(running_var + eps)                   # [Cout]
    bias = beta + (conv_bias - running_mean) * scale              # [Cout]
    w_eff = (w_oihw * scale[:, None, None, None]).astype(jnp.float32)

    Hpad, Wpad = H + 2 * padding, W + 2 * padding
    T = KH * KW * Cin
    WC = W * Cout

    # Padded input, replicated over Cout so lanes are (w*Cout + co):
    #   x_rep[cin, n*Hpad + hp, wp*Cout + co] = x_pad[n, hp, wp, cin]   (~81 KiB)
    x_nhwc = jnp.transpose(x_nchw, (0, 2, 3, 1)).astype(jnp.float32)
    x_pad = jnp.pad(x_nhwc,
                    ((0, 0), (padding, padding), (padding, padding), (0, 0)))
    x_rep = jnp.transpose(x_pad, (3, 0, 1, 2))                    # (Cin,N,Hpad,Wpad)
    x_rep = jnp.broadcast_to(x_rep[..., None], (Cin, N, Hpad, Wpad, Cout))
    x_rep = x_rep.reshape(Cin, N * Hpad, Wpad * Cout)

    # Per-tap weights in (kh, kw, cin) order, tiled over W along the lane axis.
    w_tap = jnp.transpose(w_eff, (2, 3, 1, 0)).reshape(T, Cout)
    w_lane = jnp.tile(w_tap[:, None, :], (1, W, 1)).reshape(T, WC)
    bias_lane = jnp.tile(bias.astype(jnp.float32)[None, :], (W, 1)).reshape(1, WC)

    nbytes = 4 * (x_rep.size + w_lane.size + bias_lane.size + N * H * WC)
    out2d = pl.pallas_call(
        _make_kernel(N, H, W, Cin, Cout, KH, KW, Hpad),
        out_shape=jax.ShapeDtypeStruct((N * H, WC), jnp.float32),
        in_specs=[pl.BlockSpec(memory_space=pltpu.MemorySpace.VMEM)] * 3,
        out_specs=pl.BlockSpec(memory_space=pltpu.MemorySpace.VMEM),
        cost_estimate=pl.CostEstimate(flops=2 * T * N * H * WC,
                                      transcendentals=0,
                                      bytes_accessed=nbytes),
    )(x_rep, w_lane, bias_lane)

    out_nhwc = out2d.reshape(N, H, W, Cout)
    return jnp.transpose(out_nhwc, (0, 3, 1, 2))                  # back to NCHW


def reference(x, w, b, gamma, beta, mean, var, eps=1e-5):
    y = jax.lax.conv_general_dilated(
        x, w, window_strides=(1, 1), padding=((1, 1), (1, 1)),
        dimension_numbers=("NCHW", "OIHW", "NCHW"))
    y = y + b[None, :, None, None]
    s = (gamma / jnp.sqrt(var + eps))[None, :, None, None]
    y = (y - mean[None, :, None, None]) * s + beta[None, :, None, None]
    return jnp.maximum(y, 0.0)


if __name__ == "__main__":
    # Small shapes consistent with the module: N=2, Cin=4, Cout=8, H=W=16.
    key = jax.random.PRNGKey(0)
    k = jax.random.split(key, 7)

    N, Cin, Cout, H, W = 2, 4, 8, 16, 16
    x = jax.random.normal(k[0], (N, Cin, H, W), dtype=jnp.float32)

    # Deterministic "parameters" (synthetic, not a checkpoint load).
    w = 0.1 * jax.random.normal(k[1], (Cout, Cin, 3, 3), dtype=jnp.float32)
    conv_b = 0.1 * jax.random.normal(k[2], (Cout,), dtype=jnp.float32)
    gamma = 1.0 + 0.1 * jax.random.normal(k[3], (Cout,), dtype=jnp.float32)
    beta = 0.1 * jax.random.normal(k[4], (Cout,), dtype=jnp.float32)
    r_mean = 0.1 * jax.random.normal(k[5], (Cout,), dtype=jnp.float32)
    r_var = jax.random.uniform(k[6], (Cout,), minval=0.5, maxval=1.5,
                               dtype=jnp.float32)

    out = conv_bn_relu(x, w, conv_b, gamma, beta, r_mean, r_var)
    out = jax.block_until_ready(out)

    ref = jax.block_until_ready(reference(x, w, conv_b, gamma, beta,
                                          r_mean, r_var))
    assert out.shape == (N, Cout, H, W), out.shape
    np.testing.assert_allclose(np.asarray(out), np.asarray(ref),
                               rtol=1e-4, atol=1e-4)
    print("KERNEL_OK")
</pallas_src>

<mosaic_0001>
module attributes {stable_mosaic.version = 11 : i64} {
  func.func @conv_bn_relu_kernel(%arg0: memref<4x36x144xf32, #tpu.memory_space<vmem>>, %arg1: memref<36x128xf32, #tpu.memory_space<vmem>>, %arg2: memref<1x128xf32, #tpu.memory_space<vmem>>, %arg3: memref<32x128xf32, #tpu.memory_space<vmem>>) attributes {dimension_semantics = [], scalar_prefetch = 0 : i64, scratch_operands = 0 : i64, tpu.core_type = #tpu.core_type<tc>} {
    %c0 = arith.constant 0 : index
    %c0_0 = arith.constant 0 : index
    %0 = vector.load %arg2[%c0, %c0_0] : memref<1x128xf32, #tpu.memory_space<vmem>>, vector<1x128xf32>
    %1 = vector.shape_cast %0 : vector<1x128xf32> to vector<1x128xf32>
    %2 = vector.broadcast %1 : vector<1x128xf32> to vector<16x128xf32>
    %c0_1 = arith.constant 0 : index
    %c0_2 = arith.constant 0 : index
    %c0_3 = arith.constant 0 : index
    %3 = vector.load %arg0[%c0_1, %c0_2, %c0_3] : memref<4x36x144xf32, #tpu.memory_space<vmem>>, vector<1x16x144xf32>
    %4 = vector.shape_cast %3 : vector<1x16x144xf32> to vector<16x144xf32>
    %5 = vector.extract_strided_slice %4 {offsets = [0, 0], sizes = [16, 128], strides = [1, 1]} : vector<16x144xf32> to vector<16x128xf32>
    %c0_4 = arith.constant 0 : index
    %c0_5 = arith.constant 0 : index
    %6 = vector.load %arg1[%c0_4, %c0_5] : memref<36x128xf32, #tpu.memory_space<vmem>>, vector<1x128xf32>
    %7 = vector.broadcast %6 : vector<1x128xf32> to vector<16x128xf32>
    %8 = arith.mulf %5, %7 : vector<16x128xf32>
    %9 = arith.addf %2, %8 : vector<16x128xf32>
    %10 = vector.extract_strided_slice %4 {offsets = [0, 8], sizes = [16, 128], strides = [1, 1]} : vector<16x144xf32> to vector<16x128xf32>
    %c4 = arith.constant 4 : index
    %c0_6 = arith.constant 0 : index
    %11 = vector.load %arg1[%c4, %c0_6] : memref<36x128xf32, #tpu.memory_space<vmem>>, vector<1x128xf32>
    %12 = vector.broadcast %11 : vector<1x128xf32> to vector<16x128xf32>
    %13 = arith.mulf %10, %12 : vector<16x128xf32>
    %14 = arith.addf %9, %13 : vector<16x128xf32>
    %15 = vector.extract_strided_slice %4 {offsets = [0, 16], sizes = [16, 128], strides = [1, 1]} : vector<16x144xf32> to vector<16x128xf32>
    %c8 = arith.constant 8 : index
    %c0_7 = arith.constant 0 : index
    %16 = vector.load %arg1[%c8, %c0_7] : memref<36x128xf32, #tpu.memory_space<vmem>>, vector<1x128xf32>
    %17 = vector.broadcast %16 : vector<1x128xf32> to vector<16x128xf32>
    %18 = arith.mulf %15, %17 : vector<16x128xf32>
    %19 = arith.addf %14, %18 : vector<16x128xf32>
    %c1 = arith.constant 1 : index
    %c0_8 = arith.constant 0 : index
    %c0_9 = arith.constant 0 : index
    %20 = vector.load %arg0[%c1, %c0_8, %c0_9] : memref<4x36x144xf32, #tpu.memory_space<vmem>>, vector<1x16x144xf32>
    %21 = vector.shape_cast %20 : vector<1x16x144xf32> to vector<16x144xf32>
    %22 = vector.extract_strided_slice %21 {offsets = [0, 0], sizes = [16, 128], strides = [1, 1]} : vector<16x144xf32> to vector<16x128xf32>
    %c1_10 = arith.constant 1 : index
    %c0_11 = arith.constant 0 : index
    %23 = vector.load %arg1[%c1_10, %c0_11] : memref<36x128xf32, #tpu.memory_space<vmem>>, vector<1x128xf32>
    %24 = vector.broadcast %23 : vector<1x128xf32> to vector<16x128xf32>
    %25 = arith.mulf %22, %24 : vector<16x128xf32>
    %26 = arith.addf %19, %25 : vector<16x128xf32>
    %27 = vector.extract_strided_slice %21 {offsets = [0, 8], sizes = [16, 128], strides = [1, 1]} : vector<16x144xf32> to vector<16x128xf32>
    %c5 = arith.constant 5 : index
    %c0_12 = arith.constant 0 : index
    %28 = vector.load %arg1[%c5, %c0_12] : memref<36x128xf32, #tpu.memory_space<vmem>>, vector<1x128xf32>
    %29 = vector.broadcast %28 : vector<1x128xf32> to vector<16x128xf32>
    %30 = arith.mulf %27, %29 : vector<16x128xf32>
    %31 = arith.addf %26, %30 : vector<16x128xf32>
    %32 = vector.extract_strided_slice %21 {offsets = [0, 16], sizes = [16, 128], strides = [1, 1]} : vector<16x144xf32> to vector<16x128xf32>
    %c9 = arith.constant 9 : index
    %c0_13 = arith.constant 0 : index
    %33 = vector.load %arg1[%c9, %c0_13] : memref<36x128xf32, #tpu.memory_space<vmem>>, vector<1x128xf32>
    %34 = vector.broadcast %33 : vector<1x128xf32> to vector<16x128xf32>
    %35 = arith.mulf %32, %34 : vector<16x128xf32>
    %36 = arith.addf %31, %35 : vector<16x128xf32>
    %c2 = arith.constant 2 : index
    %c0_14 = arith.constant 0 : index
    %c0_15 = arith.constant 0 : index
    %37 = vector.load %arg0[%c2, %c0_14, %c0_15] : memref<4x36x144xf32, #tpu.memory_space<vmem>>, vector<1x16x144xf32>
    %38 = vector.shape_cast %37 : vector<1x16x144xf32> to vector<16x144xf32>
    %39 = vector.extract_strided_slice %38 {offsets = [0, 0], sizes = [16, 128], strides = [1, 1]} : vector<16x144xf32> to vector<16x128xf32>
    %c2_16 = arith.constant 2 : index
    %c0_17 = arith.constant 0 : index
    %40 = vector.load %arg1[%c2_16, %c0_17] : memref<36x128xf32, #tpu.memory_space<vmem>>, vector<1x128xf32>
    %41 = vector.broadcast %40 : vector<1x128xf32> to vector<16x128xf32>
    %42 = arith.mulf %39, %41 : vector<16x128xf32>
    %43 = arith.addf %36, %42 : vector<16x128xf32>
    %44 = vector.extract_strided_slice %38 {offsets = [0, 8], sizes = [16, 128], strides = [1, 1]} : vector<16x144xf32> to vector<16x128xf32>
    %c6 = arith.constant 6 : index
    %c0_18 = arith.constant 0 : index
    %45 = vector.load %arg1[%c6, %c0_18] : memref<36x128xf32, #tpu.memory_space<vmem>>, vector<1x128xf32>
    %46 = vector.broadcast %45 : vector<1x128xf32> to vector<16x128xf32>
    %47 = arith.mulf %44, %46 : vector<16x128xf32>
    %48 = arith.addf %43, %47 : vector<16x128xf32>
    %49 = vector.extract_strided_slice %38 {offsets = [0, 16], sizes = [16, 128], strides = [1, 1]} : vector<16x144xf32> to vector<16x128xf32>
    %c10 = arith.constant 10 : index
    %c0_19 = arith.constant 0 : index
    %50 = vector.load %arg1[%c10, %c0_19] : memref<36x128xf32, #tpu.memory_space<vmem>>, vector<1x128xf32>
    %51 = vector.broadcast %50 : vector<1x128xf32> to vector<16x128xf32>
    %52 = arith.mulf %49, %51 : vector<16x128xf32>
    %53 = arith.addf %48, %52 : vector<16x128xf32>
    %c3 = arith.constant 3 : index
    %c0_20 = arith.constant 0 : index
    %c0_21 = arith.constant 0 : index
    %54 = vector.load %arg0[%c3, %c0_20, %c0_21] : memref<4x36x144xf32, #tpu.memory_space<vmem>>, vector<1x16x144xf32>
    %55 = vector.shape_cast %54 : vector<1x16x144xf32> to vector<16x144xf32>
    %56 = vector.extract_strided_slice %55 {offsets = [0, 0], sizes = [16, 128], strides = [1, 1]} : vector<16x144xf32> to vector<16x128xf32>
    %c3_22 = arith.constant 3 : index
    %c0_23 = arith.constant 0 : index
    %57 = vector.load %arg1[%c3_22, %c0_23] : memref<36x128xf32, #tpu.memory_space<vmem>>, vector<1x128xf32>
    %58 = vector.broadcast %57 : vector<1x128xf32> to vector<16x128xf32>
    %59 = arith.mulf %56, %58 : vector<16x128xf32>
    %60 = arith.addf %53, %59 : vector<16x128xf32>
    %61 = vector.extract_strided_slice %55 {offsets = [0, 8], sizes = [16, 128], strides = [1, 1]} : vector<16x144xf32> to vector<16x128xf32>
    %c7 = arith.constant 7 : index
    %c0_24 = arith.constant 0 : index
    %62 = vector.load %arg1[%c7, %c0_24] : memref<36x128xf32, #tpu.memory_space<vmem>>, vector<1x128xf32>
    %63 = vector.broadcast %62 : vector<1x128xf32> to vector<16x128xf32>
    %64 = arith.mulf %61, %63 : vector<16x128xf32>
    %65 = arith.addf %60, %64 : vector<16x128xf32>
    %66 = vector.extract_strided_slice %55 {offsets = [0, 16], sizes = [16, 128], strides = [1, 1]} : vector<16x144xf32> to vector<16x128xf32>
    %c11 = arith.constant 11 : index
    %c0_25 = arith.constant 0 : index
    %67 = vector.load %arg1[%c11, %c0_25] : memref<36x128xf32, #tpu.memory_space<vmem>>, vector<1x128xf32>
    %68 = vector.broadcast %67 : vector<1x128xf32> to vector<16x128xf32>
    %69 = arith.mulf %66, %68 : vector<16x128xf32>
    %70 = arith.addf %65, %69 : vector<16x128xf32>
    %c0_26 = arith.constant 0 : index
    %c1_27 = arith.constant 1 : index
    %c0_28 = arith.constant 0 : index
    %71 = vector.load %arg0[%c0_26, %c1_27, %c0_28] : memref<4x36x144xf32, #tpu.memory_space<vmem>>, vector<1x16x144xf32>
    %72 = vector.shape_cast %71 : vector<1x16x144xf32> to vector<16x144xf32>
    %73 = vector.extract_strided_slice %72 {offsets = [0, 0], sizes = [16, 128], strides = [1, 1]} : vector<16x144xf32> to vector<16x128xf32>
    %c12 = arith.constant 12 : index
    %c0_29 = arith.constant 0 : index
    %74 = vector.load %arg1[%c12, %c0_29] : memref<36x128xf32, #tpu.memory_space<vmem>>, vector<1x128xf32>
    %75 = vector.broadcast %74 : vector<1x128xf32> to vector<16x128xf32>
    %76 = arith.mulf %73, %75 : vector<16x128xf32>
    %77 = arith.addf %70, %76 : vector<16x128xf32>
    %78 = vector.extract_strided_slice %72 {offsets = [0, 8], sizes = [16, 128], strides = [1, 1]} : vector<16x144xf32> to vector<16x128xf32>
    %c16 = arith.constant 16 : index
    %c0_30 = arith.constant 0 : index
    %79 = vector.load %arg1[%c16, %c0_30] : memref<36x128xf32, #tpu.memory_space<vmem>>, vector<1x128xf32>
    %80 = vector.broadcast %79 : vector<1x128xf32> to vector<16x128xf32>
    %81 = arith.mulf %78, %80 : vector<16x128xf32>
    %82 = arith.addf %77, %81 : vector<16x128xf32>
    %83 = vector.extract_strided_slice %72 {offsets = [0, 16], sizes = [16, 128], strides = [1, 1]} : vector<16x144xf32> to vector<16x128xf32>
    %c20 = arith.constant 20 : index
    %c0_31 = arith.constant 0 : index
    %84 = vector.load %arg1[%c20, %c0_31] : memref<36x128xf32, #tpu.memory_space<vmem>>, vector<1x128xf32>
    %85 = vector.broadcast %84 : vector<1x128xf32> to vector<16x128xf32>
    %86 = arith.mulf %83, %85 : vector<16x128xf32>
    %87 = arith.addf %82, %86 : vector<16x128xf32>
    %c1_32 = arith.constant 1 : index
    %c1_33 = arith.constant 1 : index
    %c0_34 = arith.constant 0 : index
    %88 = vector.load %arg0[%c1_32, %c1_33, %c0_34] : memref<4x36x144xf32, #tpu.memory_space<vmem>>, vector<1x16x144xf32>
    %89 = vector.shape_cast %88 : vector<1x16x144xf32> to vector<16x144xf32>
    %90 = vector.extract_strided_slice %89 {offsets = [0, 0], sizes = [16, 128], strides = [1, 1]} : vector<16x144xf32> to vector<16x128xf32>
    %c13 = arith.constant 13 : index
    %c0_35 = arith.constant 0 : index
    %91 = vector.load %arg1[%c13, %c0_35] : memref<36x128xf32, #tpu.memory_space<vmem>>, vector<1x128xf32>
    %92 = vector.broadcast %91 : vector<1x128xf32> to vector<16x128xf32>
    %93 = arith.mulf %90, %92 : vector<16x128xf32>
    %94 = arith.addf %87, %93 : vector<16x128xf32>
    %95 = vector.extract_strided_slice %89 {offsets = [0, 8], sizes = [16, 128], strides = [1, 1]} : vector<16x144xf32> to vector<16x128xf32>
    %c17 = arith.constant 17 : index
    %c0_36 = arith.constant 0 : index
    %96 = vector.load %arg1[%c17, %c0_36] : memref<36x128xf32, #tpu.memory_space<vmem>>, vector<1x128xf32>
    %97 = vector.broadcast %96 : vector<1x128xf32> to vector<16x128xf32>
    %98 = arith.mulf %95, %97 : vector<16x128xf32>
    %99 = arith.addf %94, %98 : vector<16x128xf32>
    %100 = vector.extract_strided_slice %89 {offsets = [0, 16], sizes = [16, 128], strides = [1, 1]} : vector<16x144xf32> to vector<16x128xf32>
    %c21 = arith.constant 21 : index
    %c0_37 = arith.constant 0 : index
    %101 = vector.load %arg1[%c21, %c0_37] : memref<36x128xf32, #tpu.memory_space<vmem>>, vector<1x128xf32>
    %102 = vector.broadcast %101 : vector<1x128xf32> to vector<16x128xf32>
    %103 = arith.mulf %100, %102 : vector<16x128xf32>
    %104 = arith.addf %99, %103 : vector<16x128xf32>
    %c2_38 = arith.constant 2 : index
    %c1_39 = arith.constant 1 : index
    %c0_40 = arith.constant 0 : index
    %105 = vector.load %arg0[%c2_38, %c1_39, %c0_40] : memref<4x36x144xf32, #tpu.memory_space<vmem>>, vector<1x16x144xf32>
    %106 = vector.shape_cast %105 : vector<1x16x144xf32> to vector<16x144xf32>
    %107 = vector.extract_strided_slice %106 {offsets = [0, 0], sizes = [16, 128], strides = [1, 1]} : vector<16x144xf32> to vector<16x128xf32>
    %c14 = arith.constant 14 : index
    %c0_41 = arith.constant 0 : index
    %108 = vector.load %arg1[%c14, %c0_41] : memref<36x128xf32, #tpu.memory_space<vmem>>, vector<1x128xf32>
    %109 = vector.broadcast %108 : vector<1x128xf32> to vector<16x128xf32>
    %110 = arith.mulf %107, %109 : vector<16x128xf32>
    %111 = arith.addf %104, %110 : vector<16x128xf32>
    %112 = vector.extract_strided_slice %106 {offsets = [0, 8], sizes = [16, 128], strides = [1, 1]} : vector<16x144xf32> to vector<16x128xf32>
    %c18 = arith.constant 18 : index
    %c0_42 = arith.constant 0 : index
    %113 = vector.load %arg1[%c18, %c0_42] : memref<36x128xf32, #tpu.memory_space<vmem>>, vector<1x128xf32>
    %114 = vector.broadcast %113 : vector<1x128xf32> to vector<16x128xf32>
    %115 = arith.mulf %112, %114 : vector<16x128xf32>
    %116 = arith.addf %111, %115 : vector<16x128xf32>
    %117 = vector.extract_strided_slice %106 {offsets = [0, 16], sizes = [16, 128], strides = [1, 1]} : vector<16x144xf32> to vector<16x128xf32>
    %c22 = arith.constant 22 : index
    %c0_43 = arith.constant 0 : index
    %118 = vector.load %arg1[%c22, %c0_43] : memref<36x128xf32, #tpu.memory_space<vmem>>, vector<1x128xf32>
    %119 = vector.broadcast %118 : vector<1x128xf32> to vector<16x128xf32>
    %120 = arith.mulf %117, %119 : vector<16x128xf32>
    %121 = arith.addf %116, %120 : vector<16x128xf32>
    %c3_44 = arith.constant 3 : index
    %c1_45 = arith.constant 1 : index
    %c0_46 = arith.constant 0 : index
    %122 = vector.load %arg0[%c3_44, %c1_45, %c0_46] : memref<4x36x144xf32, #tpu.memory_space<vmem>>, vector<1x16x144xf32>
    %123 = vector.shape_cast %122 : vector<1x16x144xf32> to vector<16x144xf32>
    %124 = vector.extract_strided_slice %123 {offsets = [0, 0], sizes = [16, 128], strides = [1, 1]} : vector<16x144xf32> to vector<16x128xf32>
    %c15 = arith.constant 15 : index
    %c0_47 = arith.constant 0 : index
    %125 = vector.load %arg1[%c15, %c0_47] : memref<36x128xf32, #tpu.memory_space<vmem>>, vector<1x128xf32>
    %126 = vector.broadcast %125 : vector<1x128xf32> to vector<16x128xf32>
    %127 = arith.mulf %124, %126 : vector<16x128xf32>
    %128 = arith.addf %121, %127 : vector<16x128xf32>
    %129 = vector.extract_strided_slice %123 {offsets = [0, 8], sizes = [16, 128], strides = [1, 1]} : vector<16x144xf32> to vector<16x128xf32>
    %c19 = arith.constant 19 : index
    %c0_48 = arith.constant 0 : index
    %130 = vector.load %arg1[%c19, %c0_48] : memref<36x128xf32, #tpu.memory_space<vmem>>, vector<1x128xf32>
    %131 = vector.broadcast %130 : vector<1x128xf32> to vector<16x128xf32>
    %132 = arith.mulf %129, %131 : vector<16x128xf32>
    %133 = arith.addf %128, %132 : vector<16x128xf32>
    %134 = vector.extract_strided_slice %123 {offsets = [0, 16], sizes = [16, 128], strides = [1, 1]} : vector<16x144xf32> to vector<16x128xf32>
    %c23 = arith.constant 23 : index
    %c0_49 = arith.constant 0 : index
    %135 = vector.load %arg1[%c23, %c0_49] : memref<36x128xf32, #tpu.memory_space<vmem>>, vector<1x128xf32>
    %136 = vector.broadcast %135 : vector<1x128xf32> to vector<16x128xf32>
    %137 = arith.mulf %134, %136 : vector<16x128xf32>
    %138 = arith.addf %133, %137 : vector<16x128xf32>
    %c0_50 = arith.constant 0 : index
    %c2_51 = arith.constant 2 : index
    %c0_52 = arith.constant 0 : index
    %139 = vector.load %arg0[%c0_50, %c2_51, %c0_52] : memref<4x36x144xf32, #tpu.memory_space<vmem>>, vector<1x16x144xf32>
    %140 = vector.shape_cast %139 : vector<1x16x144xf32> to vector<16x144xf32>
    %141 = vector.extract_strided_slice %140 {offsets = [0, 0], sizes = [16, 128], strides = [1, 1]} : vector<16x144xf32> to vector<16x128xf32>
    %c24 = arith.constant 24 : index
    %c0_53 = arith.constant 0 : index
    %142 = vector.load %arg1[%c24, %c0_53] : memref<36x128xf32, #tpu.memory_space<vmem>>, vector<1x128xf32>
    %143 = vector.broadcast %142 : vector<1x128xf32> to vector<16x128xf32>
    %144 = arith.mulf %141, %143 : vector<16x128xf32>
    %145 = arith.addf %138, %144 : vector<16x128xf32>
    %146 = vector.extract_strided_slice %140 {offsets = [0, 8], sizes = [16, 128], strides = [1, 1]} : vector<16x144xf32> to vector<16x128xf32>
    %c28 = arith.constant 28 : index
    %c0_54 = arith.constant 0 : index
    %147 = vector.load %arg1[%c28, %c0_54] : memref<36x128xf32, #tpu.memory_space<vmem>>, vector<1x128xf32>
    %148 = vector.broadcast %147 : vector<1x128xf32> to vector<16x128xf32>
    %149 = arith.mulf %146, %148 : vector<16x128xf32>
    %150 = arith.addf %145, %149 : vector<16x128xf32>
    %151 = vector.extract_strided_slice %140 {offsets = [0, 16], sizes = [16, 128], strides = [1, 1]} : vector<16x144xf32> to vector<16x128xf32>
    %c32 = arith.constant 32 : index
    %c0_55 = arith.constant 0 : index
    %152 = vector.load %arg1[%c32, %c0_55] : memref<36x128xf32, #tpu.memory_space<vmem>>, vector<1x128xf32>
    %153 = vector.broadcast %152 : vector<1x128xf32> to vector<16x128xf32>
    %154 = arith.mulf %151, %153 : vector<16x128xf32>
    %155 = arith.addf %150, %154 : vector<16x128xf32>
    %c1_56 = arith.constant 1 : index
    %c2_57 = arith.constant 2 : index
    %c0_58 = arith.constant 0 : index
    %156 = vector.load %arg0[%c1_56, %c2_57, %c0_58] : memref<4x36x144xf32, #tpu.memory_space<vmem>>, vector<1x16x144xf32>
    %157 = vector.shape_cast %156 : vector<1x16x144xf32> to vector<16x144xf32>
    %158 = vector.extract_strided_slice %157 {offsets = [0, 0], sizes = [16, 128], strides = [1, 1]} : vector<16x144xf32> to vector<16x128xf32>
    %c25 = arith.constant 25 : index
    %c0_59 = arith.constant 0 : index
    %159 = vector.load %arg1[%c25, %c0_59] : memref<36x128xf32, #tpu.memory_space<vmem>>, vector<1x128xf32>
    %160 = vector.broadcast %159 : vector<1x128xf32> to vector<16x128xf32>
    %161 = arith.mulf %158, %160 : vector<16x128xf32>
    %162 = arith.addf %155, %161 : vector<16x128xf32>
    %163 = vector.extract_strided_slice %157 {offsets = [0, 8], sizes = [16, 128], strides = [1, 1]} : vector<16x144xf32> to vector<16x128xf32>
    %c29 = arith.constant 29 : index
    %c0_60 = arith.constant 0 : index
    %164 = vector.load %arg1[%c29, %c0_60] : memref<36x128xf32, #tpu.memory_space<vmem>>, vector<1x128xf32>
    %165 = vector.broadcast %164 : vector<1x128xf32> to vector<16x128xf32>
    %166 = arith.mulf %163, %165 : vector<16x128xf32>
    %167 = arith.addf %162, %166 : vector<16x128xf32>
    %168 = vector.extract_strided_slice %157 {offsets = [0, 16], sizes = [16, 128], strides = [1, 1]} : vector<16x144xf32> to vector<16x128xf32>
    %c33 = arith.constant 33 : index
    %c0_61 = arith.constant 0 : index
    %169 = vector.load %arg1[%c33, %c0_61] : memref<36x128xf32, #tpu.memory_space<vmem>>, vector<1x128xf32>
    %170 = vector.broadcast %169 : vector<1x128xf32> to vector<16x128xf32>
    %171 = arith.mulf %168, %170 : vector<16x128xf32>
    %172 = arith.addf %167, %171 : vector<16x128xf32>
    %c2_62 = arith.constant 2 : index
    %c2_63 = arith.constant 2 : index
    %c0_64 = arith.constant 0 : index
    %173 = vector.load %arg0[%c2_62, %c2_63, %c0_64] : memref<4x36x144xf32, #tpu.memory_space<vmem>>, vector<1x16x144xf32>
    %174 = vector.shape_cast %173 : vector<1x16x144xf32> to vector<16x144xf32>
    %175 = vector.extract_strided_slice %174 {offsets = [0, 0], sizes = [16, 128], strides = [1, 1]} : vector<16x144xf32> to vector<16x128xf32>
    %c26 = arith.constant 26 : index
    %c0_65 = arith.constant 0 : index
    %176 = vector.load %arg1[%c26, %c0_65] : memref<36x128xf32, #tpu.memory_space<vmem>>, vector<1x128xf32>
    %177 = vector.broadcast %176 : vector<1x128xf32> to vector<16x128xf32>
    %178 = arith.mulf %175, %177 : vector<16x128xf32>
    %179 = arith.addf %172, %178 : vector<16x128xf32>
    %180 = vector.extract_strided_slice %174 {offsets = [0, 8], sizes = [16, 128], strides = [1, 1]} : vector<16x144xf32> to vector<16x128xf32>
    %c30 = arith.constant 30 : index
    %c0_66 = arith.constant 0 : index
    %181 = vector.load %arg1[%c30, %c0_66] : memref<36x128xf32, #tpu.memory_space<vmem>>, vector<1x128xf32>
    %182 = vector.broadcast %181 : vector<1x128xf32> to vector<16x128xf32>
    %183 = arith.mulf %180, %182 : vector<16x128xf32>
    %184 = arith.addf %179, %183 : vector<16x128xf32>
    %185 = vector.extract_strided_slice %174 {offsets = [0, 16], sizes = [16, 128], strides = [1, 1]} : vector<16x144xf32> to vector<16x128xf32>
    %c34 = arith.constant 34 : index
    %c0_67 = arith.constant 0 : index
    %186 = vector.load %arg1[%c34, %c0_67] : memref<36x128xf32, #tpu.memory_space<vmem>>, vector<1x128xf32>
    %187 = vector.broadcast %186 : vector<1x128xf32> to vector<16x128xf32>
    %188 = arith.mulf %185, %187 : vector<16x128xf32>
    %189 = arith.addf %184, %188 : vector<16x128xf32>
    %c3_68 = arith.constant 3 : index
    %c2_69 = arith.constant 2 : index
    %c0_70 = arith.constant 0 : index
    %190 = vector.load %arg0[%c3_68, %c2_69, %c0_70] : memref<4x36x144xf32, #tpu.memory_space<vmem>>, vector<1x16x144xf32>
    %191 = vector.shape_cast %190 : vector<1x16x144xf32> to vector<16x144xf32>
    %192 = vector.extract_strided_slice %191 {offsets = [0, 0], sizes = [16, 128], strides = [1, 1]} : vector<16x144xf32> to vector<16x128xf32>
    %c27 = arith.constant 27 : index
    %c0_71 = arith.constant 0 : index
    %193 = vector.load %arg1[%c27, %c0_71] : memref<36x128xf32, #tpu.memory_space<vmem>>, vector<1x128xf32>
    %194 = vector.broadcast %193 : vector<1x128xf32> to vector<16x128xf32>
    %195 = arith.mulf %192, %194 : vector<16x128xf32>
    %196 = arith.addf %189, %195 : vector<16x128xf32>
    %197 = vector.extract_strided_slice %191 {offsets = [0, 8], sizes = [16, 128], strides = [1, 1]} : vector<16x144xf32> to vector<16x128xf32>
    %c31 = arith.constant 31 : index
    %c0_72 = arith.constant 0 : index
    %198 = vector.load %arg1[%c31, %c0_72] : memref<36x128xf32, #tpu.memory_space<vmem>>, vector<1x128xf32>
    %199 = vector.broadcast %198 : vector<1x128xf32> to vector<16x128xf32>
    %200 = arith.mulf %197, %199 : vector<16x128xf32>
    %201 = arith.addf %196, %200 : vector<16x128xf32>
    %202 = vector.extract_strided_slice %191 {offsets = [0, 16], sizes = [16, 128], strides = [1, 1]} : vector<16x144xf32> to vector<16x128xf32>
    %c35 = arith.constant 35 : index
    %c0_73 = arith.constant 0 : index
    %203 = vector.load %arg1[%c35, %c0_73] : memref<36x128xf32, #tpu.memory_space<vmem>>, vector<1x128xf32>
    %204 = vector.broadcast %203 : vector<1x128xf32> to vector<16x128xf32>
    %205 = arith.mulf %202, %204 : vector<16x128xf32>
    %206 = arith.addf %201, %205 : vector<16x128xf32>
    %cst = arith.constant 0.000000e+00 : f32
    %207 = vector.broadcast %cst : f32 to vector<16x128xf32>
    %208 = arith.maximumf %206, %207 : vector<16x128xf32>
    %c0_74 = arith.constant 0 : index
    %c0_75 = arith.constant 0 : index
    %209 = vector.load %arg3[%c0_74, %c0_75] : memref<32x128xf32, #tpu.memory_space<vmem>>, vector<16x128xf32>
    tpu.vector_store %arg3[%c0_74, %c0_75], %208 {strides = array<i32>} : memref<32x128xf32, #tpu.memory_space<vmem>>, vector<16x128xf32>,
    %c0_76 = arith.constant 0 : index
    %c0_77 = arith.constant 0 : index
    %210 = vector.load %arg2[%c0_76, %c0_77] : memref<1x128xf32, #tpu.memory_space<vmem>>, vector<1x128xf32>
    %211 = vector.shape_cast %210 : vector<1x128xf32> to vector<1x128xf32>
    %212 = vector.broadcast %211 : vector<1x128xf32> to vector<16x128xf32>
    %c0_78 = arith.constant 0 : index
    %c18_79 = arith.constant 18 : index
    %c0_80 = arith.constant 0 : index
    %213 = vector.load %arg0[%c0_78, %c18_79, %c0_80] : memref<4x36x144xf32, #tpu.memory_space<vmem>>, vector<1x16x144xf32>
    %214 = vector.shape_cast %213 : vector<1x16x144xf32> to vector<16x144xf32>
    %215 = vector.extract_strided_slice %214 {offsets = [0, 0], sizes = [16, 128], strides = [1, 1]} : vector<16x144xf32> to vector<16x128xf32>
    %c0_81 = arith.constant 0 : index
    %c0_82 = arith.constant 0 : index
    %216 = vector.load %arg1[%c0_81, %c0_82] : memref<36x128xf32, #tpu.memory_space<vmem>>, vector<1x128xf32>
    %217 = vector.broadcast %216 : vector<1x128xf32> to vector<16x128xf32>
    %218 = arith.mulf %215, %217 : vector<16x128xf32>
    %219 = arith.addf %212, %218 : vector<16x128xf32>
    %220 = vector.extract_strided_slice %214 {offsets = [0, 8], sizes = [16, 128], strides = [1, 1]} : vector<16x144xf32> to vector<16x128xf32>
    %c4_83 = arith.constant 4 : index
    %c0_84 = arith.constant 0 : index
    %221 = vector.load %arg1[%c4_83, %c0_84] : memref<36x128xf32, #tpu.memory_space<vmem>>, vector<1x128xf32>
    %222 = vector.broadcast %221 : vector<1x128xf32> to vector<16x128xf32>
    %223 = arith.mulf %220, %222 : vector<16x128xf32>
    %224 = arith.addf %219, %223 : vector<16x128xf32>
    %225 = vector.extract_strided_slice %214 {offsets = [0, 16], sizes = [16, 128], strides = [1, 1]} : vector<16x144xf32> to vector<16x128xf32>
    %c8_85 = arith.constant 8 : index
    %c0_86 = arith.constant 0 : index
    %226 = vector.load %arg1[%c8_85, %c0_86] : memref<36x128xf32, #tpu.memory_space<vmem>>, vector<1x128xf32>
    %227 = vector.broadcast %226 : vector<1x128xf32> to vector<16x128xf32>
    %228 = arith.mulf %225, %227 : vector<16x128xf32>
    %229 = arith.addf %224, %228 : vector<16x128xf32>
    %c1_87 = arith.constant 1 : index
    %c18_88 = arith.constant 18 : index
    %c0_89 = arith.constant 0 : index
    %230 = vector.load %arg0[%c1_87, %c18_88, %c0_89] : memref<4x36x144xf32, #tpu.memory_space<vmem>>, vector<1x16x144xf32>
    %231 = vector.shape_cast %230 : vector<1x16x144xf32> to vector<16x144xf32>
    %232 = vector.extract_strided_slice %231 {offsets = [0, 0], sizes = [16, 128], strides = [1, 1]} : vector<16x144xf32> to vector<16x128xf32>
    %c1_90 = arith.constant 1 : index
    %c0_91 = arith.constant 0 : index
    %233 = vector.load %arg1[%c1_90, %c0_91] : memref<36x128xf32, #tpu.memory_space<vmem>>, vector<1x128xf32>
    %234 = vector.broadcast %233 : vector<1x128xf32> to vector<16x128xf32>
    %235 = arith.mulf %232, %234 : vector<16x128xf32>
    %236 = arith.addf %229, %235 : vector<16x128xf32>
    %237 = vector.extract_strided_slice %231 {offsets = [0, 8], sizes = [16, 128], strides = [1, 1]} : vector<16x144xf32> to vector<16x128xf32>
    %c5_92 = arith.constant 5 : index
    %c0_93 = arith.constant 0 : index
    %238 = vector.load %arg1[%c5_92, %c0_93] : memref<36x128xf32, #tpu.memory_space<vmem>>, vector<1x128xf32>
    %239 = vector.broadcast %238 : vector<1x128xf32> to vector<16x128xf32>
    %240 = arith.mulf %237, %239 : vector<16x128xf32>
    %241 = arith.addf %236, %240 : vector<16x128xf32>
    %242 = vector.extract_strided_slice %231 {offsets = [0, 16], sizes = [16, 128], strides = [1, 1]} : vector<16x144xf32> to vector<16x128xf32>
    %c9_94 = arith.constant 9 : index
    %c0_95 = arith.constant 0 : index
    %243 = vector.load %arg1[%c9_94, %c0_95] : memref<36x128xf32, #tpu.memory_space<vmem>>, vector<1x128xf32>
    %244 = vector.broadcast %243 : vector<1x128xf32> to vector<16x128xf32>
    %245 = arith.mulf %242, %244 : vector<16x128xf32>
    %246 = arith.addf %241, %245 : vector<16x128xf32>
    %c2_96 = arith.constant 2 : index
    %c18_97 = arith.constant 18 : index
    %c0_98 = arith.constant 0 : index
    %247 = vector.load %arg0[%c2_96, %c18_97, %c0_98] : memref<4x36x144xf32, #tpu.memory_space<vmem>>, vector<1x16x144xf32>
    %248 = vector.shape_cast %247 : vector<1x16x144xf32> to vector<16x144xf32>
    %249 = vector.extract_strided_slice %248 {offsets = [0, 0], sizes = [16, 128], strides = [1, 1]} : vector<16x144xf32> to vector<16x128xf32>
    %c2_99 = arith.constant 2 : index
    %c0_100 = arith.constant 0 : index
    %250 = vector.load %arg1[%c2_99, %c0_100] : memref<36x128xf32, #tpu.memory_space<vmem>>, vector<1x128xf32>
    %251 = vector.broadcast %250 : vector<1x128xf32> to vector<16x128xf32>
    %252 = arith.mulf %249, %251 : vector<16x128xf32>
    %253 = arith.addf %246, %252 : vector<16x128xf32>
    %254 = vector.extract_strided_slice %248 {offsets = [0, 8], sizes = [16, 128], strides = [1, 1]} : vector<16x144xf32> to vector<16x128xf32>
    %c6_101 = arith.constant 6 : index
    %c0_102 = arith.constant 0 : index
    %255 = vector.load %arg1[%c6_101, %c0_102] : memref<36x128xf32, #tpu.memory_space<vmem>>, vector<1x128xf32>
    %256 = vector.broadcast %255 : vector<1x128xf32> to vector<16x128xf32>
    %257 = arith.mulf %254, %256 : vector<16x128xf32>
    %258 = arith.addf %253, %257 : vector<16x128xf32>
    %259 = vector.extract_strided_slice %248 {offsets = [0, 16], sizes = [16, 128], strides = [1, 1]} : vector<16x144xf32> to vector<16x128xf32>
    %c10_103 = arith.constant 10 : index
    %c0_104 = arith.constant 0 : index
    %260 = vector.load %arg1[%c10_103, %c0_104] : memref<36x128xf32, #tpu.memory_space<vmem>>, vector<1x128xf32>
    %261 = vector.broadcast %260 : vector<1x128xf32> to vector<16x128xf32>
    %262 = arith.mulf %259, %261 : vector<16x128xf32>
    %263 = arith.addf %258, %262 : vector<16x128xf32>
    %c3_105 = arith.constant 3 : index
    %c18_106 = arith.constant 18 : index
    %c0_107 = arith.constant 0 : index
    %264 = vector.load %arg0[%c3_105, %c18_106, %c0_107] : memref<4x36x144xf32, #tpu.memory_space<vmem>>, vector<1x16x144xf32>
    %265 = vector.shape_cast %264 : vector<1x16x144xf32> to vector<16x144xf32>
    %266 = vector.extract_strided_slice %265 {offsets = [0, 0], sizes = [16, 128], strides = [1, 1]} : vector<16x144xf32> to vector<16x128xf32>
    %c3_108 = arith.constant 3 : index
    %c0_109 = arith.constant 0 : index
    %267 = vector.load %arg1[%c3_108, %c0_109] : memref<36x128xf32, #tpu.memory_space<vmem>>, vector<1x128xf32>
    %268 = vector.broadcast %267 : vector<1x128xf32> to vector<16x128xf32>
    %269 = arith.mulf %266, %268 : vector<16x128xf32>
    %270 = arith.addf %263, %269 : vector<16x128xf32>
    %271 = vector.extract_strided_slice %265 {offsets = [0, 8], sizes = [16, 128], strides = [1, 1]} : vector<16x144xf32> to vector<16x128xf32>
    %c7_110 = arith.constant 7 : index
    %c0_111 = arith.constant 0 : index
    %272 = vector.load %arg1[%c7_110, %c0_111] : memref<36x128xf32, #tpu.memory_space<vmem>>, vector<1x128xf32>
    %273 = vector.broadcast %272 : vector<1x128xf32> to vector<16x128xf32>
    %274 = arith.mulf %271, %273 : vector<16x128xf32>
    %275 = arith.addf %270, %274 : vector<16x128xf32>
    %276 = vector.extract_strided_slice %265 {offsets = [0, 16], sizes = [16, 128], strides = [1, 1]} : vector<16x144xf32> to vector<16x128xf32>
    %c11_112 = arith.constant 11 : index
    %c0_113 = arith.constant 0 : index
    %277 = vector.load %arg1[%c11_112, %c0_113] : memref<36x128xf32, #tpu.memory_space<vmem>>, vector<1x128xf32>
    %278 = vector.broadcast %277 : vector<1x128xf32> to vector<16x128xf32>
    %279 = arith.mulf %276, %278 : vector<16x128xf32>
    %280 = arith.addf %275, %279 : vector<16x128xf32>
    %c0_114 = arith.constant 0 : index
    %c19_115 = arith.constant 19 : index
    %c0_116 = arith.constant 0 : index
    %281 = vector.load %arg0[%c0_114, %c19_115, %c0_116] : memref<4x36x144xf32, #tpu.memory_space<vmem>>, vector<1x16x144xf32>
    %282 = vector.shape_cast %281 : vector<1x16x144xf32> to vector<16x144xf32>
    %283 = vector.extract_strided_slice %282 {offsets = [0, 0], sizes = [16, 128], strides = [1, 1]} : vector<16x144xf32> to vector<16x128xf32>
    %c12_117 = arith.constant 12 : index
    %c0_118 = arith.constant 0 : index
    %284 = vector.load %arg1[%c12_117, %c0_118] : memref<36x128xf32, #tpu.memory_space<vmem>>, vector<1x128xf32>
    %285 = vector.broadcast %284 : vector<1x128xf32> to vector<16x128xf32>
    %286 = arith.mulf %283, %285 : vector<16x128xf32>
    %287 = arith.addf %280, %286 : vector<16x128xf32>
    %288 = vector.extract_strided_slice %282 {offsets = [0, 8], sizes = [16, 128], strides = [1, 1]} : vector<16x144xf32> to vector<16x128xf32>
    %c16_119 = arith.constant 16 : index
    %c0_120 = arith.constant 0 : index
    %289 = vector.load %arg1[%c16_119, %c0_120] : memref<36x128xf32, #tpu.memory_space<vmem>>, vector<1x128xf32>
    %290 = vector.broadcast %289 : vector<1x128xf32> to vector<16x128xf32>
    %291 = arith.mulf %288, %290 : vector<16x128xf32>
    %292 = arith.addf %287, %291 : vector<16x128xf32>
    %293 = vector.extract_strided_slice %282 {offsets = [0, 16], sizes = [16, 128], strides = [1, 1]} : vector<16x144xf32> to vector<16x128xf32>
    %c20_121 = arith.constant 20 : index
    %c0_122 = arith.constant 0 : index
    %294 = vector.load %arg1[%c20_121, %c0_122] : memref<36x128xf32, #tpu.memory_space<vmem>>, vector<1x128xf32>
    %295 = vector.broadcast %294 : vector<1x128xf32> to vector<16x128xf32>
    %296 = arith.mulf %293, %295 : vector<16x128xf32>
    %297 = arith.addf %292, %296 : vector<16x128xf32>
    %c1_123 = arith.constant 1 : index
    %c19_124 = arith.constant 19 : index
    %c0_125 = arith.constant 0 : index
    %298 = vector.load %arg0[%c1_123, %c19_124, %c0_125] : memref<4x36x144xf32, #tpu.memory_space<vmem>>, vector<1x16x144xf32>
    %299 = vector.shape_cast %298 : vector<1x16x144xf32> to vector<16x144xf32>
    %300 = vector.extract_strided_slice %299 {offsets = [0, 0], sizes = [16, 128], strides = [1, 1]} : vector<16x144xf32> to vector<16x128xf32>
    %c13_126 = arith.constant 13 : index
    %c0_127 = arith.constant 0 : index
    %301 = vector.load %arg1[%c13_126, %c0_127] : memref<36x128xf32, #tpu.memory_space<vmem>>, vector<1x128xf32>
    %302 = vector.broadcast %301 : vector<1x128xf32> to vector<16x128xf32>
    %303 = arith.mulf %300, %302 : vector<16x128xf32>
    %304 = arith.addf %297, %303 : vector<16x128xf32>
    %305 = vector.extract_strided_slice %299 {offsets = [0, 8], sizes = [16, 128], strides = [1, 1]} : vector<16x144xf32> to vector<16x128xf32>
    %c17_128 = arith.constant 17 : index
    %c0_129 = arith.constant 0 : index
    %306 = vector.load %arg1[%c17_128, %c0_129] : memref<36x128xf32, #tpu.memory_space<vmem>>, vector<1x128xf32>
    %307 = vector.broadcast %306 : vector<1x128xf32> to vector<16x128xf32>
    %308 = arith.mulf %305, %307 : vector<16x128xf32>
    %309 = arith.addf %304, %308 : vector<16x128xf32>
    %310 = vector.extract_strided_slice %299 {offsets = [0, 16], sizes = [16, 128], strides = [1, 1]} : vector<16x144xf32> to vector<16x128xf32>
    %c21_130 = arith.constant 21 : index
    %c0_131 = arith.constant 0 : index
    %311 = vector.load %arg1[%c21_130, %c0_131] : memref<36x128xf32, #tpu.memory_space<vmem>>, vector<1x128xf32>
    %312 = vector.broadcast %311 : vector<1x128xf32> to vector<16x128xf32>
    %313 = arith.mulf %310, %312 : vector<16x128xf32>
    %314 = arith.addf %309, %313 : vector<16x128xf32>
    %c2_132 = arith.constant 2 : index
    %c19_133 = arith.constant 19 : index
    %c0_134 = arith.constant 0 : index
    %315 = vector.load %arg0[%c2_132, %c19_133, %c0_134] : memref<4x36x144xf32, #tpu.memory_space<vmem>>, vector<1x16x144xf32>
    %316 = vector.shape_cast %315 : vector<1x16x144xf32> to vector<16x144xf32>
    %317 = vector.extract_strided_slice %316 {offsets = [0, 0], sizes = [16, 128], strides = [1, 1]} : vector<16x144xf32> to vector<16x128xf32>
    %c14_135 = arith.constant 14 : index
    %c0_136 = arith.constant 0 : index
    %318 = vector.load %arg1[%c14_135, %c0_136] : memref<36x128xf32, #tpu.memory_space<vmem>>, vector<1x128xf32>
    %319 = vector.broadcast %318 : vector<1x128xf32> to vector<16x128xf32>
    %320 = arith.mulf %317, %319 : vector<16x128xf32>
    %321 = arith.addf %314, %320 : vector<16x128xf32>
    %322 = vector.extract_strided_slice %316 {offsets = [0, 8], sizes = [16, 128], strides = [1, 1]} : vector<16x144xf32> to vector<16x128xf32>
    %c18_137 = arith.constant 18 : index
    %c0_138 = arith.constant 0 : index
    %323 = vector.load %arg1[%c18_137, %c0_138] : memref<36x128xf32, #tpu.memory_space<vmem>>, vector<1x128xf32>
    %324 = vector.broadcast %323 : vector<1x128xf32> to vector<16x128xf32>
    %325 = arith.mulf %322, %324 : vector<16x128xf32>
    %326 = arith.addf %321, %325 : vector<16x128xf32>
    %327 = vector.extract_strided_slice %316 {offsets = [0, 16], sizes = [16, 128], strides = [1, 1]} : vector<16x144xf32> to vector<16x128xf32>
    %c22_139 = arith.constant 22 : index
    %c0_140 = arith.constant 0 : index
    %328 = vector.load %arg1[%c22_139, %c0_140] : memref<36x128xf32, #tpu.memory_space<vmem>>, vector<1x128xf32>
    %329 = vector.broadcast %328 : vector<1x128xf32> to vector<16x128xf32>
    %330 = arith.mulf %327, %329 : vector<16x128xf32>
    %331 = arith.addf %326, %330 : vector<16x128xf32>
    %c3_141 = arith.constant 3 : index
    %c19_142 = arith.constant 19 : index
    %c0_143 = arith.constant 0 : index
    %332 = vector.load %arg0[%c3_141, %c19_142, %c0_143] : memref<4x36x144xf32, #tpu.memory_space<vmem>>, vector<1x16x144xf32>
    %333 = vector.shape_cast %332 : vector<1x16x144xf32> to vector<16x144xf32>
    %334 = vector.extract_strided_slice %333 {offsets = [0, 0], sizes = [16, 128], strides = [1, 1]} : vector<16x144xf32> to vector<16x128xf32>
    %c15_144 = arith.constant 15 : index
    %c0_145 = arith.constant 0 : index
    %335 = vector.load %arg1[%c15_144, %c0_145] : memref<36x128xf32, #tpu.memory_space<vmem>>, vector<1x128xf32>
    %336 = vector.broadcast %335 : vector<1x128xf32> to vector<16x128xf32>
    %337 = arith.mulf %334, %336 : vector<16x128xf32>
    %338 = arith.addf %331, %337 : vector<16x128xf32>
    %339 = vector.extract_strided_slice %333 {offsets = [0, 8], sizes = [16, 128], strides = [1, 1]} : vector<16x144xf32> to vector<16x128xf32>
    %c19_146 = arith.constant 19 : index
    %c0_147 = arith.constant 0 : index
    %340 = vector.load %arg1[%c19_146, %c0_147] : memref<36x128xf32, #tpu.memory_space<vmem>>, vector<1x128xf32>
    %341 = vector.broadcast %340 : vector<1x128xf32> to vector<16x128xf32>
    %342 = arith.mulf %339, %341 : vector<16x128xf32>
    %343 = arith.addf %338, %342 : vector<16x128xf32>
    %344 = vector.extract_strided_slice %333 {offsets = [0, 16], sizes = [16, 128], strides = [1, 1]} : vector<16x144xf32> to vector<16x128xf32>
    %c23_148 = arith.constant 23 : index
    %c0_149 = arith.constant 0 : index
    %345 = vector.load %arg1[%c23_148, %c0_149] : memref<36x128xf32, #tpu.memory_space<vmem>>, vector<1x128xf32>
    %346 = vector.broadcast %345 : vector<1x128xf32> to vector<16x128xf32>
    %347 = arith.mulf %344, %346 : vector<16x128xf32>
    %348 = arith.addf %343, %347 : vector<16x128xf32>
    %c0_150 = arith.constant 0 : index
    %c20_151 = arith.constant 20 : index
    %c0_152 = arith.constant 0 : index
    %349 = vector.load %arg0[%c0_150, %c20_151, %c0_152] : memref<4x36x144xf32, #tpu.memory_space<vmem>>, vector<1x16x144xf32>
    %350 = vector.shape_cast %349 : vector<1x16x144xf32> to vector<16x144xf32>
    %351 = vector.extract_strided_slice %350 {offsets = [0, 0], sizes = [16, 128], strides = [1, 1]} : vector<16x144xf32> to vector<16x128xf32>
    %c24_153 = arith.constant 24 : index
    %c0_154 = arith.constant 0 : index
    %352 = vector.load %arg1[%c24_153, %c0_154] : memref<36x128xf32, #tpu.memory_space<vmem>>, vector<1x128xf32>
    %353 = vector.broadcast %352 : vector<1x128xf32> to vector<16x128xf32>
    %354 = arith.mulf %351, %353 : vector<16x128xf32>
    %355 = arith.addf %348, %354 : vector<16x128xf32>
    %356 = vector.extract_strided_slice %350 {offsets = [0, 8], sizes = [16, 128], strides = [1, 1]} : vector<16x144xf32> to vector<16x128xf32>
    %c28_155 = arith.constant 28 : index
    %c0_156 = arith.constant 0 : index
    %357 = vector.load %arg1[%c28_155, %c0_156] : memref<36x128xf32, #tpu.memory_space<vmem>>, vector<1x128xf32>
    %358 = vector.broadcast %357 : vector<1x128xf32> to vector<16x128xf32>
    %359 = arith.mulf %356, %358 : vector<16x128xf32>
    %360 = arith.addf %355, %359 : vector<16x128xf32>
    %361 = vector.extract_strided_slice %350 {offsets = [0, 16], sizes = [16, 128], strides = [1, 1]} : vector<16x144xf32> to vector<16x128xf32>
    %c32_157 = arith.constant 32 : index
    %c0_158 = arith.constant 0 : index
    %362 = vector.load %arg1[%c32_157, %c0_158] : memref<36x128xf32, #tpu.memory_space<vmem>>, vector<1x128xf32>
    %363 = vector.broadcast %362 : vector<1x128xf32> to vector<16x128xf32>
    %364 = arith.mulf %361, %363 : vector<16x128xf32>
    %365 = arith.addf %360, %364 : vector<16x128xf32>
    %c1_159 = arith.constant 1 : index
    %c20_160 = arith.constant 20 : index
    %c0_161 = arith.constant 0 : index
    %366 = vector.load %arg0[%c1_159, %c20_160, %c0_161] : memref<4x36x144xf32, #tpu.memory_space<vmem>>, vector<1x16x144xf32>
    %367 = vector.shape_cast %366 : vector<1x16x144xf32> to vector<16x144xf32>
    %368 = vector.extract_strided_slice %367 {offsets = [0, 0], sizes = [16, 128], strides = [1, 1]} : vector<16x144xf32> to vector<16x128xf32>
    %c25_162 = arith.constant 25 : index
    %c0_163 = arith.constant 0 : index
    %369 = vector.load %arg1[%c25_162, %c0_163] : memref<36x128xf32, #tpu.memory_space<vmem>>, vector<1x128xf32>
    %370 = vector.broadcast %369 : vector<1x128xf32> to vector<16x128xf32>
    %371 = arith.mulf %368, %370 : vector<16x128xf32>
    %372 = arith.addf %365, %371 : vector<16x128xf32>
    %373 = vector.extract_strided_slice %367 {offsets = [0, 8], sizes = [16, 128], strides = [1, 1]} : vector<16x144xf32> to vector<16x128xf32>
    %c29_164 = arith.constant 29 : index
    %c0_165 = arith.constant 0 : index
    %374 = vector.load %arg1[%c29_164, %c0_165] : memref<36x128xf32, #tpu.memory_space<vmem>>, vector<1x128xf32>
    %375 = vector.broadcast %374 : vector<1x128xf32> to vector<16x128xf32>
    %376 = arith.mulf %373, %375 : vector<16x128xf32>
    %377 = arith.addf %372, %376 : vector<16x128xf32>
    %378 = vector.extract_strided_slice %367 {offsets = [0, 16], sizes = [16, 128], strides = [1, 1]} : vector<16x144xf32> to vector<16x128xf32>
    %c33_166 = arith.constant 33 : index
    %c0_167 = arith.constant 0 : index
    %379 = vector.load %arg1[%c33_166, %c0_167] : memref<36x128xf32, #tpu.memory_space<vmem>>, vector<1x128xf32>
    %380 = vector.broadcast %379 : vector<1x128xf32> to vector<16x128xf32>
    %381 = arith.mulf %378, %380 : vector<16x128xf32>
    %382 = arith.addf %377, %381 : vector<16x128xf32>
    %c2_168 = arith.constant 2 : index
    %c20_169 = arith.constant 20 : index
    %c0_170 = arith.constant 0 : index
    %383 = vector.load %arg0[%c2_168, %c20_169, %c0_170] : memref<4x36x144xf32, #tpu.memory_space<vmem>>, vector<1x16x144xf32>
    %384 = vector.shape_cast %383 : vector<1x16x144xf32> to vector<16x144xf32>
    %385 = vector.extract_strided_slice %384 {offsets = [0, 0], sizes = [16, 128], strides = [1, 1]} : vector<16x144xf32> to vector<16x128xf32>
    %c26_171 = arith.constant 26 : index
    %c0_172 = arith.constant 0 : index
    %386 = vector.load %arg1[%c26_171, %c0_172] : memref<36x128xf32, #tpu.memory_space<vmem>>, vector<1x128xf32>
    %387 = vector.broadcast %386 : vector<1x128xf32> to vector<16x128xf32>
    %388 = arith.mulf %385, %387 : vector<16x128xf32>
    %389 = arith.addf %382, %388 : vector<16x128xf32>
    %390 = vector.extract_strided_slice %384 {offsets = [0, 8], sizes = [16, 128], strides = [1, 1]} : vector<16x144xf32> to vector<16x128xf32>
    %c30_173 = arith.constant 30 : index
    %c0_174 = arith.constant 0 : index
    %391 = vector.load %arg1[%c30_173, %c0_174] : memref<36x128xf32, #tpu.memory_space<vmem>>, vector<1x128xf32>
    %392 = vector.broadcast %391 : vector<1x128xf32> to vector<16x128xf32>
    %393 = arith.mulf %390, %392 : vector<16x128xf32>
    %394 = arith.addf %389, %393 : vector<16x128xf32>
    %395 = vector.extract_strided_slice %384 {offsets = [0, 16], sizes = [16, 128], strides = [1, 1]} : vector<16x144xf32> to vector<16x128xf32>
    %c34_175 = arith.constant 34 : index
    %c0_176 = arith.constant 0 : index
    %396 = vector.load %arg1[%c34_175, %c0_176] : memref<36x128xf32, #tpu.memory_space<vmem>>, vector<1x128xf32>
    %397 = vector.broadcast %396 : vector<1x128xf32> to vector<16x128xf32>
    %398 = arith.mulf %395, %397 : vector<16x128xf32>
    %399 = arith.addf %394, %398 : vector<16x128xf32>
    %c3_177 = arith.constant 3 : index
    %c20_178 = arith.constant 20 : index
    %c0_179 = arith.constant 0 : index
    %400 = vector.load %arg0[%c3_177, %c20_178, %c0_179] : memref<4x36x144xf32, #tpu.memory_space<vmem>>, vector<1x16x144xf32>
    %401 = vector.shape_cast %400 : vector<1x16x144xf32> to vector<16x144xf32>
    %402 = vector.extract_strided_slice %401 {offsets = [0, 0], sizes = [16, 128], strides = [1, 1]} : vector<16x144xf32> to vector<16x128xf32>
    %c27_180 = arith.constant 27 : index
    %c0_181 = arith.constant 0 : index
    %403 = vector.load %arg1[%c27_180, %c0_181] : memref<36x128xf32, #tpu.memory_space<vmem>>, vector<1x128xf32>
    %404 = vector.broadcast %403 : vector<1x128xf32> to vector<16x128xf32>
    %405 = arith.mulf %402, %404 : vector<16x128xf32>
    %406 = arith.addf %399, %405 : vector<16x128xf32>
    %407 = vector.extract_strided_slice %401 {offsets = [0, 8], sizes = [16, 128], strides = [1, 1]} : vector<16x144xf32> to vector<16x128xf32>
    %c31_182 = arith.constant 31 : index
    %c0_183 = arith.constant 0 : index
    %408 = vector.load %arg1[%c31_182, %c0_183] : memref<36x128xf32, #tpu.memory_space<vmem>>, vector<1x128xf32>
    %409 = vector.broadcast %408 : vector<1x128xf32> to vector<16x128xf32>
    %410 = arith.mulf %407, %409 : vector<16x128xf32>
    %411 = arith.addf %406, %410 : vector<16x128xf32>
    %412 = vector.extract_strided_slice %401 {offsets = [0, 16], sizes = [16, 128], strides = [1, 1]} : vector<16x144xf32> to vector<16x128xf32>
    %c35_184 = arith.constant 35 : index
    %c0_185 = arith.constant 0 : index
    %413 = vector.load %arg1[%c35_184, %c0_185] : memref<36x128xf32, #tpu.memory_space<vmem>>, vector<1x128xf32>
    %414 = vector.broadcast %413 : vector<1x128xf32> to vector<16x128xf32>
    %415 = arith.mulf %412, %414 : vector<16x128xf32>
    %416 = arith.addf %411, %415 : vector<16x128xf32>
    %cst_186 = arith.constant 0.000000e+00 : f32
    %417 = vector.broadcast %cst_186 : f32 to vector<16x128xf32>
    %418 = arith.maximumf %416, %417 : vector<16x128xf32>
    %c16_187 = arith.constant 16 : index
    %c0_188 = arith.constant 0 : index
    %419 = vector.load %arg3[%c16_187, %c0_188] : memref<32x128xf32, #tpu.memory_space<vmem>>, vector<16x128xf32>
    tpu.vector_store %arg3[%c16_187, %c0_188], %418 {strides = array<i32>} : memref<32x128xf32, #tpu.memory_space<vmem>>, vector<16x128xf32>,
    return
  }
}

</mosaic_0001>

<bundles_post_ra>
// kernel: tile.14
= control target key start
LH: loop header
LB: loop body
LE: loop exit
PB: predicated region body
PF: predicated region fallthrough
CT: control target
= control target key end

     0   :  { %s28_s0 = inlined_call_operand.vmem [shape: f32[8], index: 0, kind: input, shape index: {}]   ;;  %s29_s1 = inlined_call_operand.vmem [shape: f32[16,1,1,8], index: 1, kind: output, shape index: {}]  }
   0x1   :  { %v4_v0 = vld [vmem:[%s28_s0] ss:$0 sm:$0xff] }
   0x2   :  { %5 = vst [vmem:[%s29_s1] sm:$0xff] %v4_v0  ;;  %8 = vst [vmem:[%s29_s1 + $0x8] sm:$0xff] %v4_v0 }

// kernel: tile.15
= control target key start
LH: loop header
LB: loop body
LE: loop exit
PB: predicated region body
PF: predicated region fallthrough
CT: control target
= control target key end

     0   :  { %s133_s10 = smov 120   ;;  %s134_s11 = smov 104   ;;  %vm3_vm0 = vcmask 64512   ;;  %vm9_vm1 = vcmask 1048512   ;;  %vm15_vm2 = vcmask 982912   ;;  %vm21_vm3 = vcmask 917312   ;;  %s209_s0 = inlined_call_operand.vmem [shape: f32[16,1,1,8], index: 0, kind: input, shape index: {}]   ;;  %s210_s1 = inlined_call_operand.vmem [shape: f32[1,128], index: 1, kind: output, shape index: {}]  }
   0x1   :  { %v103_v0 = vld [vmem:[%s209_s0 + $0xf] sm:$0x1]   ;;  %v105_v1 = vld [vmem:[%s209_s0 + $0xd] sm:$0x1]   ;;  %v104_v2 = vld [vmem:[%s209_s0 + $0xe] sm:$0x1]  }
   0x2   :  { %7 = vrot.lane.b32.xlu0 %v103_v0, %s133_s10  ;;  %19 = vrot.lane.b32.xlu1 %v105_v1, %s134_s11  ;;  %v106_v3 = vld [vmem:[%s209_s0 + $0xc] sm:$0x1]   ;;  %s135_s16 = smov 112   ;;  %s136_s17 = smov 96   ;;  %v107_v4 = vld [vmem:[%s209_s0 + $0xb] sm:$0x1]  }
   0x3   :  { %v108_v5 = vld [vmem:[%s209_s0 + $0xa] sm:$0x1]   ;;  %v2_v6 = vld [vmem:[%s209_s0] sm:$0x1]   ;;  %s137_s24 = smov 88   ;;  %s138_s25 = smov 80  }
   0x4   :  { %4 = vst.msk [vmem:[#allocation0] sm:$0x1] %vm3_vm0, %v2_v6   ;;  %v109_v7 = vld [vmem:[%s209_s0 + $0x9] sm:$0x1]   ;;  %v110_v8 = vld [vmem:[%s209_s0 + $0x8] sm:$0x1]  }
   0x5   :  { %s139_s30 = smov 72   ;;  %s140_s2 = smov 64   ;;  %v111_v9 = vld [vmem:[%s209_s0 + $0x7] sm:$0x1]   ;;  %v112_v10 = vld [vmem:[%s209_s0 + $0x6] sm:$0x1]  }
   0x6   :  { %13 = vrot.lane.b32.xlu0 %v104_v2, %s135_s16  ;;  %25 = vrot.lane.b32.xlu1 %v106_v3, %s136_s17  ;;  %s141_s7 = smov 56   ;;  %s142_s8 = smov 48   ;;  %v113_v11 = vld [vmem:[%s209_s0 + $0x5] sm:$0x1]   ;;  %v114_v12 = vld [vmem:[%s209_s0 + $0x4] sm:$0x1]  }
   0x7   :  { %s143_s13 = smov 40   ;;  %s144_s14 = smov 32   ;;  %v115_v13 = vld [vmem:[%s209_s0 + $0x3] sm:$0x1]   ;;  %v116_v14 = vld [vmem:[%s209_s0 + $0x2] sm:$0x1]  }
   0x8   :  { %s145_s19 = smov 24   ;;  %s146_s20 = smov 16   ;;  %v117_v15 = vld [vmem:[%s209_s0 + $0x1] sm:$0x1]   ;;  %vm27_vm4 = vcmask 851712   ;;  %vm33_vm5 = vcmask 786112  }
   0x9   :  { %s147_s0 = smov 8   ;;  %vm39_vm6 = vcmask 720512   ;;  %vm45_vm7 = vcmask 654912   ;;  %vm51_vm8 = vcmask 589312   ;;  %vm57_vm9 = vcmask 523712  }
   0xa   :  { %31 = vrot.lane.b32.xlu0 %v107_v4, %s137_s24  ;;  %37 = vrot.lane.b32.xlu1 %v108_v5, %s138_s25  ;;  %vm63_vm10 = vcmask 458112   ;;  %vm69_vm11 = vcmask 392512   ;;  %vm75_vm12 = vcmask 326912   ;;  %vm81_vm13 = vcmask 261312  }
   0xb   :  { %vm87_vm14 = vcmask 195712   ;;  %vm93_vm15 = vcmask 130112  }
   0xe   :  { %43 = vrot.lane.b32.xlu0 %v109_v7, %s139_s30  ;;  %49 = vrot.lane.b32.xlu1 %v110_v8, %s140_s2 }
  0x12   :  { %55 = vrot.lane.b32.xlu0 %v111_v9, %s141_s7  ;;  %61 = vrot.lane.b32.xlu1 %v112_v10, %s142_s8 }
  0x16   :  { %67 = vrot.lane.b32.xlu0 %v113_v11, %s143_s13  ;;  %73 = vrot.lane.b32.xlu1 %v114_v12, %s144_s14 }
  0x1a   :  { %79 = vrot.lane.b32.xlu0 %v115_v13, %s145_s19  ;;  %85 = vrot.lane.b32.xlu1 %v116_v14, %s146_s20 }
  0x1e   :  { %91 = vrot.lane.b32.xlu0 %v117_v15, %s147_s0 }
  0x74   :  { %v8_v16 = vpop.permute.xlu0 %7   ;;  %v20_v17 = vpop.permute.xlu1 %19  }
  0x75   :  { %10 = vst.msk [vmem:[#allocation0] sm:$0x1] %vm9_vm1, %v8_v16  }
  0x78   :  { %v14_v18 = vpop.permute.xlu0 %13   ;;  %v26_v19 = vpop.permute.xlu1 %25  }
  0x79   :  { %16 = vst.msk [vmem:[#allocation0] sm:$0x1] %vm15_vm2, %v14_v18  }
  0x7a   :  { %22 = vst.msk [vmem:[#allocation0] sm:$0x1] %vm21_vm3, %v20_v17  }
  0x7b   :  { %28 = vst.msk [vmem:[#allocation0] sm:$0x1] %vm27_vm4, %v26_v19  }
  0x7c   :  { %v32_v20 = vpop.permute.xlu0 %31   ;;  %v38_v21 = vpop.permute.xlu1 %37  }
  0x7d   :  { %34 = vst.msk [vmem:[#allocation0] sm:$0x1] %vm33_vm5, %v32_v20  }
  0x7e   :  { %40 = vst.msk [vmem:[#allocation0] sm:$0x1] %vm39_vm6, %v38_v21  }
  0x80   :  { %v44_v22 = vpop.permute.xlu0 %43   ;;  %v50_v23 = vpop.permute.xlu1 %49  }
  0x81   :  { %46 = vst.msk [vmem:[#allocation0] sm:$0x1] %vm45_vm7, %v44_v22  }
  0x82   :  { %52 = vst.msk [vmem:[#allocation0] sm:$0x1] %vm51_vm8, %v50_v23  }
  0x84   :  { %v56_v24 = vpop.permute.xlu0 %55   ;;  %v62_v25 = vpop.permute.xlu1 %61  }
  0x85   :  { %58 = vst.msk [vmem:[#allocation0] sm:$0x1] %vm57_vm9, %v56_v24  }
  0x86   :  { %64 = vst.msk [vmem:[#allocation0] sm:$0x1] %vm63_vm10, %v62_v25  }
  0x88   :  { %v68_v26 = vpop.permute.xlu0 %67   ;;  %v74_v27 = vpop.permute.xlu1 %73  }
  0x89   :  { %70 = vst.msk [vmem:[#allocation0] sm:$0x1] %vm69_vm11, %v68_v26  }
  0x8a   :  { %76 = vst.msk [vmem:[#allocation0] sm:$0x1] %vm75_vm12, %v74_v27  }
  0x8c   :  { %v80_v28 = vpop.permute.xlu0 %79   ;;  %v86_v29 = vpop.permute.xlu1 %85  }
  0x8d   :  { %82 = vst.msk [vmem:[#allocation0] sm:$0x1] %vm81_vm13, %v80_v28  }
  0x8e   :  { %88 = vst.msk [vmem:[#allocation0] sm:$0x1] %vm87_vm14, %v86_v29  }
  0x90   :  { %v92_v30 = vpop.permute.xlu0 %91  }
  0x91   :  { %94 = vst.msk [vmem:[#allocation0] sm:$0x1] %vm93_vm15, %v92_v30  }
  0x98   :  { %v99_v31 = vld [vmem:[#allocation0] sm:$0x1] }
  0x99   :  { %102 = vst [vmem:[%s210_s1] sm:$0x1] %v99_v31 }

// kernel: conv_bn_relu.1
= control target key start
LH: loop header
LB: loop body
LE: loop exit
PB: predicated region body
PF: predicated region fallthrough
CT: control target
= control target key end

     0   :  { %s2875_s16 = smov 8   ;;  %s2876_s17 = smov 16   ;;  %vm341_vm0 = vcmask 1046528   ;;  %vm59_vm1 = vcmask 982016   ;;  %vm91_vm2 = vcmask 916480   ;;  %vm798_vm3 = vcmask 1045504   ;;  %s4848_s1 = inlined_call_operand.vmem [shape: f32[36,128], index: 1, kind: input, shape index: {}]   ;;  %s4849_s0 = inlined_call_operand.vmem [shape: f32[4,36,144], index: 0, kind: input, shape index: {}]   ;;  %s4850_s2 = inlined_call_operand.vmem [shape: f32[1,128], index: 2, kind: input, shape index: {}]   ;;  %s4851_s3 = inlined_call_operand.vmem [shape: f32[32,128], index: 3, kind: output, shape index: {}]  }
   0x1   :  { %v2707_v0 = vld [vmem:[%s4848_s1 + $0x4] ss:$0 sm:$0xff]  ;;  %v2708_v1 = vld [vmem:[%s4848_s1 + $0x8] ss:$0 sm:$0xff]  ;;  %v2714_v2 = vld [vmem:[%s4848_s1 + $0x5] ss:$0 sm:$0xff] }
   0x2   :  { %40 = vrot.lane.b32.xlu0 %v2707_v0, %s2875_s16  ;;  %72 = vrot.lane.b32.xlu1 %v2708_v1, %s2876_s17  ;;  %v2715_v3 = vld [vmem:[%s4848_s1 + $0x9] ss:$0 sm:$0xff]  ;;  %v2721_v4 = vld [vmem:[%s4848_s1 + $0x6] ss:$0 sm:$0xff]  ;;  %s2877_s23 = smov 120   ;;  %s2878_s24 = smov 112  }
   0x3   :  { %v2722_v5 = vld [vmem:[%s4848_s1 + $0xa] ss:$0 sm:$0xff]  ;;  %v2728_v6 = vld [vmem:[%s4848_s1 + $0x7] ss:$0 sm:$0xff]  ;;  %v2729_v7 = vld [vmem:[%s4848_s1 + $0xb] ss:$0 sm:$0xff] }
   0x4   :  { %v2731_v8 = vld [vmem:[%s4848_s1 + $0x10] ss:$0 sm:$0xff]  ;;  %v2732_v9 = vld [vmem:[%s4848_s1 + $0x14] ss:$0 sm:$0xff]  ;;  %v2738_v10 = vld [vmem:[%s4848_s1 + $0x11] ss:$0 sm:$0xff] }
   0x5   :  { %v2739_v11 = vld [vmem:[%s4848_s1 + $0x15] ss:$0 sm:$0xff]  ;;  %v2745_v12 = vld [vmem:[%s4848_s1 + $0x12] ss:$0 sm:$0xff]  ;;  %v22_v13 = vld [vmem:[%s4849_s0 + $0x8] sm:$0xff] }
   0x6   :  { %118 = vrot.lane.b32.xlu0 %v2714_v2, %s2875_s16  ;;  %149 = vrot.lane.b32.xlu1 %v2715_v3, %s2876_s17  ;;  %v2957_v14 = vld [vmem:[%s4849_s0] sm:$0xff]  ;;  %v2963_v18 = vld [vmem:[%s4849_s0 + $0x10] sm:$0xff] }
   0x7   :  { %v2968_v19 = vld [vmem:[%s4849_s0 + $0x18] sm:$0xff]  ;;  %v2982_v26 = vld [vmem:[%s4849_s0 + $0x50] sm:$0xff]  ;;  %v2995_v32 = vld [vmem:[%s4849_s0 + $0x60] sm:$0xff] }
   0x8   :  { %v2710_v27 = vld [vmem:[%s4849_s0 + $0x58] sm:$0xff]  ;;  %v3000_v33 = vld [vmem:[%s4849_s0 + $0x68] sm:$0xff]  ;;  %v3014_v40 = vld [vmem:[%s4849_s0 + $0xa0] sm:$0xff] }
   0x9   :  { %v2717_v41 = vld [vmem:[%s4849_s0 + $0xa8] sm:$0xff]  ;;  %v3027_v46 = vld [vmem:[%s4849_s0 + $0xb0] sm:$0xff]  ;;  %v3032_v47 = vld [vmem:[%s4849_s0 + $0xb8] sm:$0xff] }
   0xa   :  { %194 = vrot.lane.b32.xlu0 %v2721_v4, %s2875_s16  ;;  %225 = vrot.lane.b32.xlu1 %v2722_v5, %s2876_s17  ;;  %v3046_v54 = vld [vmem:[%s4849_s0 + $0xf0] sm:$0xff]  ;;  %v2724_v55 = vld [vmem:[%s4849_s0 + $0xf8] sm:$0xff] }
   0xb   :  { %v3059_v60 = vld [vmem:[%s4849_s0 + $0x100] sm:$0xff]  ;;  %v3064_v61 = vld [vmem:[%s4849_s0 + $0x108] sm:$0xff] }
   0xc   :  { %v3073_v2 = vld [vmem:[%s4849_s0] sm:$0xfe]  ;;  %v327_v3 = vld [vmem:[%s4849_s0 + $0x8] sm:$0xfe] }
   0xe   :  { %270 = vrot.lane.b32.xlu0 %v2728_v6, %s2875_s16  ;;  %301 = vrot.lane.b32.xlu1 %v2729_v7, %s2876_s17 }
  0x12   :  { %357 = vrot.lane.b32.xlu0 %v2731_v8, %s2875_s16  ;;  %402 = vrot.lane.b32.xlu1 %v2732_v9, %s2876_s17 }
  0x16   :  { %471 = vrot.lane.b32.xlu0 %v2738_v10, %s2875_s16  ;;  %516 = vrot.lane.b32.xlu1 %v2739_v11, %s2876_s17  ;;  %v3089_v10 = vld [vmem:[%s4849_s0 + $0x20] sm:$0x1]  ;;  %v329_v11 = vld [vmem:[%s4849_s0 + $0x28] sm:$0x1] }
  0x1a   :  { %585 = vrot.lane.b32.xlu0 %v2745_v12, %s2875_s16 }
  0x74   :  { %v41_v15 = vpop.permute.xlu0 %40  ;;  %v73_v20 = vpop.permute.xlu1 %72 }
  0x75   :  { %v44_v16 = vmul.f32 %v41_v15, %v22_v13  ;;  %v43_v17 = vmul.f32 %v41_v15, %v2957_v14  ;;  %v45_v21 = vmul.f32 %v41_v15, %v2963_v18  ;;  %v46_v22 = vmul.f32 %v41_v15, %v2968_v19 }
  0x76   :  { %v76_v23 = vmul.f32 %v73_v20, %v22_v13  ;;  %v75_v24 = vmul.f32 %v73_v20, %v2957_v14  ;;  %v78_v28 = vmul.f32 %v73_v20, %v2968_v19  ;;  %v77_v29 = vmul.f32 %v73_v20, %v2963_v18 }
  0x77   :  { %53 = vrot.lane.b32.xlu1 %v44_v16, %s2877_s23  ;;  %51 = vrot.lane.b32.xlu0 %v43_v17, %s2877_s23 }
  0x78   :  { %v119_v25 = vpop.permute.xlu0 %118  ;;  %v150_v34 = vpop.permute.xlu1 %149 }
  0x79   :  { %v121_v30 = vmul.f32 %v2982_v26, %v119_v25  ;;  %v122_v31 = vmul.f32 %v2710_v27, %v119_v25  ;;  %v123_v35 = vmul.f32 %v2995_v32, %v119_v25  ;;  %v124_v36 = vmul.f32 %v3000_v33, %v119_v25 }
  0x7a   :  { %v153_v37 = vmul.f32 %v2710_v27, %v150_v34  ;;  %v152_v38 = vmul.f32 %v2982_v26, %v150_v34  ;;  %v155_v42 = vmul.f32 %v3000_v33, %v150_v34  ;;  %v154_v43 = vmul.f32 %v2995_v32, %v150_v34 }
  0x7b   :  { %55 = vrot.lane.b32.xlu1 %v45_v21, %s2877_s23  ;;  %57 = vrot.lane.b32.xlu0 %v46_v22, %s2877_s23 }
  0x7c   :  { %v195_v39 = vpop.permute.xlu0 %194  ;;  %v226_v48 = vpop.permute.xlu1 %225 }
  0x7d   :  { %v197_v44 = vmul.f32 %v3014_v40, %v195_v39  ;;  %v198_v45 = vmul.f32 %v2717_v41, %v195_v39  ;;  %v199_v49 = vmul.f32 %v3027_v46, %v195_v39  ;;  %v200_v50 = vmul.f32 %v3032_v47, %v195_v39 }
  0x7e   :  { %v229_v51 = vmul.f32 %v2717_v41, %v226_v48  ;;  %v228_v52 = vmul.f32 %v3014_v40, %v226_v48  ;;  %v231_v56 = vmul.f32 %v3032_v47, %v226_v48  ;;  %v230_v57 = vmul.f32 %v3027_v46, %v226_v48  ;;  %v3109_v41 = vld [vmem:[%s4849_s0 + $0x50] sm:$0xfe] }
  0x7f   :  { %85 = vrot.lane.b32.xlu1 %v76_v23, %s2878_s24  ;;  %83 = vrot.lane.b32.xlu0 %v75_v24, %s2878_s24 }
  0x80   :  { %v271_v53 = vpop.permute.xlu0 %270  ;;  %v302_v62 = vpop.permute.xlu1 %301 }
  0x81   :  { %v273_v58 = vmul.f32 %v3046_v54, %v271_v53  ;;  %v274_v59 = vmul.f32 %v2724_v55, %v271_v53  ;;  %v275_v63 = vmul.f32 %v3059_v60, %v271_v53  ;;  %v276_v0 = vmul.f32 %v3064_v61, %v271_v53 }
  0x82   :  { %v305_v4 = vmul.f32 %v2724_v55, %v302_v62  ;;  %v304_v5 = vmul.f32 %v3046_v54, %v302_v62  ;;  %v307_v20 = vmul.f32 %v3064_v61, %v302_v62  ;;  %v306_v21 = vmul.f32 %v3059_v60, %v302_v62  ;;  %v3129_v62 = vld [vmem:[%s4849_s0 + $0x70] sm:$0x1] }
  0x83   :  { %89 = vrot.lane.b32.xlu1 %v78_v28, %s2878_s24  ;;  %87 = vrot.lane.b32.xlu0 %v77_v29, %s2878_s24 }
  0x84   :  { %v358_v1 = vpop.permute.xlu0 %357  ;;  %v403_v17 = vpop.permute.xlu1 %402 }
  0x85   :  { %v360_v6 = vmul.f32 %v358_v1, %v3073_v2  ;;  %v362_v7 = vmul.f32 %v358_v1, %v2963_v18  ;;  %v361_v8 = vmul.f32 %v358_v1, %v327_v3  ;;  %v363_v9 = vmul.f32 %v358_v1, %v2968_v19 }
  0x86   :  { %v364_v22 = vmul.f32 %v358_v1, %v3089_v10  ;;  %v365_v23 = vmul.f32 %v358_v1, %v329_v11  ;;  %v406_v24 = vmul.f32 %v403_v17, %v327_v3  ;;  %v408_v25 = vmul.f32 %v403_v17, %v2968_v19 }
  0x87   :  { %129 = vrot.lane.b32.xlu1 %v121_v30, %s2877_s23  ;;  %131 = vrot.lane.b32.xlu0 %v122_v31, %s2877_s23  ;;  %v372_v12 = vrot.slane %v360_v6, 1  ;;  %v373_v13 = vrot.slane %v362_v7, 1  ;;  %v375_v15 = vrot.slane %v361_v8, 1  ;;  %v376_v16 = vrot.slane %v363_v9, 1 }
  0x88   :  { %v405_v29 = vmul.f32 %v403_v17, %v3073_v2  ;;  %v407_v30 = vmul.f32 %v403_v17, %v2963_v18  ;;  %v378_v31 = vrot.slane %v364_v22, 1  ;;  %v380_v34 = vrot.slane %v365_v23, 1  ;;  %v472_v39 = vpop.permute.xlu0 %471  ;;  %v517_v3 = vpop.permute.xlu1 %516 }
  0x89   :  { %v374_v27 = vsel %vm341_vm0, %v372_v12, %v373_v13  ;;  %v377_v28 = vsel %vm341_vm0, %v375_v15, %v376_v16  ;;  %v409_v48 = vmul.f32 %v403_v17, %v3089_v10  ;;  %v477_v55 = vmul.f32 %v3000_v33, %v472_v39 }
  0x8a   :  { %v478_v6 = vmul.f32 %v3129_v62, %v472_v39  ;;  %v522_v12 = vmul.f32 %v3000_v33, %v517_v3  ;;  %v521_v15 = vmul.f32 %v2995_v32, %v517_v3 }
  0x8b   :  { %133 = vrot.lane.b32.xlu1 %v123_v35, %s2877_s23  ;;  %135 = vrot.lane.b32.xlu0 %v124_v36, %s2877_s23  ;;  %v420_v35 = vrot.slane %v406_v24, 1  ;;  %v421_v36 = vrot.slane %v408_v25, 1  ;;  %v490_v1 = vrot.slane %v477_v55, 1  ;;  %v3149_v25 = vld [vmem:[%s4849_s0 + $0xa0] sm:$0xfe] }
  0x8c   :  { %v532_v23 = vrot.slane %v521_v15, 1  ;;  %v586_v24 = vpop.permute.xlu0 %585  ;;  %v2713_v15 = vld [vmem:[%s4848_s1 + $0x1] ss:$0 sm:$0xff] }
  0x8f   :  { %162 = vrot.lane.b32.xlu1 %v153_v37, %s2878_s24  ;;  %160 = vrot.lane.b32.xlu0 %v152_v38, %s2878_s24  ;;  %v417_v37 = vrot.slane %v405_v29, 1  ;;  %v418_v38 = vrot.slane %v407_v30, 1 }
  0x93   :  { %166 = vrot.lane.b32.xlu1 %v155_v42, %s2878_s24  ;;  %164 = vrot.lane.b32.xlu0 %v154_v43, %s2878_s24  ;;  %v2734_v42 = vld [vmem:[%s4849_s0 + $0x58] sm:$0xfe]  ;;  %v379_v43 = vsel %vm341_vm0, %v373_v13, %v378_v31  ;;  %v519_v13 = vmul.f32 %v3109_v41, %v517_v3  ;;  %v523_v31 = vmul.f32 %v3129_v62, %v517_v3 }
  0x94   :  { %v475_v53 = vmul.f32 %v2734_v42, %v472_v39  ;;  %v520_v9 = vmul.f32 %v2734_v42, %v517_v3 }
  0x95   :  { %v531_v22 = vrot.slane %v519_v13, 1 }
  0x97   :  { %205 = vrot.lane.b32.xlu1 %v197_v44, %s2877_s23  ;;  %207 = vrot.lane.b32.xlu0 %v198_v45, %s2877_s23  ;;  %v381_v44 = vsel %vm341_vm0, %v376_v16, %v380_v34  ;;  %v410_v45 = vmul.f32 %v403_v17, %v329_v11  ;;  %v492_v16 = vrot.slane %v478_v6, 1  ;;  %v588_v34 = vmul.f32 %v3149_v25, %v586_v24 }
  0x9b   :  { %209 = vrot.lane.b32.xlu1 %v199_v49, %s2877_s23  ;;  %211 = vrot.lane.b32.xlu0 %v200_v50, %s2877_s23  ;;  %v474_v49 = vmul.f32 %v3109_v41, %v472_v39  ;;  %v476_v50 = vmul.f32 %v2995_v32, %v472_v39 }
  0x9f   :  { %238 = vrot.lane.b32.xlu1 %v229_v51, %s2878_s24  ;;  %236 = vrot.lane.b32.xlu0 %v228_v52, %s2878_s24  ;;  %v422_v51 = vsel %vm341_vm0, %v420_v35, %v421_v36  ;;  %v419_v52 = vsel %vm341_vm0, %v417_v37, %v418_v38  ;;  %v590_v35 = vmul.f32 %v3027_v46, %v586_v24 }
  0xa0   :  { %v533_v37 = vsel %vm341_vm0, %v531_v22, %v532_v23 }
  0xa3   :  { %242 = vrot.lane.b32.xlu1 %v231_v56, %s2878_s24  ;;  %240 = vrot.lane.b32.xlu0 %v230_v57, %s2878_s24  ;;  %v425_v56 = vrot.slane %v410_v45, 1  ;;  %v423_v57 = vrot.slane %v409_v48, 1  ;;  %v3177_v45 = vld [vmem:[%s4849_s0 + $0xc8] sm:$0x1]  ;;  %v600_v48 = vrot.slane %v588_v34, 1 }
  0xa7   :  { %281 = vrot.lane.b32.xlu1 %v273_v58, %s2877_s23  ;;  %283 = vrot.lane.b32.xlu0 %v274_v59, %s2877_s23  ;;  %v486_v58 = vrot.slane %v474_v49, 1  ;;  %v487_v59 = vrot.slane %v476_v50, 1  ;;  %v601_v49 = vrot.slane %v590_v35, 1 }
  0xa9   :  { %v488_v8 = vsel %vm341_vm0, %v486_v58, %v487_v59 }
  0xab   :  { %285 = vrot.lane.b32.xlu1 %v275_v63, %s2877_s23  ;;  %287 = vrot.lane.b32.xlu0 %v276_v0, %s2877_s23  ;;  %v2736_v63 = vld [vmem:[%s4849_s0 + $0x78] sm:$0x1]  ;;  %v489_v0 = vrot.slane %v475_v53, 1 }
  0xac   :  { %v479_v7 = vmul.f32 %v2736_v63, %v472_v39  ;;  %v524_v30 = vmul.f32 %v2736_v63, %v517_v3  ;;  %v591_v39 = vmul.f32 %v3032_v47, %v586_v24  ;;  %v2746_v3 = vld [vmem:[%s4848_s1 + $0x16] ss:$0 sm:$0xff] }
  0xad   :  { %v491_v11 = vsel %vm341_vm0, %v489_v0, %v490_v1 }
  0xae   :  { %v494_v17 = vrot.slane %v479_v7, 1  ;;  %v539_v42 = vrot.slane %v524_v30, 1 }
  0xaf   :  { %314 = vrot.lane.b32.xlu1 %v305_v4, %s2878_s24  ;;  %312 = vrot.lane.b32.xlu0 %v304_v5, %s2878_s24  ;;  %v426_v4 = vsel %vm341_vm0, %v421_v36, %v425_v56  ;;  %v424_v5 = vsel %vm341_vm0, %v418_v38, %v423_v57  ;;  %v593_v56 = vmul.f32 %v3177_v45, %v586_v24 }
  0xb0   :  { %v495_v29 = vsel %vm341_vm0, %v490_v1, %v494_v17  ;;  %v602_v57 = vsel %vm341_vm0, %v600_v48, %v601_v49 }
  0xb1   :  { %v608_v63 = vrot.slane %v593_v56, 1 }
  0xb3   :  { %318 = vrot.lane.b32.xlu1 %v307_v20, %s2878_s24  ;;  %316 = vrot.lane.b32.xlu0 %v306_v21, %s2878_s24  ;;  %v534_v20 = vrot.slane %v520_v9, 1  ;;  %v535_v21 = vrot.slane %v522_v12, 1 }
  0xb5   :  { %v536_v36 = vsel %vm341_vm0, %v534_v20, %v535_v21 }
  0xb7   :  { %382 = vrot.lane.b32.xlu1 %v374_v27, %s2877_s23  ;;  %384 = vrot.lane.b32.xlu0 %v377_v28, %s2877_s23  ;;  %v3154_v27 = vld [vmem:[%s4849_s0 + $0xa8] sm:$0xfe]  ;;  %v493_v28 = vsel %vm341_vm0, %v487_v59, %v492_v16 }
  0xb8   :  { %v589_v38 = vmul.f32 %v3154_v27, %v586_v24 }
  0xba   :  { %v603_v50 = vrot.slane %v589_v38, 1 }
  0xbb   :  { %386 = vrot.lane.b32.xlu1 %v379_v43, %s2877_s23  ;;  %388 = vrot.lane.b32.xlu0 %v381_v44, %s2877_s23  ;;  %v537_v43 = vrot.slane %v523_v31, 1  ;;  %v3172_v44 = vld [vmem:[%s4849_s0 + $0xc0] sm:$0x1] }
  0xbc   :  { %v592_v55 = vmul.f32 %v3172_v44, %v586_v24 }
  0xbd   :  { %v538_v53 = vsel %vm341_vm0, %v532_v23, %v537_v43 }
  0xbe   :  { %v606_v59 = vrot.slane %v592_v55, 1 }
  0xbf   :  { %429 = vrot.lane.b32.xlu1 %v422_v51, %s2878_s24  ;;  %427 = vrot.lane.b32.xlu0 %v419_v52, %s2878_s24  ;;  %v604_v51 = vrot.slane %v591_v39, 1  ;;  %v540_v52 = vsel %vm341_vm0, %v535_v21, %v539_v42 }
  0xc0   :  { %v607_v0 = vsel %vm341_vm0, %v601_v49, %v606_v59 }
  0xc1   :  { %v605_v58 = vsel %vm341_vm0, %v603_v50, %v604_v51  ;;  %v609_v1 = vsel %vm341_vm0, %v604_v51, %v608_v63 }
  0xc3   :  { %433 = vrot.lane.b32.xlu1 %v426_v4, %s2878_s24  ;;  %431 = vrot.lane.b32.xlu0 %v424_v5, %s2878_s24  ;;  %v2706_v4 = vld [vmem:[%s4848_s1] ss:$0 sm:$0xff] }
  0xc4   :  { %v30_v7 = vmul.f32 %v2706_v4, %v2957_v14  ;;  %v108_v14 = vmul.f32 %v2713_v15, %v2982_v26 }
  0xc7   :  { %496 = vrot.lane.b32.xlu1 %v488_v8, %s2877_s23  ;;  %498 = vrot.lane.b32.xlu0 %v491_v11, %s2877_s23  ;;  %v2705_v8 = vld [vmem:[%s4850_s2] ss:$0 sm:$0xff] }
  0xc8   :  { %v32_v9 = vadd.f32 %v2705_v8, %v30_v7 }
  0xcb   :  { %500 = vrot.lane.b32.xlu1 %v493_v28, %s2877_s23  ;;  %502 = vrot.lane.b32.xlu0 %v495_v29, %s2877_s23 }
  0xcf   :  { %543 = vrot.lane.b32.xlu1 %v536_v36, %s2878_s24  ;;  %541 = vrot.lane.b32.xlu0 %v533_v37, %s2878_s24  ;;  %v2720_v36 = vld [vmem:[%s4848_s1 + $0x2] ss:$0 sm:$0xff] }
  0xd0   :  { %v184_v26 = vmul.f32 %v2720_v36, %v3014_v40 }
  0xd3   :  { %547 = vrot.lane.b32.xlu1 %v540_v52, %s2878_s24  ;;  %545 = vrot.lane.b32.xlu0 %v538_v53, %s2878_s24  ;;  %v31_v53 = vmul.f32 %v2706_v4, %v2963_v18 }
  0xd5   :  { %v33_v59 = vadd.f32 %v2705_v8, %v31_v53  ;;  %v2730_v8 = vld [vmem:[%s4848_s1 + $0xc] ss:$0 sm:$0xff] }
  0xd7   :  { %610 = vrot.lane.b32.xlu1 %v602_v57, %s2877_s23  ;;  %612 = vrot.lane.b32.xlu0 %v605_v58, %s2877_s23  ;;  %v2727_v58 = vld [vmem:[%s4848_s1 + $0x3] ss:$0 sm:$0xff] }
  0xdb   :  { %614 = vrot.lane.b32.xlu1 %v607_v0, %s2877_s23  ;;  %616 = vrot.lane.b32.xlu0 %v609_v1, %s2877_s23  ;;  %v260_v1 = vmul.f32 %v2727_v58, %v3046_v54 }
  0xdf   :  { %630 = vrot.lane.b32.xlu1 %v2746_v3, %s2876_s17 }
  0xe9   :  { %v54_v5 = vpop.permute.xlu1 %53  ;;  %v52_v6 = vpop.permute.xlu0 %51 }
  0xea   :  { %v60_v13 = vsel %vm59_vm1, %v52_v6, %v54_v5 }
  0xeb   :  { %v64_v16 = vadd.f32 %v60_v13, %v32_v9 }
  0xed   :  { %v56_v11 = vpop.permute.xlu1 %55  ;;  %v58_v12 = vpop.permute.xlu0 %57 }
  0xee   :  { %v61_v3 = vsel %vm59_vm1, %v56_v11, %v58_v12  ;;  %v335_v12 = vmul.f32 %v2730_v8, %v3073_v2 }
  0xef   :  { %v65_v7 = vadd.f32 %v61_v3, %v33_v59  ;;  %v2737_v59 = vld [vmem:[%s4848_s1 + $0xd] ss:$0 sm:$0xff] }
  0xf1   :  { %v86_v17 = vpop.permute.xlu1 %85  ;;  %v84_v20 = vpop.permute.xlu0 %83 }
  0xf2   :  { %v92_v21 = vsel %vm91_vm2, %v84_v20, %v86_v17  ;;  %v109_v20 = vmul.f32 %v2713_v15, %v2995_v32 }
  0xf3   :  { %v96_v22 = vadd.f32 %v92_v21, %v64_v16  ;;  %v336_v21 = vmul.f32 %v2730_v8, %v2963_v18 }
  0xf5   :  { %v90_v23 = vpop.permute.xlu1 %89  ;;  %v88_v24 = vpop.permute.xlu0 %87  ;;  %v110_v28 = vadd.f32 %v108_v14, %v96_v22 }
  0xf6   :  { %v93_v4 = vsel %vm91_vm2, %v88_v24, %v90_v23 }
  0xf7   :  { %v97_v17 = vadd.f32 %v93_v4, %v65_v7 }
  0xf9   :  { %v130_v29 = vpop.permute.xlu1 %129  ;;  %v132_v30 = vpop.permute.xlu0 %131  ;;  %v111_v22 = vadd.f32 %v109_v20, %v97_v17 }
  0xfa   :  { %v137_v35 = vsel %vm59_vm1, %v130_v29, %v132_v30  ;;  %v342_v30 = vrot.slane %v335_v12, 1 }
  0xfb   :  { %v141_v37 = vadd.f32 %v137_v35, %v110_v28  ;;  %v343_v35 = vrot.slane %v336_v21, 1 }
  0xfd   :  { %v134_v31 = vpop.permute.xlu1 %133  ;;  %v136_v34 = vpop.permute.xlu0 %135 }
  0xfe   :  { %v138_v11 = vsel %vm59_vm1, %v134_v31, %v136_v34 }
  0xff   :  { %v142_v24 = vadd.f32 %v138_v11, %v111_v22 }
 0x101   :  { %v163_v38 = vpop.permute.xlu1 %162  ;;  %v161_v39 = vpop.permute.xlu0 %160 }
 0x102   :  { %v168_v42 = vsel %vm91_vm2, %v161_v39, %v163_v38  ;;  %v185_v38 = vmul.f32 %v2720_v36, %v3027_v46  ;;  %v261_v36 = vmul.f32 %v2727_v58, %v3059_v60 }
 0x103   :  { %v172_v43 = vadd.f32 %v168_v42, %v141_v37  ;;  %v344_v42 = vsel %vm341_vm0, %v342_v30, %v343_v35 }
 0x105   :  { %v167_v48 = vpop.permute.xlu1 %166  ;;  %v165_v49 = vpop.permute.xlu0 %164  ;;  %v186_v50 = vadd.f32 %v184_v26, %v172_v43 }
 0x106   :  { %v169_v23 = vsel %vm91_vm2, %v165_v49, %v167_v48 }
 0x107   :  { %v173_v37 = vadd.f32 %v169_v23, %v142_v24 }
 0x109   :  { %v206_v51 = vpop.permute.xlu1 %205  ;;  %v208_v52 = vpop.permute.xlu0 %207  ;;  %v187_v43 = vadd.f32 %v185_v38, %v173_v37 }
 0x10a   :  { %v213_v57 = vsel %vm59_vm1, %v206_v51, %v208_v52 }
 0x10b   :  { %v217_v40 = vadd.f32 %v213_v57, %v186_v50 }
 0x10d   :  { %v210_v55 = vpop.permute.xlu1 %209  ;;  %v212_v56 = vpop.permute.xlu0 %211 }
 0x10e   :  { %v214_v2 = vsel %vm59_vm1, %v210_v55, %v212_v56  ;;  %v337_v55 = vmul.f32 %v2730_v8, %v3089_v10  ;;  %v452_v10 = vmul.f32 %v2737_v59, %v3129_v62 }
 0x10f   :  { %v218_v50 = vadd.f32 %v214_v2, %v187_v43 }
 0x110   :  { %v459_v21 = vrot.slane %v452_v10, 1 }
 0x111   :  { %v239_v63 = vpop.permute.xlu1 %238  ;;  %v237_v0 = vpop.permute.xlu0 %236 }
 0x112   :  { %v244_v5 = vsel %vm91_vm2, %v237_v0, %v239_v63  ;;  %v450_v0 = vmul.f32 %v2737_v59, %v3109_v41 }
 0x113   :  { %v248_v6 = vadd.f32 %v244_v5, %v217_v40 }
 0x115   :  { %v243_v9 = vpop.permute.xlu1 %242  ;;  %v241_v13 = vpop.permute.xlu0 %240  ;;  %v262_v16 = vadd.f32 %v260_v1, %v248_v6  ;;  %v451_v1 = vmul.f32 %v2737_v59, %v2995_v32  ;;  %v345_v6 = vrot.slane %v337_v55, 1 }
 0x116   :  { %v245_v49 = vsel %vm91_vm2, %v241_v13, %v243_v9  ;;  %v456_v13 = vrot.slane %v450_v0, 1  ;;  %v2752_v0 = vld [vmem:[%s4848_s1 + $0x13] ss:$0 sm:$0xff] }
 0x117   :  { %v249_v57 = vadd.f32 %v245_v49, %v218_v50  ;;  %v346_v20 = vsel %vm341_vm0, %v343_v35, %v345_v6 }
 0x119   :  { %v282_v14 = vpop.permute.xlu1 %281  ;;  %v284_v54 = vpop.permute.xlu0 %283  ;;  %v263_v3 = vadd.f32 %v261_v36, %v249_v57 }
 0x11a   :  { %v289_v15 = vsel %vm59_vm1, %v282_v14, %v284_v54 }
 0x11b   :  { %v293_v39 = vadd.f32 %v289_v15, %v262_v16  ;;  %v457_v16 = vrot.slane %v451_v1, 1 }
 0x11d   :  { %v286_v28 = vpop.permute.xlu1 %285  ;;  %v288_v29 = vpop.permute.xlu0 %287  ;;  %v458_v12 = vsel %vm341_vm0, %v456_v13, %v457_v16  ;;  %v460_v30 = vsel %vm341_vm0, %v457_v16, %v459_v21  ;;  %v2748_v13 = vld [vmem:[%s4849_s0 + $0xf8] sm:$0xfe]  ;;  %v2750_v16 = vld [vmem:[%s4849_s0 + $0x118] sm:$0x1] }
 0x11e   :  { %v290_v63 = vsel %vm59_vm1, %v286_v28, %v288_v29 }
 0x11f   :  { %v294_v4 = vadd.f32 %v290_v63, %v263_v3 }
 0x121   :  { %v315_v26 = vpop.permute.xlu1 %314  ;;  %v313_v31 = vpop.permute.xlu0 %312 }
 0x122   :  { %v320_v34 = vsel %vm91_vm2, %v313_v31, %v315_v26 }
 0x123   :  { %v324_v48 = vadd.f32 %v320_v34, %v293_v39 }
 0x125   :  { %v319_v51 = vpop.permute.xlu1 %318  ;;  %v317_v52 = vpop.permute.xlu0 %316  ;;  %v349_v53 = vadd.f32 %v344_v42, %v324_v48 }
 0x126   :  { %v321_v5 = vsel %vm91_vm2, %v317_v52, %v319_v51 }
 0x127   :  { %v325_v17 = vadd.f32 %v321_v5, %v294_v4 }
 0x129   :  { %v383_v56 = vpop.permute.xlu1 %382  ;;  %v385_v40 = vpop.permute.xlu0 %384  ;;  %v350_v22 = vadd.f32 %v346_v20, %v325_v17  ;;  %v3315_v17 = vld [vmem:[%s4849_s0 + $0xf0] sm:$0xfe] }
 0x12a   :  { %v390_v9 = vsel %vm59_vm1, %v383_v56, %v385_v40 }
 0x12b   :  { %v394_v8 = vadd.f32 %v390_v9, %v349_v53 }
 0x12d   :  { %v387_v58 = vpop.permute.xlu1 %386  ;;  %v389_v7 = vpop.permute.xlu0 %388 }
 0x12e   :  { %v391_v54 = vsel %vm59_vm1, %v387_v58, %v389_v7 }
 0x12f   :  { %v395_v24 = vadd.f32 %v391_v54, %v350_v22  ;;  %v3323_v54 = vld [vmem:[%s4849_s0 + $0x110] sm:$0x1] }
 0x131   :  { %v430_v41 = vpop.permute.xlu1 %429  ;;  %v428_v14 = vpop.permute.xlu0 %427 }
 0x132   :  { %v435_v11 = vsel %vm91_vm2, %v428_v14, %v430_v41 }
 0x133   :  { %v439_v23 = vadd.f32 %v435_v11, %v394_v8 }
 0x135   :  { %v434_v28 = vpop.permute.xlu1 %433  ;;  %v432_v29 = vpop.permute.xlu0 %431  ;;  %v3254_v15 = vadd.f32 %v458_v12, %v439_v23 }
 0x136   :  { %v436_v62 = vsel %vm91_vm2, %v432_v29, %v434_v28 }
 0x137   :  { %v440_v35 = vadd.f32 %v436_v62, %v395_v24 }
 0x139   :  { %v3258_v37 = vpop.permute.xlu1 %496  ;;  %v3260_v38 = vadd.f32 %v460_v30, %v440_v35  ;;  %v3290_v1 = vpop.permute.xlu0 %498 }
 0x13d   :  { %v3262_v39 = vpop.permute.xlu1 %500  ;;  %v3292_v3 = vpop.permute.xlu0 %502 }
 0x141   :  { %v3264_v26 = vpop.permute.xlu1 %543  ;;  %v3294_v5 = vpop.permute.xlu0 %541 }
 0x145   :  { %v3266_v31 = vpop.permute.xlu1 %547  ;;  %v3296_v6 = vpop.permute.xlu0 %545 }
 0x149   :  { %v3268_v2 = vpop.permute.xlu1 %610  ;;  %v3298_v4 = vpop.permute.xlu0 %612 }
 0x14d   :  { %v3270_v34 = vpop.permute.xlu1 %614  ;;  %v3300_v58 = vpop.permute.xlu0 %616 }
 0x151   :  { %v631_v42 = vpop.permute.xlu1 %630 }
 0x152   :  { %v634_v43 = vmul.f32 %v3154_v27, %v631_v42  ;;  %v636_v48 = vmul.f32 %v3032_v47, %v631_v42  ;;  %v633_v49 = vmul.f32 %v3149_v25, %v631_v42  ;;  %v635_v50 = vmul.f32 %v3027_v46, %v631_v42 }
 0x153   :  { %v638_v51 = vmul.f32 %v3177_v45, %v631_v42  ;;  %v637_v52 = vmul.f32 %v3172_v44, %v631_v42 }
 0x154   :  { %v648_v53 = vrot.slane %v634_v43, 1  ;;  %v649_v57 = vrot.slane %v636_v48, 1  ;;  %v645_v36 = vrot.slane %v633_v49, 1  ;;  %v646_v59 = vrot.slane %v635_v50, 1  ;;  %v2753_v43 = vld [vmem:[%s4848_s1 + $0x17] ss:$0 sm:$0xff] }
 0x155   :  { %v653_v40 = vrot.slane %v638_v51, 1  ;;  %v651_v27 = vrot.slane %v637_v52, 1 }
 0x156   :  { %v650_v55 = vsel %vm341_vm0, %v648_v53, %v649_v57  ;;  %v647_v56 = vsel %vm341_vm0, %v645_v36, %v646_v59 }
 0x157   :  { %657 = vrot.lane.b32.xlu1 %v650_v55, %s2878_s24  ;;  %655 = vrot.lane.b32.xlu0 %v647_v56, %s2878_s24  ;;  %v654_v63 = vsel %vm341_vm0, %v649_v57, %v653_v40  ;;  %v652_v45 = vsel %vm341_vm0, %v646_v59, %v651_v27 }
 0x15b   :  { %661 = vrot.lane.b32.xlu1 %v654_v63, %s2878_s24  ;;  %659 = vrot.lane.b32.xlu0 %v652_v45, %s2878_s24 }
 0x15f   :  { %699 = vrot.lane.b32.xlu0 %v2752_v0, %s2875_s16 }
 0x1c9   :  { %v3302_v7 = vpop.permute.xlu0 %655  ;;  %v3338_v48 = vpop.permute.xlu1 %657 }
 0x1cd   :  { %v3304_v9 = vpop.permute.xlu0 %659  ;;  %v3340_v49 = vpop.permute.xlu1 %661 }
 0x1d1   :  { %v700_v10 = vpop.permute.xlu0 %699 }
 0x1d2   :  { %v703_v20 = vmul.f32 %v2748_v13, %v700_v10  ;;  %v705_v8 = vmul.f32 %v3064_v61, %v700_v10  ;;  %v702_v41 = vmul.f32 %v3315_v17, %v700_v10  ;;  %v704_v14 = vmul.f32 %v3059_v60, %v700_v10 }
 0x1d3   :  { %v707_v11 = vmul.f32 %v2750_v16, %v700_v10  ;;  %v706_v12 = vmul.f32 %v3323_v54, %v700_v10 }
 0x1d4   :  { %v717_v21 = vrot.slane %v703_v20, 1  ;;  %v718_v22 = vrot.slane %v705_v8, 1  ;;  %v714_v23 = vrot.slane %v702_v41, 1  ;;  %v715_v24 = vrot.slane %v704_v14, 1 }
 0x1d5   :  { %v722_v62 = vrot.slane %v707_v11, 1  ;;  %v720_v30 = vrot.slane %v706_v12, 1  ;;  %v784_v12 = vld [vmem:[%s4849_s0 + $0x8] sm:$0xfc] }
 0x1d6   :  { %v719_v28 = vsel %vm341_vm0, %v717_v21, %v718_v22  ;;  %v716_v29 = vsel %vm341_vm0, %v714_v23, %v715_v24  ;;  %v786_v21 = vld [vmem:[%s4849_s0 + $0x28] sm:$0x3]  ;;  %v3379_v23 = vld [vmem:[%s4849_s0] sm:$0xfc] }
 0x1d7   :  { %726 = vrot.lane.b32.xlu0 %v719_v28, %s2877_s23  ;;  %724 = vrot.lane.b32.xlu1 %v716_v29, %s2877_s23  ;;  %v723_v35 = vsel %vm341_vm0, %v718_v22, %v722_v62  ;;  %v721_v42 = vsel %vm341_vm0, %v715_v24, %v720_v30  ;;  %v3387_v30 = vld [vmem:[%s4849_s0 + $0x20] sm:$0x3] }
 0x1db   :  { %730 = vrot.lane.b32.xlu0 %v723_v35, %s2877_s23  ;;  %728 = vrot.lane.b32.xlu1 %v721_v42, %s2877_s23 }
 0x1df   :  { %744 = vrot.lane.b32.xlu1 %v2753_v43, %s2876_s17 }
 0x249   :  { %v3342_v50 = vpop.permute.xlu1 %724 }
 0x24d   :  { %v3344_v51 = vpop.permute.xlu1 %728 }
 0x251   :  { %v745_v52 = vpop.permute.xlu1 %744 }
 0x252   :  { %v748_v53 = vmul.f32 %v2748_v13, %v745_v52  ;;  %v750_v57 = vmul.f32 %v3064_v61, %v745_v52  ;;  %v747_v36 = vmul.f32 %v3315_v17, %v745_v52  ;;  %v749_v59 = vmul.f32 %v3059_v60, %v745_v52  ;;  %v2755_v13 = vld [vmem:[%s4848_s1 + $0x1c] ss:$0 sm:$0xff] }
 0x253   :  { %v752_v55 = vmul.f32 %v2750_v16, %v745_v52  ;;  %v751_v56 = vmul.f32 %v3323_v54, %v745_v52  ;;  %v3362_v16 = vpop.permute.xlu0 %726 }
 0x254   :  { %v762_v40 = vrot.slane %v748_v53, 1  ;;  %v763_v27 = vrot.slane %v750_v57, 1  ;;  %v759_v63 = vrot.slane %v747_v36, 1  ;;  %v760_v45 = vrot.slane %v749_v59, 1 }
 0x255   :  { %v767_v20 = vrot.slane %v752_v55, 1  ;;  %v765_v8 = vrot.slane %v751_v56, 1 }
 0x256   :  { %v764_v0 = vsel %vm341_vm0, %v762_v40, %v763_v27  ;;  %v761_v10 = vsel %vm341_vm0, %v759_v63, %v760_v45  ;;  %v2756_v63 = vld [vmem:[%s4848_s1 + $0x20] ss:$0 sm:$0xff] }
 0x257   :  { %771 = vrot.lane.b32.xlu1 %v764_v0, %s2878_s24  ;;  %769 = vrot.lane.b32.xlu0 %v761_v10, %s2878_s24  ;;  %v768_v61 = vsel %vm341_vm0, %v763_v27, %v767_v20  ;;  %v766_v60 = vsel %vm341_vm0, %v760_v45, %v765_v8  ;;  %v3364_v41 = vpop.permute.xlu0 %730 }
 0x25b   :  { %775 = vrot.lane.b32.xlu1 %v768_v61, %s2878_s24  ;;  %773 = vrot.lane.b32.xlu0 %v766_v60, %s2878_s24 }
 0x25f   :  { %814 = vrot.lane.b32.xlu0 %v2755_v13, %s2875_s16 }
 0x2c9   :  { %v3366_v14 = vpop.permute.xlu0 %769  ;;  %v3402_v45 = vpop.permute.xlu1 %771 }
 0x2cd   :  { %v3368_v11 = vpop.permute.xlu0 %773  ;;  %v3404_v0 = vpop.permute.xlu1 %775 }
 0x2d1   :  { %v815_v22 = vpop.permute.xlu0 %814 }
 0x2d2   :  { %v818_v24 = vmul.f32 %v815_v22, %v784_v12  ;;  %v820_v28 = vmul.f32 %v815_v22, %v2968_v19  ;;  %v817_v29 = vmul.f32 %v815_v22, %v3379_v23  ;;  %v819_v62 = vmul.f32 %v815_v22, %v2963_v18 }
 0x2d3   :  { %v822_v35 = vmul.f32 %v815_v22, %v786_v21  ;;  %v821_v42 = vmul.f32 %v815_v22, %v3387_v30 }
 0x2d4   :  { %v832_v43 = vrot.slane %v818_v24, 2  ;;  %v833_v52 = vrot.slane %v820_v28, 2  ;;  %v829_v53 = vrot.slane %v817_v29, 2  ;;  %v830_v57 = vrot.slane %v819_v62, 2 }
 0x2d5   :  { %v837_v55 = vrot.slane %v822_v35, 2  ;;  %v835_v56 = vrot.slane %v821_v42, 2 }
 0x2d6   :  { %v834_v36 = vsel %vm798_vm3, %v832_v43, %v833_v52  ;;  %v831_v59 = vsel %vm798_vm3, %v829_v53, %v830_v57 }
 0x2d7   :  { %841 = vrot.lane.b32.xlu0 %v834_v36, %s2877_s23  ;;  %839 = vrot.lane.b32.xlu1 %v831_v59, %s2877_s23  ;;  %v838_v40 = vsel %vm798_vm3, %v833_v52, %v837_v55  ;;  %v836_v27 = vsel %vm798_vm3, %v830_v57, %v835_v56  ;;  %v2758_v56 = vld [vmem:[%s4849_s0 + $0x58] sm:$0xfc] }
 0x2db   :  { %845 = vrot.lane.b32.xlu0 %v838_v40, %s2877_s23  ;;  %843 = vrot.lane.b32.xlu1 %v836_v27, %s2877_s23  ;;  %v2760_v40 = vld [vmem:[%s4849_s0 + $0x78] sm:$0x3] }
 0x2df   :  { %859 = vrot.lane.b32.xlu1 %v2756_v63, %s2876_s17  ;;  %v3443_v63 = vld [vmem:[%s4849_s0 + $0x50] sm:$0xfc] }
 0x349   :  { %v3406_v10 = vpop.permute.xlu1 %839 }
 0x34d   :  { %v3408_v20 = vpop.permute.xlu1 %843 }
 0x351   :  { %v860_v8 = vpop.permute.xlu1 %859 }
 0x352   :  { %v863_v61 = vmul.f32 %v860_v8, %v784_v12  ;;  %v865_v60 = vmul.f32 %v860_v8, %v2968_v19  ;;  %v862_v13 = vmul.f32 %v860_v8, %v3379_v23  ;;  %v864_v22 = vmul.f32 %v860_v8, %v2963_v18  ;;  %v2762_v12 = vld [vmem:[%s4848_s1 + $0x1d] ss:$0 sm:$0xff] }
 0x353   :  { %v867_v24 = vmul.f32 %v860_v8, %v786_v21  ;;  %v866_v28 = vmul.f32 %v860_v8, %v3387_v30  ;;  %v3426_v21 = vpop.permute.xlu0 %841 }
 0x354   :  { %v877_v29 = vrot.slane %v863_v61, 2  ;;  %v878_v62 = vrot.slane %v865_v60, 2  ;;  %v874_v35 = vrot.slane %v862_v13, 2  ;;  %v875_v42 = vrot.slane %v864_v22, 2  ;;  %v3451_v22 = vld [vmem:[%s4849_s0 + $0x70] sm:$0x3] }
 0x355   :  { %v882_v53 = vrot.slane %v867_v24, 2  ;;  %v880_v57 = vrot.slane %v866_v28, 2 }
 0x356   :  { %v879_v43 = vsel %vm798_vm3, %v877_v29, %v878_v62  ;;  %v876_v52 = vsel %vm798_vm3, %v874_v35, %v875_v42 }
 0x357   :  { %886 = vrot.lane.b32.xlu1 %v879_v43, %s2878_s24  ;;  %884 = vrot.lane.b32.xlu0 %v876_v52, %s2878_s24  ;;  %v883_v19 = vsel %vm798_vm3, %v878_v62, %v882_v53  ;;  %v881_v18 = vsel %vm798_vm3, %v875_v42, %v880_v57  ;;  %v3428_v36 = vpop.permute.xlu0 %845 }
 0x35b   :  { %890 = vrot.lane.b32.xlu1 %v883_v19, %s2878_s24  ;;  %888 = vrot.lane.b32.xlu0 %v881_v18, %s2878_s24 }
 0x35f   :  { %928 = vrot.lane.b32.xlu0 %v2762_v12, %s2875_s16  ;;  %v2763_v12 = vld [vmem:[%s4848_s1 + $0x21] ss:$0 sm:$0xff] }
 0x3c9   :  { %v3430_v59 = vpop.permute.xlu0 %884 }
 0x3cd   :  { %v3432_v55 = vpop.permute.xlu0 %888 }
 0x3ce   :  { %4862 = vst [vmem:[#allocation2_spill] sm:$0xff] %v3432_v55 }
 0x3d1   :  { %v929_v27 = vpop.permute.xlu0 %928 }
 0x3d2   :  { %v932_v8 = vmul.f32 %v2758_v56, %v929_v27  ;;  %v934_v61 = vmul.f32 %v3000_v33, %v929_v27  ;;  %v931_v60 = vmul.f32 %v3443_v63, %v929_v27  ;;  %v933_v13 = vmul.f32 %v2995_v32, %v929_v27 }
 0x3d3   :  { %v936_v24 = vmul.f32 %v2760_v40, %v929_v27  ;;  %v935_v28 = vmul.f32 %v3451_v22, %v929_v27  ;;  %v3466_v27 = vpop.permute.xlu1 %886 }
 0x3d4   :  { %v946_v29 = vrot.slane %v932_v8, 2  ;;  %v947_v62 = vrot.slane %v934_v61, 2  ;;  %v943_v35 = vrot.slane %v931_v60, 2  ;;  %v944_v42 = vrot.slane %v933_v13, 2 }
 0x3d5   :  { %v951_v53 = vrot.slane %v936_v24, 2  ;;  %v949_v57 = vrot.slane %v935_v28, 2 }
 0x3d6   :  { %v948_v43 = vsel %vm798_vm3, %v946_v29, %v947_v62  ;;  %v945_v52 = vsel %vm798_vm3, %v943_v35, %v944_v42 }
 0x3d7   :  { %955 = vrot.lane.b32.xlu0 %v948_v43, %s2877_s23  ;;  %953 = vrot.lane.b32.xlu1 %v945_v52, %s2877_s23  ;;  %v952_v19 = vsel %vm798_vm3, %v947_v62, %v951_v53  ;;  %v950_v18 = vsel %vm798_vm3, %v944_v42, %v949_v57  ;;  %v3468_v8 = vpop.permute.xlu1 %890 }
 0x3d8   :  { %4863 = vst [vmem:[#allocation3_spill] sm:$0xff] %v3468_v8 }
 0x3db   :  { %959 = vrot.lane.b32.xlu0 %v952_v19, %s2877_s23  ;;  %957 = vrot.lane.b32.xlu1 %v950_v18, %s2877_s23 }
 0x3df   :  { %973 = vrot.lane.b32.xlu1 %v2763_v12, %s2876_s17 }
 0x449   :  { %v3470_v61 = vpop.permute.xlu1 %953 }
 0x44a   :  { %4864 = vst [vmem:[#allocation4_spill] sm:$0xff] %v3470_v61 }
 0x44d   :  { %v3472_v60 = vpop.permute.xlu1 %957 }
 0x44e   :  { %4865 = vst [vmem:[#allocation5_spill] sm:$0xff] %v3472_v60 }
 0x451   :  { %v974_v13 = vpop.permute.xlu1 %973 }
 0x452   :  { %v977_v24 = vmul.f32 %v2758_v56, %v974_v13  ;;  %v979_v28 = vmul.f32 %v3000_v33, %v974_v13  ;;  %v976_v29 = vmul.f32 %v3443_v63, %v974_v13  ;;  %v978_v62 = vmul.f32 %v2995_v32, %v974_v13  ;;  %v2769_v56 = vld [vmem:[%s4848_s1 + $0x1e] ss:$0 sm:$0xff] }
 0x453   :  { %v981_v35 = vmul.f32 %v2760_v40, %v974_v13  ;;  %v980_v42 = vmul.f32 %v3451_v22, %v974_v13  ;;  %v3490_v40 = vpop.permute.xlu0 %955 }
 0x454   :  { %v991_v43 = vrot.slane %v977_v24, 2  ;;  %v992_v52 = vrot.slane %v979_v28, 2  ;;  %v988_v53 = vrot.slane %v976_v29, 2  ;;  %v989_v57 = vrot.slane %v978_v62, 2  ;;  %4866 = vst [vmem:[#allocation6_spill] sm:$0xff] %v3490_v40 }
 0x455   :  { %v996_v12 = vrot.slane %v981_v35, 2  ;;  %v994_v60 = vrot.slane %v980_v42, 2  ;;  %v2767_v29 = vld [vmem:[%s4849_s0 + $0xc8] sm:$0x3]  ;;  %v3507_v35 = vld [vmem:[%s4849_s0 + $0xa0] sm:$0xfc] }
 0x456   :  { %v993_v19 = vsel %vm798_vm3, %v991_v43, %v992_v52  ;;  %v990_v18 = vsel %vm798_vm3, %v988_v53, %v989_v57  ;;  %4870 = vst [vmem:[#allocation10_spill] sm:$0xff] %v3507_v35 }
 0x457   :  { %1000 = vrot.lane.b32.xlu1 %v993_v19, %s2878_s24  ;;  %998 = vrot.lane.b32.xlu0 %v990_v18, %s2878_s24  ;;  %v997_v33 = vsel %vm798_vm3, %v992_v52, %v996_v12  ;;  %v995_v32 = vsel %vm798_vm3, %v989_v57, %v994_v60  ;;  %v3492_v13 = vpop.permute.xlu0 %959  ;;  %v2765_v60 = vld [vmem:[%s4849_s0 + $0xa8] sm:$0xfc]  ;;  %v3515_v57 = vld [vmem:[%s4849_s0 + $0xc0] sm:$0x3] }
 0x458   :  { %4867 = vst [vmem:[#allocation7_spill] sm:$0xff] %v3492_v13  ;;  %4871 = vst [vmem:[#allocation11_spill] sm:$0xff] %v3515_v57 }
 0x45b   :  { %1004 = vrot.lane.b32.xlu1 %v997_v33, %s2878_s24  ;;  %1002 = vrot.lane.b32.xlu0 %v995_v32, %s2878_s24 }
 0x45f   :  { %1042 = vrot.lane.b32.xlu0 %v2769_v56, %s2875_s16 }
 0x4c9   :  { %v3494_v24 = vpop.permute.xlu0 %998 }
 0x4ca   :  { %4868 = vst [vmem:[#allocation8_spill] sm:$0xff] %v3494_v24 }
 0x4cd   :  { %v3496_v28 = vpop.permute.xlu0 %1002 }
 0x4ce   :  { %4869 = vst [vmem:[#allocation9_spill] sm:$0xff] %v3496_v28 }
 0x4d1   :  { %v1043_v62 = vpop.permute.xlu0 %1042 }
 0x4d2   :  { %v1046_v42 = vmul.f32 %v2765_v60, %v1043_v62  ;;  %v1048_v43 = vmul.f32 %v3032_v47, %v1043_v62  ;;  %v1045_v52 = vmul.f32 %v3507_v35, %v1043_v62  ;;  %v1047_v53 = vmul.f32 %v3027_v46, %v1043_v62 }
 0x4d3   :  { %v1050_v19 = vmul.f32 %v2767_v29, %v1043_v62  ;;  %v1049_v18 = vmul.f32 %v3515_v57, %v1043_v62  ;;  %v2770_v62 = vld [vmem:[%s4848_s1 + $0x22] ss:$0 sm:$0xff] }
 0x4d4   :  { %v1060_v12 = vrot.slane %v1046_v42, 2  ;;  %v1061_v33 = vrot.slane %v1048_v43, 2  ;;  %v1057_v32 = vrot.slane %v1045_v52, 2  ;;  %v1058_v56 = vrot.slane %v1047_v53, 2  ;;  %v3530_v42 = vpop.permute.xlu1 %1000 }
 0x4d5   :  { %v1065_v13 = vrot.slane %v1050_v19, 2  ;;  %v1063_v24 = vrot.slane %v1049_v18, 2  ;;  %4872 = vst [vmem:[#allocation12_spill] sm:$0xff] %v3530_v42  ;;  %v3545_v18 = vld [vmem:[%s4849_s0 + $0xb0] sm:$0xff] }
 0x4d6   :  { %v1062_v28 = vsel %vm798_vm3, %v1060_v12, %v1061_v33  ;;  %v1059_v47 = vsel %vm798_vm3, %v1057_v32, %v1058_v56 }
 0x4d7   :  { %1069 = vrot.lane.b32.xlu0 %v1062_v28, %s2877_s23  ;;  %1067 = vrot.lane.b32.xlu1 %v1059_v47, %s2877_s23  ;;  %v1066_v46 = vsel %vm798_vm3, %v1061_v33, %v1065_v13  ;;  %v1064_v61 = vsel %vm798_vm3, %v1058_v56, %v1063_v24 }
 0x4d8   :  { %v3532_v43 = vpop.permute.xlu1 %1004 }
 0x4d9   :  { %4873 = vst [vmem:[#allocation13_spill] sm:$0xff] %v3532_v43 }
 0x4db   :  { %1073 = vrot.lane.b32.xlu0 %v1066_v46, %s2877_s23  ;;  %1071 = vrot.lane.b32.xlu1 %v1064_v61, %s2877_s23  ;;  %v2861_v61 = vld [vmem:[%s4849_s0 + $0xb8] sm:$0xff] }
 0x4df   :  { %1087 = vrot.lane.b32.xlu1 %v2770_v62, %s2876_s17 }
 0x549   :  { %v3534_v28 = vpop.permute.xlu1 %1067 }
 0x54a   :  { %4874 = vst [vmem:[#allocation14_spill] sm:$0xff] %v3534_v28 }
 0x54d   :  { %v3536_v52 = vpop.permute.xlu1 %1071 }
 0x54e   :  { %4875 = vst [vmem:[#allocation15_spill] sm:$0xff] %v3536_v52 }
 0x551   :  { %v1088_v13 = vpop.permute.xlu1 %1087 }
 0x552   :  { %v1091_v24 = vmul.f32 %v2765_v60, %v1088_v13  ;;  %v1093_v53 = vmul.f32 %v2861_v61, %v1088_v13  ;;  %v1090_v19 = vmul.f32 %v3507_v35, %v1088_v13  ;;  %v1092_v12 = vmul.f32 %v3545_v18, %v1088_v13 }
 0x553   :  { %v1095_v33 = vmul.f32 %v2767_v29, %v1088_v13  ;;  %v1094_v32 = vmul.f32 %v3515_v57, %v1088_v13  ;;  %v2776_v13 = vld [vmem:[%s4848_s1 + $0x1f] ss:$0 sm:$0xff] }
 0x554   :  { %v1105_v56 = vrot.slane %v1091_v24, 2  ;;  %v1106_v47 = vrot.slane %v1093_v53, 2  ;;  %v1102_v60 = vrot.slane %v1090_v19, 2  ;;  %v1103_v46 = vrot.slane %v1092_v12, 2  ;;  %v3561_v24 = vpop.permute.xlu0 %1069 }
 0x555   :  { %v1110_v52 = vrot.slane %v1095_v33, 2  ;;  %v1108_v28 = vrot.slane %v1094_v32, 2  ;;  %4876 = vst [vmem:[#allocation16_spill] sm:$0xff] %v3561_v24  ;;  %v3578_v33 = vld [vmem:[%s4849_s0 + $0xf0] sm:$0xfc] }
 0x556   :  { %v1107_v62 = vsel %vm798_vm3, %v1105_v56, %v1106_v47  ;;  %v1104_v61 = vsel %vm798_vm3, %v1102_v60, %v1103_v46  ;;  %v2863_v56 = vld [vmem:[%s4849_s0 + $0x108] sm:$0xff] }
 0x557   :  { %1114 = vrot.lane.b32.xlu1 %v1107_v62, %s2878_s24  ;;  %1112 = vrot.lane.b32.xlu0 %v1104_v61, %s2878_s24  ;;  %v1111_v43 = vsel %vm798_vm3, %v1106_v47, %v1110_v52  ;;  %v1109_v29 = vsel %vm798_vm3, %v1103_v46, %v1108_v28  ;;  %v2774_v28 = vld [vmem:[%s4849_s0 + $0x118] sm:$0x3]  ;;  %v3587_v46 = vld [vmem:[%s4849_s0 + $0x100] sm:$0xff] }
 0x558   :  { %v3563_v53 = vpop.permute.xlu0 %1073  ;;  %v3593_v61 = vld [vmem:[%s4849_s0 + $0x110] sm:$0x3] }
 0x559   :  { %4877 = vst [vmem:[#allocation17_spill] sm:$0xff] %v3563_v53 }
 0x55b   :  { %1118 = vrot.lane.b32.xlu1 %v1111_v43, %s2878_s24  ;;  %1116 = vrot.lane.b32.xlu0 %v1109_v29, %s2878_s24  ;;  %v2772_v43 = vld [vmem:[%s4849_s0 + $0xf8] sm:$0xfc] }
 0x55f   :  { %1156 = vrot.lane.b32.xlu0 %v2776_v13, %s2875_s16 }
 0x5c9   :  { %v3565_v19 = vpop.permute.xlu0 %1112 }
 0x5ca   :  { %4878 = vst [vmem:[#allocation18_spill] sm:$0xff] %v3565_v19 }
 0x5cd   :  { %v3567_v12 = vpop.permute.xlu0 %1116 }
 0x5ce   :  { %4879 = vst [vmem:[#allocation19_spill] sm:$0xff] %v3567_v12 }
 0x5d1   :  { %v1157_v52 = vpop.permute.xlu0 %1156 }
 0x5d2   :  { %v1160_v32 = vmul.f32 %v2772_v43, %v1157_v52  ;;  %v1162_v47 = vmul.f32 %v2863_v56, %v1157_v52  ;;  %v1159_v60 = vmul.f32 %v3578_v33, %v1157_v52  ;;  %v1161_v62 = vmul.f32 %v3587_v46, %v1157_v52 }
 0x5d3   :  { %v1164_v29 = vmul.f32 %v2774_v28, %v1157_v52  ;;  %v1163_v13 = vmul.f32 %v3593_v61, %v1157_v52 }
 0x5d4   :  { %v1174_v12 = vrot.slane %v1160_v32, 2  ;;  %v1175_v53 = vrot.slane %v1162_v47, 2  ;;  %v1171_v19 = vrot.slane %v1159_v60, 2  ;;  %v1172_v24 = vrot.slane %v1161_v62, 2 }
 0x5d5   :  { %v1179_v40 = vrot.slane %v1164_v29, 2  ;;  %v1177_v35 = vrot.slane %v1163_v13, 2 }
 0x5d6   :  { %v1176_v42 = vsel %vm798_vm3, %v1174_v12, %v1175_v53  ;;  %v1173_v57 = vsel %vm798_vm3, %v1171_v19, %v1172_v24  ;;  %v2777_v12 = vld [vmem:[%s4848_s1 + $0x23] ss:$0 sm:$0xff]  ;;  %v3608_v19 = vpop.permute.xlu1 %1114 }
 0x5d7   :  { %1183 = vrot.lane.b32.xlu0 %v1176_v42, %s2877_s23  ;;  %1181 = vrot.lane.b32.xlu1 %v1173_v57, %s2877_s23  ;;  %v1180_v55 = vsel %vm798_vm3, %v1175_v53, %v1179_v40  ;;  %v1178_v8 = vsel %vm798_vm3, %v1172_v24, %v1177_v35 }
 0x5da   :  { %v3610_v52 = vpop.permute.xlu1 %1118 }
 0x5db   :  { %1187 = vrot.lane.b32.xlu0 %v1180_v55, %s2877_s23  ;;  %1185 = vrot.lane.b32.xlu1 %v1178_v8, %s2877_s23 }
 0x5df   :  { %1201 = vrot.lane.b32.xlu1 %v2777_v12, %s2876_s17 }
 0x649   :  { %v3612_v42 = vpop.permute.xlu1 %1181 }
 0x64a   :  { %4880 = vst [vmem:[#allocation20_spill] sm:$0xff] %v3612_v42 }
 0x64d   :  { %v3614_v57 = vpop.permute.xlu1 %1185 }
 0x64e   :  { %4881 = vst [vmem:[#allocation21_spill] sm:$0xff] %v3614_v57 }
 0x651   :  { %v1202_v40 = vpop.permute.xlu1 %1201 }
 0x652   :  { %v1205_v35 = vmul.f32 %v2772_v43, %v1202_v40  ;;  %v1207_v24 = vmul.f32 %v2863_v56, %v1202_v40  ;;  %v1204_v55 = vmul.f32 %v3578_v33, %v1202_v40  ;;  %v1206_v8 = vmul.f32 %v3587_v46, %v1202_v40  ;;  %v2780_v56 = vld [vmem:[%s4848_s1 + $0x4] ss:$0 sm:$0xff] }
 0x653   :  { %v1209_v53 = vmul.f32 %v2774_v28, %v1202_v40  ;;  %v1208_v32 = vmul.f32 %v3593_v61, %v1202_v40  ;;  %v2744_v40 = vld [vmem:[%s4848_s1 + $0xe] ss:$0 sm:$0xff] }
 0x654   :  { %v1219_v47 = vrot.slane %v1205_v35, 2  ;;  %v1220_v60 = vrot.slane %v1207_v24, 2  ;;  %v1216_v62 = vrot.slane %v1204_v55, 2  ;;  %v1217_v29 = vrot.slane %v1206_v8, 2 }
 0x655   :  { %v1224_v42 = vrot.slane %v1209_v53, 2  ;;  %v1222_v57 = vrot.slane %v1208_v32, 2  ;;  %v564_v35 = vmul.f32 %v2744_v40, %v3149_v25  ;;  %v549_v8 = vsel %vm91_vm2, %v3294_v5, %v3264_v26  ;;  %v2751_v25 = vld [vmem:[%s4848_s1 + $0xf] ss:$0 sm:$0xff] }
 0x656   :  { %v1221_v13 = vsel %vm798_vm3, %v1219_v47, %v1220_v60  ;;  %v1218_v12 = vsel %vm798_vm3, %v1216_v62, %v1217_v29  ;;  %v566_v53 = vmul.f32 %v2744_v40, %v3172_v44  ;;  %v505_v47 = vsel %vm59_vm1, %v3262_v39, %v3292_v3 }
 0x657   :  { %1228 = vrot.lane.b32.xlu1 %v1221_v13, %s2878_s24  ;;  %1226 = vrot.lane.b32.xlu0 %v1218_v12, %s2878_s24  ;;  %v1225_v43 = vsel %vm798_vm3, %v1220_v60, %v1224_v42  ;;  %v1223_v28 = vsel %vm798_vm3, %v1217_v29, %v1222_v57  ;;  %v565_v42 = vmul.f32 %v3545_v18, %v2744_v40  ;;  %v570_v24 = vrot.slane %v564_v35, 1 }
 0x658   :  { %v504_v57 = vsel %vm59_vm1, %v3258_v37, %v3290_v1  ;;  %v550_v1 = vsel %vm91_vm2, %v3296_v6, %v3266_v31  ;;  %v573_v26 = vrot.slane %v566_v53, 1  ;;  %v678_v44 = vmul.f32 %v2751_v25, %v3315_v17 }
 0x659   :  { %v571_v55 = vrot.slane %v565_v42, 1  ;;  %v508_v32 = vadd.f32 %v504_v57, %v3254_v15  ;;  %v679_v15 = vmul.f32 %v3587_v46, %v2751_v25  ;;  %v509_v5 = vadd.f32 %v505_v47, %v3260_v38  ;;  %v2754_v38 = vld [vmem:[%s4848_s1 + $0x18] ss:$0 sm:$0xff] }
 0x65a   :  { %v618_v62 = vsel %vm59_vm1, %v3268_v2, %v3298_v4  ;;  %v680_v3 = vmul.f32 %v2751_v25, %v3323_v54  ;;  %v663_v31 = vsel %vm91_vm2, %v3302_v7, %v3338_v48  ;;  %v684_v6 = vrot.slane %v678_v44, 1 }
 0x65b   :  { %1232 = vrot.lane.b32.xlu1 %v1225_v43, %s2878_s24  ;;  %1230 = vrot.lane.b32.xlu0 %v1223_v28, %s2878_s24  ;;  %v553_v60 = vadd.f32 %v549_v8, %v508_v32  ;;  %v572_v37 = vsel %vm341_vm0, %v570_v24, %v571_v55  ;;  %v554_v29 = vadd.f32 %v550_v1, %v509_v5  ;;  %v685_v17 = vrot.slane %v679_v15, 1  ;;  %v2768_v15 = vld [vmem:[%s4848_s1 + $0x1a] ss:$0 sm:$0xff] }
 0x65c   :  { %v574_v13 = vsel %vm341_vm0, %v571_v55, %v573_v26  ;;  %v619_v2 = vsel %vm59_vm1, %v3270_v34, %v3300_v58  ;;  %v687_v54 = vrot.slane %v680_v3, 1  ;;  %v664_v28 = vsel %vm91_vm2, %v3304_v9, %v3340_v49  ;;  %v2761_v55 = vld [vmem:[%s4848_s1 + $0x19] ss:$0 sm:$0xff] }
 0x65d   :  { %v577_v39 = vadd.f32 %v572_v37, %v553_v60  ;;  %v578_v4 = vadd.f32 %v574_v13, %v554_v29  ;;  %v686_v7 = vsel %vm341_vm0, %v684_v6, %v685_v17  ;;  %v792_v48 = vmul.f32 %v2754_v38, %v3379_v23  ;;  %v4882_v29 = vld [vmem:[#allocation3_spill] sm:$0xff]  ;;  %v4885_v6 = vld [vmem:[#allocation6_spill] sm:$0xff] }
 0x65e   :  { %v732_v34 = vsel %vm59_vm1, %v3342_v50, %v3362_v16  ;;  %v688_v57 = vsel %vm341_vm0, %v685_v17, %v687_v54  ;;  %v777_v9 = vsel %vm91_vm2, %v3366_v14, %v3402_v45  ;;  %v794_v24 = vmul.f32 %v2754_v38, %v3387_v30  ;;  %v2866_v14 = vld [vmem:[%s4849_s0 + $0x60] sm:$0xff]  ;;  %v4886_v17 = vld [vmem:[#allocation4_spill] sm:$0xff] }
 0x65f   :  { %1274 = vrot.lane.b32.xlu0 %v2780_v56, %s2875_s16  ;;  %v622_v12 = vadd.f32 %v618_v62, %v577_v39  ;;  %v2865_v56 = vld [vmem:[%s4849_s0 + $0x10] sm:$0xff]  ;;  %v623_v35 = vadd.f32 %v619_v2, %v578_v4  ;;  %v799_v49 = vrot.slane %v792_v48, 2  ;;  %v733_v50 = vsel %vm59_vm1, %v3344_v51, %v3364_v41  ;;  %v4883_v39 = vld [vmem:[#allocation2_spill] sm:$0xff] }
 0x660   :  { %v793_v40 = vmul.f32 %v2865_v56, %v2754_v38  ;;  %v907_v32 = vmul.f32 %v2761_v55, %v3443_v63  ;;  %v908_v45 = vmul.f32 %v2866_v14, %v2761_v55  ;;  %v778_v30 = vsel %vm91_vm2, %v3368_v11, %v3404_v0  ;;  %v4889_v54 = vld [vmem:[#allocation8_spill] sm:$0xff] }
 0x661   :  { %v667_v43 = vadd.f32 %v663_v31, %v622_v12  ;;  %v668_v58 = vadd.f32 %v664_v28, %v623_v35  ;;  %v802_v47 = vrot.slane %v794_v24, 2  ;;  %v847_v51 = vsel %vm59_vm1, %v3406_v10, %v3426_v21  ;;  %v4891_v35 = vld [vmem:[#allocation5_spill] sm:$0xff] }
 0x662   :  { %v800_v23 = vrot.slane %v793_v40, 2  ;;  %v913_v63 = vrot.slane %v907_v32, 2  ;;  %v914_v1 = vrot.slane %v908_v45, 2  ;;  %v892_v44 = vsel %vm91_vm2, %v3430_v59, %v3466_v27  ;;  %v4884_v27 = vld [vmem:[#allocation10_spill] sm:$0xff]  ;;  %v4890_v40 = vld [vmem:[#allocation7_spill] sm:$0xff] }
 0x663   :  { %v691_v42 = vadd.f32 %v686_v7, %v667_v43  ;;  %v692_v16 = vadd.f32 %v688_v57, %v668_v58  ;;  %v909_v11 = vmul.f32 %v2761_v55, %v3451_v22  ;;  %v848_v10 = vsel %vm59_vm1, %v3408_v20, %v3428_v36  ;;  %v4887_v36 = vld [vmem:[#allocation11_spill] sm:$0xff]  ;;  %v4888_v43 = vld [vmem:[#allocation12_spill] sm:$0xff] }
 0x664   :  { %v801_v25 = vsel %vm798_vm3, %v799_v49, %v800_v23  ;;  %v803_v26 = vsel %vm798_vm3, %v800_v23, %v802_v47  ;;  %v915_v62 = vsel %vm798_vm3, %v913_v63, %v914_v1  ;;  %v893_v3 = vsel %vm91_vm2, %v4883_v39, %v4882_v29  ;;  %v4893_v49 = vld [vmem:[#allocation9_spill] sm:$0xff]  ;;  %v4896_v47 = vld [vmem:[#allocation18_spill] sm:$0xff]  ;;  %v4898_v63 = vld [vmem:[#allocation15_spill] sm:$0xff] }
 0x665   :  { %v736_v8 = vadd.f32 %v732_v34, %v691_v42  ;;  %v737_v60 = vadd.f32 %v733_v50, %v692_v16  ;;  %v916_v59 = vrot.slane %v909_v11, 2  ;;  %v1021_v22 = vmul.f32 %v2768_v15, %v4884_v27  ;;  %v4894_v16 = vld [vmem:[#allocation16_spill] sm:$0xff]  ;;  %v4899_v11 = vld [vmem:[#allocation19_spill] sm:$0xff] }
 0x666   :  { %v1022_v13 = vmul.f32 %v3545_v18, %v2768_v15  ;;  %v961_v12 = vsel %vm59_vm1, %v4886_v17, %v4885_v6  ;;  %v1023_v2 = vmul.f32 %v2768_v15, %v4887_v36  ;;  %v1006_v28 = vsel %vm91_vm2, %v4889_v54, %v4888_v43  ;;  %v2775_v18 = vld [vmem:[%s4848_s1 + $0x1b] ss:$0 sm:$0xff]  ;;  %v3772_v43 = vld [vmem:[%s4849_s0 + $0x20] sm:$0xfc] }
 0x667   :  { %v781_v53 = vadd.f32 %v777_v9, %v736_v8  ;;  %v782_v41 = vadd.f32 %v778_v30, %v737_v60  ;;  %v917_v4 = vsel %vm798_vm3, %v914_v1, %v916_v59  ;;  %v1027_v7 = vrot.slane %v1021_v22, 2  ;;  %v4892_v9 = vld [vmem:[#allocation13_spill] sm:$0xff] }
 0x668   :  { %v1028_v48 = vrot.slane %v1022_v13, 2  ;;  %v962_v34 = vsel %vm59_vm1, %v4891_v35, %v4890_v40  ;;  %v1030_v57 = vrot.slane %v1023_v2, 2  ;;  %v1007_v23 = vsel %vm91_vm2, %v4893_v49, %v4892_v9  ;;  %v4901_v22 = vld [vmem:[#allocation21_spill] sm:$0xff]  ;;  %v2781_v9 = vld [vmem:[%s4848_s1 + $0x8] ss:$0 sm:$0xff] }
 0x669   :  { %v806_v37 = vadd.f32 %v801_v25, %v781_v53  ;;  %v807_v21 = vadd.f32 %v803_v26, %v782_v41  ;;  %v1135_v55 = vmul.f32 %v2775_v18, %v3578_v33  ;;  %v1136_v8 = vmul.f32 %v3587_v46, %v2775_v18  ;;  %v4895_v53 = vld [vmem:[#allocation14_spill] sm:$0xff]  ;;  %v1184_v25 = vpop.permute.xlu0 %1183  ;;  %v4897_v46 = vld [vmem:[#allocation17_spill] sm:$0xff] }
 0x66a   :  { %v1029_v24 = vsel %vm798_vm3, %v1027_v7, %v1028_v48  ;;  %v1075_v32 = vsel %vm59_vm1, %v4895_v53, %v4894_v16  ;;  %v1031_v30 = vsel %vm798_vm3, %v1028_v48, %v1030_v57  ;;  %v1120_v60 = vsel %vm91_vm2, %v4896_v47, %v3608_v19 }
 0x66b   :  { %v851_v0 = vadd.f32 %v847_v51, %v806_v37  ;;  %v852_v31 = vadd.f32 %v848_v10, %v807_v21  ;;  %v1141_v51 = vrot.slane %v1135_v55, 2  ;;  %v1142_v41 = vrot.slane %v1136_v8, 2 }
 0x66c   :  { %v1137_v33 = vmul.f32 %v2775_v18, %v3593_v61  ;;  %v1076_v1 = vsel %vm59_vm1, %v4898_v63, %v4897_v46  ;;  %v3786_v18 = vld [vmem:[%s4849_s0 + $0x30] sm:$0xff] }
 0x66d   :  { %v896_v5 = vadd.f32 %v892_v44, %v851_v0  ;;  %v897_v38 = vadd.f32 %v893_v3, %v852_v31  ;;  %v1121_v0 = vsel %vm91_vm2, %v4899_v11, %v3610_v52  ;;  %v1143_v15 = vsel %vm798_vm3, %v1141_v51, %v1142_v41  ;;  %v1188_v19 = vpop.permute.xlu0 %1187  ;;  %v3847_v46 = vld [vmem:[%s4849_s0 + $0x70] sm:$0xfc] }
 0x66e   :  { %v1144_v10 = vrot.slane %v1137_v33, 2  ;;  %v1190_v13 = vsel %vm59_vm1, %v4901_v22, %v1188_v19  ;;  %v2783_v33 = vld [vmem:[%s4849_s0 + $0x78] sm:$0xfc] }
 0x66f   :  { %v920_v20 = vadd.f32 %v915_v62, %v896_v5  ;;  %v921_v58 = vadd.f32 %v917_v4, %v897_v38  ;;  %v4900_v5 = vld [vmem:[#allocation20_spill] sm:$0xff]  ;;  %v1252_v4 = vld [vmem:[%s4849_s0 + $0x28] sm:$0xfc] }
 0x670   :  { %v1189_v62 = vsel %vm59_vm1, %v4900_v5, %v1184_v25  ;;  %v1145_v39 = vsel %vm798_vm3, %v1142_v41, %v1144_v10  ;;  %v3872_v10 = vld [vmem:[%s4849_s0 + $0x90] sm:$0x3]  ;;  %v2790_v5 = vld [vmem:[%s4848_s1 + $0x9] ss:$0 sm:$0xff] }
 0x671   :  { %v965_v56 = vadd.f32 %v961_v12, %v920_v20  ;;  %v966_v50 = vadd.f32 %v962_v34, %v921_v58  ;;  %v1256_v34 = vld [vmem:[%s4849_s0 + $0x48] sm:$0x3]  ;;  %v3798_v58 = vld [vmem:[%s4849_s0 + $0x40] sm:$0x3] }
 0x673   :  { %v1010_v42 = vadd.f32 %v1006_v28, %v965_v56  ;;  %v1011_v14 = vadd.f32 %v1007_v23, %v966_v50  ;;  %v3781_v56 = vld [vmem:[%s4849_s0 + $0x38] sm:$0xff] }
 0x675   :  { %v1034_v45 = vadd.f32 %v1029_v24, %v1010_v42  ;;  %v1035_v26 = vadd.f32 %v1031_v30, %v1011_v14 }
 0x677   :  { %v1079_v37 = vadd.f32 %v1075_v32, %v1034_v45  ;;  %v1080_v21 = vadd.f32 %v1076_v1, %v1035_v26  ;;  %v2789_v45 = vld [vmem:[%s4848_s1 + $0x5] ss:$0 sm:$0xff]  ;;  %v3853_v26 = vld [vmem:[%s4849_s0 + $0x88] sm:$0xff] }
 0x679   :  { %v1124_v44 = vadd.f32 %v1120_v60, %v1079_v37  ;;  %v1125_v61 = vadd.f32 %v1121_v0, %v1080_v21 }
 0x67b   :  { %v1148_v29 = vadd.f32 %v1143_v15, %v1124_v44  ;;  %v1149_v31 = vadd.f32 %v1145_v39, %v1125_v61  ;;  %v3860_v44 = vld [vmem:[%s4849_s0 + $0x80] sm:$0xff]  ;;  %v2787_v15 = vld [vmem:[%s4849_s0 + $0x98] sm:$0x3] }
 0x67d   :  { %v1193_v3 = vadd.f32 %v1189_v62, %v1148_v29  ;;  %v1194_v17 = vadd.f32 %v1190_v13, %v1149_v31 }
 0x6c9   :  { %v1229_v59 = vpop.permute.xlu1 %1228  ;;  %v1227_v27 = vpop.permute.xlu0 %1226 }
 0x6ca   :  { %v1234_v52 = vsel %vm91_vm2, %v1227_v27, %v1229_v59 }
 0x6cb   :  { %v1238_v6 = vadd.f32 %v1234_v52, %v1193_v3 }
 0x6cd   :  { %v1240_v12 = vmax.f32 %v1238_v6, 0.0  ;;  %v1233_v38 = vpop.permute.xlu1 %1232  ;;  %v1231_v20 = vpop.permute.xlu0 %1230 }
 0x6ce   :  { %v1235_v36 = vsel %vm91_vm2, %v1231_v20, %v1233_v38 }
 0x6cf   :  { %1242 = vst [vmem:[%s4851_s3] sm:$0xff] %v1240_v12  ;;  %v1239_v2 = vadd.f32 %v1235_v36, %v1194_v17  ;;  %v2798_v12 = vld [vmem:[%s4848_s1 + $0x6] ss:$0 sm:$0xff] }
 0x6d1   :  { %v1241_v54 = vmax.f32 %v1239_v2, 0.0  ;;  %v1275_v28 = vpop.permute.xlu0 %1274 }
 0x6d2   :  { %v1278_v7 = vmul.f32 %v1275_v28, %v1252_v4  ;;  %v1277_v48 = vmul.f32 %v1275_v28, %v3772_v43  ;;  %v1280_v40 = vmul.f32 %v1275_v28, %v3781_v56  ;;  %v1279_v35 = vmul.f32 %v1275_v28, %v3786_v18 }
 0x6d3   :  { %1243 = vst [vmem:[%s4851_s3 + $0x8] sm:$0xff] %v1241_v54  ;;  %v1282_v42 = vmul.f32 %v1275_v28, %v1256_v34  ;;  %v1281_v57 = vmul.f32 %v1275_v28, %v3798_v58  ;;  %v2792_v28 = vld [vmem:[%s4849_s0 + $0xc8] sm:$0xfc] }
 0x6d4   :  { %1291 = vrot.lane.b32.xlu0 %v1278_v7, %s2877_s23  ;;  %1289 = vrot.lane.b32.xlu1 %v1277_v48, %s2877_s23  ;;  %v3925_v48 = vld [vmem:[%s4849_s0 + $0xc0] sm:$0xfc] }
 0x6d8   :  { %1295 = vrot.lane.b32.xlu0 %v1280_v40, %s2877_s23  ;;  %1293 = vrot.lane.b32.xlu1 %v1279_v35, %s2877_s23 }
 0x6dc   :  { %1299 = vrot.lane.b32.xlu0 %v1282_v42, %s2877_s23  ;;  %1297 = vrot.lane.b32.xlu1 %v1281_v57, %s2877_s23  ;;  %v3938_v42 = vld [vmem:[%s4849_s0 + $0xd0] sm:$0xff] }
 0x6e0   :  { %1316 = vrot.lane.b32.xlu1 %v2781_v9, %s2876_s17 }
 0x746   :  { %v3809_v49 = vpop.permute.xlu1 %1289  ;;  %v3829_v30 = vpop.permute.xlu0 %1291 }
 0x74a   :  { %v3811_v23 = vpop.permute.xlu1 %1293  ;;  %v3831_v25 = vpop.permute.xlu0 %1295 }
 0x74e   :  { %v3813_v24 = vpop.permute.xlu1 %1297  ;;  %v3833_v47 = vpop.permute.xlu0 %1299 }
 0x752   :  { %v1317_v55 = vpop.permute.xlu1 %1316 }
 0x753   :  { %v1320_v8 = vmul.f32 %v1317_v55, %v1252_v4  ;;  %v1319_v50 = vmul.f32 %v1317_v55, %v3772_v43  ;;  %v1322_v16 = vmul.f32 %v1317_v55, %v3781_v56  ;;  %v1321_v53 = vmul.f32 %v1317_v55, %v3786_v18 }
 0x754   :  { %v1324_v32 = vmul.f32 %v1317_v55, %v1256_v34  ;;  %v1323_v14 = vmul.f32 %v1317_v55, %v3798_v58  ;;  %v3931_v34 = vld [vmem:[%s4849_s0 + $0xd8] sm:$0xff]  ;;  %v2796_v55 = vld [vmem:[%s4849_s0 + $0xe8] sm:$0x3] }
 0x755   :  { %1333 = vrot.lane.b32.xlu1 %v1320_v8, %s2878_s24  ;;  %1331 = vrot.lane.b32.xlu0 %v1319_v50, %s2878_s24  ;;  %4902 = vst [vmem:[#allocation3_spill] sm:$0xff] %v3931_v34  ;;  %v3950_v8 = vld [vmem:[%s4849_s0 + $0xe0] sm:$0x3] }
 0x759   :  { %1337 = vrot.lane.b32.xlu1 %v1322_v16, %s2878_s24  ;;  %1335 = vrot.lane.b32.xlu0 %v1321_v53, %s2878_s24  ;;  %v2799_v53 = vld [vmem:[%s4848_s1 + $0xa] ss:$0 sm:$0xff] }
 0x75d   :  { %1341 = vrot.lane.b32.xlu1 %v1324_v32, %s2878_s24  ;;  %1339 = vrot.lane.b32.xlu0 %v1323_v14, %s2878_s24 }
 0x761   :  { %1375 = vrot.lane.b32.xlu0 %v2789_v45, %s2875_s16 }
 0x7c7   :  { %v3835_v60 = vpop.permute.xlu0 %1331  ;;  %v3881_v62 = vpop.permute.xlu1 %1333 }
 0x7cb   :  { %v3837_v51 = vpop.permute.xlu0 %1335  ;;  %v3883_v61 = vpop.permute.xlu1 %1337 }
 0x7cf   :  { %v3839_v41 = vpop.permute.xlu0 %1339  ;;  %v3885_v29 = vpop.permute.xlu1 %1341 }
 0x7d3   :  { %v1376_v37 = vpop.permute.xlu0 %1375 }
 0x7d4   :  { %v1379_v63 = vmul.f32 %v2783_v33, %v1376_v37  ;;  %v1378_v1 = vmul.f32 %v3847_v46, %v1376_v37  ;;  %v1381_v11 = vmul.f32 %v3853_v26, %v1376_v37  ;;  %v1380_v0 = vmul.f32 %v3860_v44, %v1376_v37 }
 0x7d5   :  { %v1383_v21 = vmul.f32 %v2787_v15, %v1376_v37  ;;  %v1382_v19 = vmul.f32 %v3872_v10, %v1376_v37 }
 0x7d6   :  { %1392 = vrot.lane.b32.xlu0 %v1379_v63, %s2877_s23  ;;  %1390 = vrot.lane.b32.xlu1 %v1378_v1, %s2877_s23 }
 0x7da   :  { %1396 = vrot.lane.b32.xlu0 %v1381_v11, %s2877_s23  ;;  %1394 = vrot.lane.b32.xlu1 %v1380_v0, %s2877_s23 }
 0x7de   :  { %1400 = vrot.lane.b32.xlu0 %v1383_v21, %s2877_s23  ;;  %1398 = vrot.lane.b32.xlu1 %v1382_v19, %s2877_s23 }
 0x7e2   :  { %1417 = vrot.lane.b32.xlu1 %v2790_v5, %s2876_s17 }
 0x848   :  { %v3887_v39 = vpop.permute.xlu1 %1390  ;;  %v3907_v38 = vpop.permute.xlu0 %1392 }
 0x84c   :  { %v3889_v3 = vpop.permute.xlu1 %1394  ;;  %v3909_v20 = vpop.permute.xlu0 %1396 }
 0x850   :  { %v3891_v59 = vpop.permute.xlu1 %1398  ;;  %v3911_v36 = vpop.permute.xlu0 %1400 }
 0x854   :  { %v1418_v27 = vpop.permute.xlu1 %1417 }
 0x855   :  { %v1421_v22 = vmul.f32 %v2783_v33, %v1418_v27  ;;  %v1420_v13 = vmul.f32 %v3847_v46, %v1418_v27  ;;  %v1423_v52 = vmul.f32 %v3853_v26, %v1418_v27  ;;  %v1422_v31 = vmul.f32 %v3860_v44, %v1418_v27 }
 0x856   :  { %v1425_v6 = vmul.f32 %v2787_v15, %v1418_v27  ;;  %v1424_v17 = vmul.f32 %v3872_v10, %v1418_v27  ;;  %v2807_v27 = vld [vmem:[%s4848_s1 + $0x7] ss:$0 sm:$0xff] }
 0x857   :  { %1434 = vrot.lane.b32.xlu1 %v1421_v22, %s2878_s24  ;;  %1432 = vrot.lane.b32.xlu0 %v1420_v13, %s2878_s24 }
 0x85b   :  { %1438 = vrot.lane.b32.xlu1 %v1423_v52, %s2878_s24  ;;  %1436 = vrot.lane.b32.xlu0 %v1422_v31, %s2878_s24 }
 0x85f   :  { %1442 = vrot.lane.b32.xlu1 %v1425_v6, %s2878_s24  ;;  %1440 = vrot.lane.b32.xlu0 %v1424_v17, %s2878_s24 }
 0x863   :  { %1476 = vrot.lane.b32.xlu0 %v2798_v12, %s2875_s16  ;;  %v2801_v12 = vld [vmem:[%s4849_s0 + $0x118] sm:$0xfc] }
 0x8c9   :  { %v3913_v2 = vpop.permute.xlu0 %1432  ;;  %v3959_v32 = vpop.permute.xlu1 %1434 }
 0x8cd   :  { %v3915_v4 = vpop.permute.xlu0 %1436  ;;  %v3961_v14 = vpop.permute.xlu1 %1438 }
 0x8d1   :  { %v3917_v54 = vpop.permute.xlu0 %1440  ;;  %v3963_v45 = vpop.permute.xlu1 %1442 }
 0x8d5   :  { %v1477_v7 = vpop.permute.xlu0 %1476 }
 0x8d6   :  { %v1480_v40 = vmul.f32 %v2792_v28, %v1477_v7  ;;  %v1479_v35 = vmul.f32 %v3925_v48, %v1477_v7  ;;  %v1482_v57 = vmul.f32 %v3931_v34, %v1477_v7  ;;  %v1481_v9 = vmul.f32 %v3938_v42, %v1477_v7 }
 0x8d7   :  { %v1484_v50 = vmul.f32 %v2796_v55, %v1477_v7  ;;  %v1483_v16 = vmul.f32 %v3950_v8, %v1477_v7  ;;  %v4003_v7 = vld [vmem:[%s4849_s0 + $0x110] sm:$0xfc] }
 0x8d8   :  { %1493 = vrot.lane.b32.xlu0 %v1480_v40, %s2877_s23  ;;  %1491 = vrot.lane.b32.xlu1 %v1479_v35, %s2877_s23 }
 0x8dc   :  { %1497 = vrot.lane.b32.xlu0 %v1482_v57, %s2877_s23  ;;  %1495 = vrot.lane.b32.xlu1 %v1481_v9, %s2877_s23  ;;  %v4009_v57 = vld [vmem:[%s4849_s0 + $0x128] sm:$0xff]  ;;  %v4016_v9 = vld [vmem:[%s4849_s0 + $0x120] sm:$0xff] }
 0x8dd   :  { %4907 = vst [vmem:[#allocation11_spill] sm:$0xff] %v4009_v57  ;;  %4908 = vst [vmem:[#allocation12_spill] sm:$0xff] %v4016_v9 }
 0x8e0   :  { %1501 = vrot.lane.b32.xlu0 %v1484_v50, %s2877_s23  ;;  %1499 = vrot.lane.b32.xlu1 %v1483_v16, %s2877_s23  ;;  %v2805_v16 = vld [vmem:[%s4849_s0 + $0x138] sm:$0x3] }
 0x8e4   :  { %1518 = vrot.lane.b32.xlu1 %v2799_v53, %s2876_s17  ;;  %v4028_v53 = vld [vmem:[%s4849_s0 + $0x130] sm:$0x3] }
 0x8e5   :  { %4909 = vst [vmem:[#allocation8_spill] sm:$0xff] %v4028_v53 }
 0x94a   :  { %v3965_v33 = vpop.permute.xlu1 %1491  ;;  %v3985_v22 = vpop.permute.xlu0 %1493 }
 0x94e   :  { %v3967_v37 = vpop.permute.xlu1 %1495  ;;  %v3987_v13 = vpop.permute.xlu0 %1497 }
 0x952   :  { %v3969_v63 = vpop.permute.xlu1 %1499  ;;  %v3989_v52 = vpop.permute.xlu0 %1501 }
 0x953   :  { %4903 = vst [vmem:[#allocation2_spill] sm:$0xff] %v3969_v63  ;;  %4904 = vst [vmem:[#allocation10_spill] sm:$0xff] %v3989_v52 }
 0x956   :  { %v1519_v1 = vpop.permute.xlu1 %1518 }
 0x957   :  { %v1522_v11 = vmul.f32 %v2792_v28, %v1519_v1  ;;  %v1521_v0 = vmul.f32 %v3925_v48, %v1519_v1  ;;  %v1524_v15 = vmul.f32 %v3931_v34, %v1519_v1  ;;  %v1523_v21 = vmul.f32 %v3938_v42, %v1519_v1 }
 0x958   :  { %v1526_v19 = vmul.f32 %v2796_v55, %v1519_v1  ;;  %v1525_v5 = vmul.f32 %v3950_v8, %v1519_v1 }
 0x959   :  { %1535 = vrot.lane.b32.xlu1 %v1522_v11, %s2878_s24  ;;  %1533 = vrot.lane.b32.xlu0 %v1521_v0, %s2878_s24  ;;  %v2808_v0 = vld [vmem:[%s4848_s1 + $0xb] ss:$0 sm:$0xff] }
 0x95d   :  { %1539 = vrot.lane.b32.xlu1 %v1524_v15, %s2878_s24  ;;  %1537 = vrot.lane.b32.xlu0 %v1523_v21, %s2878_s24 }
 0x961   :  { %1543 = vrot.lane.b32.xlu1 %v1526_v19, %s2878_s24  ;;  %1541 = vrot.lane.b32.xlu0 %v1525_v5, %s2878_s24 }
 0x965   :  { %1577 = vrot.lane.b32.xlu0 %v2807_v27, %s2875_s16 }
 0x9cb   :  { %v3991_v31 = vpop.permute.xlu0 %1533  ;;  %v4037_v15 = vpop.permute.xlu1 %1535 }
 0x9cf   :  { %v3993_v6 = vpop.permute.xlu0 %1537  ;;  %v4039_v21 = vpop.permute.xlu1 %1539 }
 0x9d0   :  { %4905 = vst [vmem:[#allocation6_spill] sm:$0xff] %v3993_v6 }
 0x9d3   :  { %v3995_v17 = vpop.permute.xlu0 %1541  ;;  %v4041_v19 = vpop.permute.xlu1 %1543 }
 0x9d4   :  { %4906 = vst [vmem:[#allocation4_spill] sm:$0xff] %v3995_v17  ;;  %4910 = vst [vmem:[#allocation7_spill] sm:$0xff] %v4041_v19 }
 0x9d7   :  { %v1578_v28 = vpop.permute.xlu0 %1577 }
 0x9d8   :  { %v1581_v40 = vmul.f32 %v2801_v12, %v1578_v28  ;;  %v1580_v35 = vmul.f32 %v4003_v7, %v1578_v28  ;;  %v1583_v55 = vmul.f32 %v4009_v57, %v1578_v28  ;;  %v1582_v50 = vmul.f32 %v4016_v9, %v1578_v28 }
 0x9d9   :  { %v1585_v1 = vmul.f32 %v2805_v16, %v1578_v28  ;;  %v1584_v11 = vmul.f32 %v4028_v53, %v1578_v28 }
 0x9da   :  { %1594 = vrot.lane.b32.xlu0 %v1581_v40, %s2877_s23  ;;  %1592 = vrot.lane.b32.xlu1 %v1580_v35, %s2877_s23 }
 0x9de   :  { %1598 = vrot.lane.b32.xlu0 %v1583_v55, %s2877_s23  ;;  %1596 = vrot.lane.b32.xlu1 %v1582_v50, %s2877_s23 }
 0x9e2   :  { %1602 = vrot.lane.b32.xlu0 %v1585_v1, %s2877_s23  ;;  %1600 = vrot.lane.b32.xlu1 %v1584_v11, %s2877_s23 }
 0x9e6   :  { %1619 = vrot.lane.b32.xlu1 %v2808_v0, %s2876_s17 }
 0xa4c   :  { %v4043_v5 = vpop.permute.xlu1 %1592 }
 0xa4d   :  { %4911 = vst [vmem:[#allocation5_spill] sm:$0xff] %v4043_v5 }
 0xa50   :  { %v4045_v27 = vpop.permute.xlu1 %1596 }
 0xa51   :  { %4912 = vst [vmem:[#allocation13_spill] sm:$0xff] %v4045_v27 }
 0xa54   :  { %v4047_v28 = vpop.permute.xlu1 %1600 }
 0xa55   :  { %4913 = vst [vmem:[#allocation9_spill] sm:$0xff] %v4047_v28 }
 0xa58   :  { %v1620_v40 = vpop.permute.xlu1 %1619 }
 0xa59   :  { %v1623_v35 = vmul.f32 %v2801_v12, %v1620_v40  ;;  %v1622_v55 = vmul.f32 %v4003_v7, %v1620_v40  ;;  %v1625_v50 = vmul.f32 %v4009_v57, %v1620_v40  ;;  %v1624_v1 = vmul.f32 %v4016_v9, %v1620_v40  ;;  %v2810_v12 = vld [vmem:[%s4848_s1 + $0x10] ss:$0 sm:$0xff]  ;;  %v4084_v57 = vld [vmem:[%s4849_s0 + $0x20] sm:$0xf8] }
 0xa5a   :  { %v1627_v11 = vmul.f32 %v2805_v16, %v1620_v40  ;;  %v1626_v0 = vmul.f32 %v4028_v53, %v1620_v40 }
 0xa5b   :  { %1636 = vrot.lane.b32.xlu1 %v1623_v35, %s2878_s24  ;;  %1634 = vrot.lane.b32.xlu0 %v1622_v55, %s2878_s24  ;;  %v4063_v35 = vpop.permute.xlu0 %1594 }
 0xa5c   :  { %4914 = vst [vmem:[#allocation16_spill] sm:$0xff] %v4063_v35 }
 0xa5f   :  { %1640 = vrot.lane.b32.xlu1 %v1625_v50, %s2878_s24  ;;  %1638 = vrot.lane.b32.xlu0 %v1624_v1, %s2878_s24  ;;  %v4065_v55 = vpop.permute.xlu0 %1598 }
 0xa60   :  { %4915 = vst [vmem:[#allocation14_spill] sm:$0xff] %v4065_v55 }
 0xa63   :  { %1644 = vrot.lane.b32.xlu1 %v1627_v11, %s2878_s24  ;;  %1642 = vrot.lane.b32.xlu0 %v1626_v0, %s2878_s24  ;;  %v4067_v50 = vpop.permute.xlu0 %1602  ;;  %v1656_v11 = vld [vmem:[%s4849_s0 + $0x28] sm:$0xf8]  ;;  %v1658_v0 = vld [vmem:[%s4849_s0 + $0x48] sm:$0x7] }
 0xa64   :  { %4916 = vst [vmem:[#allocation18_spill] sm:$0xff] %v4067_v50 }
 0xa67   :  { %1687 = vrot.lane.b32.xlu0 %v2810_v12, %s2875_s16 }
 0xacd   :  { %v4069_v1 = vpop.permute.xlu0 %1634 }
 0xace   :  { %4917 = vst [vmem:[#allocation17_spill] sm:$0xff] %v4069_v1 }
 0xad1   :  { %v4071_v16 = vpop.permute.xlu0 %1638 }
 0xad2   :  { %4918 = vst [vmem:[#allocation15_spill] sm:$0xff] %v4071_v16  ;;  %v4092_v16 = vld [vmem:[%s4849_s0 + $0x40] sm:$0x7] }
 0xad3   :  { %4920 = vst [vmem:[#allocation20_spill] sm:$0xff] %v4092_v16 }
 0xad5   :  { %v4073_v40 = vpop.permute.xlu0 %1642 }
 0xad6   :  { %4919 = vst [vmem:[#allocation19_spill] sm:$0xff] %v4073_v40 }
 0xad9   :  { %v1688_v12 = vpop.permute.xlu0 %1687 }
 0xada   :  { %v1691_v34 = vmul.f32 %v1688_v12, %v1656_v11  ;;  %v1693_v28 = vmul.f32 %v1688_v12, %v3781_v56  ;;  %v1690_v50 = vmul.f32 %v1688_v12, %v4084_v57  ;;  %v1692_v40 = vmul.f32 %v1688_v12, %v3786_v18 }
 0xadb   :  { %v1695_v53 = vmul.f32 %v1688_v12, %v1658_v0  ;;  %v1694_v27 = vmul.f32 %v1688_v12, %v4092_v16 }
 0xadc   :  { %v1705_v55 = vrot.slane %v1691_v34, 1  ;;  %v1706_v1 = vrot.slane %v1693_v28, 1  ;;  %v1702_v17 = vrot.slane %v1690_v50, 1  ;;  %v1703_v19 = vrot.slane %v1692_v40, 1  ;;  %v2811_v34 = vld [vmem:[%s4848_s1 + $0x14] ss:$0 sm:$0xff] }
 0xadd   :  { %v1710_v35 = vrot.slane %v1695_v53, 1  ;;  %v1708_v63 = vrot.slane %v1694_v27, 1 }
 0xade   :  { %v1707_v9 = vsel %vm341_vm0, %v1705_v55, %v1706_v1  ;;  %v1704_v5 = vsel %vm341_vm0, %v1702_v17, %v1703_v19  ;;  %v4109_v17 = vpop.permute.xlu1 %1636 }
 0xadf   :  { %1714 = vrot.lane.b32.xlu0 %v1707_v9, %s2877_s23  ;;  %1712 = vrot.lane.b32.xlu1 %v1704_v5, %s2877_s23  ;;  %v1711_v52 = vsel %vm341_vm0, %v1706_v1, %v1710_v35  ;;  %v1709_v6 = vsel %vm341_vm0, %v1703_v19, %v1708_v63  ;;  %4921 = vst [vmem:[#allocation21_spill] sm:$0xff] %v4109_v17 }
 0xae2   :  { %v4111_v9 = vpop.permute.xlu1 %1640 }
 0xae3   :  { %1718 = vrot.lane.b32.xlu0 %v1711_v52, %s2877_s23  ;;  %1716 = vrot.lane.b32.xlu1 %v1709_v6, %s2877_s23  ;;  %4922 = vst [vmem:[#allocation22_spill] sm:$0xff] %v4111_v9 }
 0xae6   :  { %v4113_v53 = vpop.permute.xlu1 %1644 }
 0xae7   :  { %1722 = vrot.lane.b32.xlu0 %v1710_v35, %s2877_s23  ;;  %1720 = vrot.lane.b32.xlu1 %v1708_v63, %s2877_s23  ;;  %4923 = vst [vmem:[#allocation23_spill] sm:$0xff] %v4113_v53 }
 0xaeb   :  { %1739 = vrot.lane.b32.xlu1 %v2811_v34, %s2876_s17 }
 0xb51   :  { %v4115_v19 = vpop.permute.xlu1 %1712 }
 0xb52   :  { %4924 = vst [vmem:[#allocation24_spill] sm:$0xff] %v4115_v19 }
 0xb55   :  { %v4117_v52 = vpop.permute.xlu1 %1716 }
 0xb56   :  { %4925 = vst [vmem:[#allocation25_spill] sm:$0xff] %v4117_v52 }
 0xb59   :  { %v4119_v6 = vpop.permute.xlu1 %1720 }
 0xb5a   :  { %4926 = vst [vmem:[#allocation26_spill] sm:$0xff] %v4119_v6 }
 0xb5d   :  { %v1740_v5 = vpop.permute.xlu1 %1739 }
 0xb5e   :  { %v1743_v63 = vmul.f32 %v1740_v5, %v1656_v11  ;;  %v1745_v27 = vmul.f32 %v1740_v5, %v3781_v56  ;;  %v1742_v28 = vmul.f32 %v1740_v5, %v4084_v57  ;;  %v1744_v35 = vmul.f32 %v1740_v5, %v3786_v18 }
 0xb5f   :  { %v1747_v55 = vmul.f32 %v1740_v5, %v1658_v0  ;;  %v1746_v50 = vmul.f32 %v1740_v5, %v4092_v16  ;;  %v2817_v0 = vld [vmem:[%s4848_s1 + $0x11] ss:$0 sm:$0xff] }
 0xb60   :  { %v1757_v1 = vrot.slane %v1743_v63, 1  ;;  %v1758_v40 = vrot.slane %v1745_v27, 1  ;;  %v1754_v12 = vrot.slane %v1742_v28, 1  ;;  %v1755_v34 = vrot.slane %v1744_v35, 1 }
 0xb61   :  { %v1762_v6 = vrot.slane %v1747_v55, 1  ;;  %v1760_v19 = vrot.slane %v1746_v50, 1  ;;  %v4160_v55 = vld [vmem:[%s4849_s0 + $0x70] sm:$0xf8] }
 0xb62   :  { %v1759_v53 = vsel %vm341_vm0, %v1757_v1, %v1758_v40  ;;  %v1756_v52 = vsel %vm341_vm0, %v1754_v12, %v1755_v34 }
 0xb63   :  { %1766 = vrot.lane.b32.xlu1 %v1759_v53, %s2878_s24  ;;  %1764 = vrot.lane.b32.xlu0 %v1756_v52, %s2878_s24  ;;  %v1763_v56 = vsel %vm341_vm0, %v1758_v40, %v1762_v6  ;;  %v1761_v11 = vsel %vm341_vm0, %v1755_v34, %v1760_v19  ;;  %v4139_v53 = vpop.permute.xlu0 %1714  ;;  %v4168_v34 = vld [vmem:[%s4849_s0 + $0x90] sm:$0x7] }
 0xb64   :  { %4927 = vst [vmem:[#allocation27_spill] sm:$0xff] %v4139_v53 }
 0xb67   :  { %1770 = vrot.lane.b32.xlu1 %v1763_v56, %s2878_s24  ;;  %1768 = vrot.lane.b32.xlu0 %v1761_v11, %s2878_s24  ;;  %v4141_v52 = vpop.permute.xlu0 %1718 }
 0xb68   :  { %4928 = vst [vmem:[#allocation28_spill] sm:$0xff] %v4141_v52 }
 0xb6b   :  { %1774 = vrot.lane.b32.xlu1 %v1762_v6, %s2878_s24  ;;  %1772 = vrot.lane.b32.xlu0 %v1760_v19, %s2878_s24  ;;  %v4143_v5 = vpop.permute.xlu0 %1722  ;;  %v2813_v19 = vld [vmem:[%s4849_s0 + $0x78] sm:$0xf8]  ;;  %v2815_v6 = vld [vmem:[%s4849_s0 + $0x98] sm:$0x7] }
 0xb6c   :  { %4929 = vst [vmem:[#allocation29_spill] sm:$0xff] %v4143_v5 }
 0xb6f   :  { %1817 = vrot.lane.b32.xlu0 %v2817_v0, %s2875_s16 }
 0xbd5   :  { %v4145_v63 = vpop.permute.xlu0 %1764 }
 0xbd6   :  { %4930 = vst [vmem:[#allocation30_spill] sm:$0xff] %v4145_v63 }
 0xbd9   :  { %v4147_v27 = vpop.permute.xlu0 %1768 }
 0xbda   :  { %4931 = vst [vmem:[#allocation31_spill] sm:$0xff] %v4147_v27 }
 0xbdd   :  { %v4149_v28 = vpop.permute.xlu0 %1772 }
 0xbde   :  { %4932 = vst [vmem:[#allocation32_spill] sm:$0xff] %v4149_v28 }
 0xbe1   :  { %v1818_v35 = vpop.permute.xlu0 %1817 }
 0xbe2   :  { %v1821_v50 = vmul.f32 %v2813_v19, %v1818_v35  ;;  %v1823_v1 = vmul.f32 %v3853_v26, %v1818_v35  ;;  %v1820_v40 = vmul.f32 %v4160_v55, %v1818_v35  ;;  %v1822_v12 = vmul.f32 %v3860_v44, %v1818_v35 }
 0xbe3   :  { %v1825_v56 = vmul.f32 %v2815_v6, %v1818_v35  ;;  %v1824_v11 = vmul.f32 %v4168_v34, %v1818_v35 }
 0xbe4   :  { %v1835_v0 = vrot.slane %v1821_v50, 1  ;;  %v1836_v28 = vrot.slane %v1823_v1, 1  ;;  %v1832_v5 = vrot.slane %v1820_v40, 1  ;;  %v1833_v27 = vrot.slane %v1822_v12, 1 }
 0xbe5   :  { %v1840_v53 = vrot.slane %v1825_v56, 1  ;;  %v1838_v9 = vrot.slane %v1824_v11, 1 }
 0xbe6   :  { %v1837_v52 = vsel %vm341_vm0, %v1835_v0, %v1836_v28  ;;  %v1834_v63 = vsel %vm341_vm0, %v1832_v5, %v1833_v27  ;;  %v2818_v5 = vld [vmem:[%s4848_s1 + $0x15] ss:$0 sm:$0xff] }
 0xbe7   :  { %1844 = vrot.lane.b32.xlu0 %v1837_v52, %s2877_s23  ;;  %1842 = vrot.lane.b32.xlu1 %v1834_v63, %s2877_s23  ;;  %v1841_v17 = vsel %vm341_vm0, %v1836_v28, %v1840_v53  ;;  %v1839_v16 = vsel %vm341_vm0, %v1833_v27, %v1838_v9  ;;  %v4185_v52 = vpop.permute.xlu1 %1766 }
 0xbeb   :  { %1848 = vrot.lane.b32.xlu0 %v1841_v17, %s2877_s23  ;;  %1846 = vrot.lane.b32.xlu1 %v1839_v16, %s2877_s23  ;;  %v4187_v63 = vpop.permute.xlu1 %1770 }
 0xbef   :  { %1852 = vrot.lane.b32.xlu0 %v1840_v53, %s2877_s23  ;;  %1850 = vrot.lane.b32.xlu1 %v1838_v9, %s2877_s23  ;;  %v4189_v28 = vpop.permute.xlu1 %1774 }
 0xbf0   :  { %4933 = vst [vmem:[#allocation33_spill] sm:$0xff] %v4189_v28 }
 0xbf3   :  { %1869 = vrot.lane.b32.xlu1 %v2818_v5, %s2876_s17 }
 0xc59   :  { %v1845_v27 = vpop.permute.xlu0 %1844  ;;  %v1843_v17 = vpop.permute.xlu1 %1842 }
 0xc5a   :  { %v4192_v16 = vsel %vm59_vm1, %v1843_v17, %v1845_v27 }
 0xc5b   :  { %4934 = vst [vmem:[#allocation34_spill] sm:$0xff] %v4192_v16 }
 0xc5d   :  { %v1849_v53 = vpop.permute.xlu0 %1848  ;;  %v1847_v35 = vpop.permute.xlu1 %1846 }
 0xc5e   :  { %v4195_v9 = vsel %vm59_vm1, %v1847_v35, %v1849_v53 }
 0xc5f   :  { %4935 = vst [vmem:[#allocation35_spill] sm:$0xff] %v4195_v9 }
 0xc61   :  { %v4197_v50 = vpop.permute.xlu1 %1850 }
 0xc62   :  { %4936 = vst [vmem:[#allocation36_spill] sm:$0xff] %v4197_v50 }
 0xc65   :  { %v1870_v1 = vpop.permute.xlu1 %1869 }
 0xc66   :  { %v1873_v40 = vmul.f32 %v2813_v19, %v1870_v1  ;;  %v1875_v12 = vmul.f32 %v3853_v26, %v1870_v1  ;;  %v1872_v56 = vmul.f32 %v4160_v55, %v1870_v1  ;;  %v1874_v11 = vmul.f32 %v3860_v44, %v1870_v1 }
 0xc67   :  { %v1877_v0 = vmul.f32 %v2815_v6, %v1870_v1  ;;  %v1876_v5 = vmul.f32 %v4168_v34, %v1870_v1  ;;  %v2824_v6 = vld [vmem:[%s4848_s1 + $0x12] ss:$0 sm:$0xff]  ;;  %v2778_v1 = vld [vmem:[%s4850_s2] ss:$0 sm:$0xff] }
 0xc68   :  { %v1887_v27 = vrot.slane %v1873_v40, 1  ;;  %v1888_v17 = vrot.slane %v1875_v12, 1  ;;  %v1884_v16 = vrot.slane %v1872_v56, 1  ;;  %v1885_v28 = vrot.slane %v1874_v11, 1 }
 0xc69   :  { %v1892_v50 = vrot.slane %v1877_v0, 1  ;;  %v1890_v9 = vrot.slane %v1876_v5, 1  ;;  %v1343_v56 = vsel %vm91_vm2, %v3835_v60, %v3881_v62  ;;  %v1302_v5 = vsel %vm59_vm1, %v3811_v23, %v3831_v25 }
 0xc6a   :  { %v1889_v53 = vsel %vm341_vm0, %v1887_v27, %v1888_v17  ;;  %v1886_v35 = vsel %vm341_vm0, %v1884_v16, %v1885_v28  ;;  %v2779_v16 = vld [vmem:[%s4848_s1] ss:$0 sm:$0xff]  ;;  %v1303_v60 = vsel %vm59_vm1, %v3813_v24, %v3833_v47  ;;  %v1402_v62 = vsel %vm59_vm1, %v3887_v39, %v3907_v38  ;;  %v2797_v24 = vld [vmem:[%s4848_s1 + $0x2] ss:$0 sm:$0xff] }
 0xc6b   :  { %1896 = vrot.lane.b32.xlu1 %v1889_v53, %s2878_s24  ;;  %1894 = vrot.lane.b32.xlu0 %v1886_v35, %s2878_s24  ;;  %v1893_v26 = vsel %vm341_vm0, %v1888_v17, %v1892_v50  ;;  %v1891_v19 = vsel %vm341_vm0, %v1885_v28, %v1890_v9  ;;  %v1262_v28 = vmul.f32 %v2779_v16, %v3772_v43  ;;  %v2788_v43 = vld [vmem:[%s4848_s1 + $0x1] ss:$0 sm:$0xff] }
 0xc6c   :  { %v1264_v12 = vmul.f32 %v2779_v16, %v3798_v58  ;;  %v1363_v17 = vmul.f32 %v2788_v43, %v3847_v46  ;;  %v1344_v58 = vsel %vm91_vm2, %v3837_v51, %v3883_v61  ;;  %v1345_v23 = vsel %vm91_vm2, %v3839_v41, %v3885_v29 }
 0xc6d   :  { %v1265_v40 = vadd.f32 %v2778_v1, %v1262_v28  ;;  %v1364_v46 = vmul.f32 %v2788_v43, %v3860_v44  ;;  %v1444_v51 = vsel %vm91_vm2, %v3913_v2, %v3959_v32  ;;  %v1403_v39 = vsel %vm59_vm1, %v3889_v3, %v3909_v20 }
 0xc6e   :  { %v1365_v41 = vmul.f32 %v2788_v43, %v3872_v10  ;;  %v1445_v2 = vsel %vm91_vm2, %v3915_v4, %v3961_v14  ;;  %v1503_v3 = vsel %vm59_vm1, %v3965_v33, %v3985_v22  ;;  %v1446_v10 = vsel %vm91_vm2, %v3917_v54, %v3963_v45  ;;  %v2809_v14 = vld [vmem:[%s4848_s1 + $0xc] ss:$0 sm:$0xff]  ;;  %v4939_v43 = vld [vmem:[#allocation2_spill] sm:$0xff] }
 0xc6f   :  { %1900 = vrot.lane.b32.xlu1 %v1893_v26, %s2878_s24  ;;  %1898 = vrot.lane.b32.xlu0 %v1891_v19, %s2878_s24  ;;  %v1464_v26 = vmul.f32 %v2797_v24, %v3925_v48  ;;  %v1404_v19 = vsel %vm59_vm1, %v3891_v59, %v3911_v36  ;;  %v1545_v4 = vsel %vm91_vm2, %v3991_v31, %v4037_v15  ;;  %v2806_v59 = vld [vmem:[%s4848_s1 + $0x3] ss:$0 sm:$0xff] }
 0xc70   :  { %v1504_v54 = vsel %vm59_vm1, %v3967_v37, %v3987_v13  ;;  %v1466_v45 = vmul.f32 %v2797_v24, %v3950_v8  ;;  %v1565_v31 = vmul.f32 %v2806_v59, %v4003_v7  ;;  %v4937_v15 = vld [vmem:[#allocation6_spill] sm:$0xff]  ;;  %v4940_v13 = vld [vmem:[#allocation16_spill] sm:$0xff]  ;;  %v4941_v8 = vld [vmem:[#allocation5_spill] sm:$0xff] }
 0xc73   :  { %1904 = vrot.lane.b32.xlu1 %v1892_v50, %s2878_s24  ;;  %1902 = vrot.lane.b32.xlu0 %v1890_v9, %s2878_s24  ;;  %v1263_v50 = vmul.f32 %v2779_v16, %v3786_v18  ;;  %v1301_v9 = vsel %vm59_vm1, %v3809_v49, %v3829_v30  ;;  %v1267_v49 = vadd.f32 %v2778_v1, %v1264_v12 }
 0xc74   :  { %v1307_v11 = vadd.f32 %v1301_v9, %v1265_v40  ;;  %v1465_v16 = vmul.f32 %v2797_v24, %v3938_v42  ;;  %v1546_v40 = vsel %vm91_vm2, %v4937_v15, %v4039_v21  ;;  %v1665_v9 = vmul.f32 %v2809_v14, %v3786_v18  ;;  %v4948_v24 = vld [vmem:[#allocation14_spill] sm:$0xff] }
 0xc75   :  { %v1266_v0 = vadd.f32 %v2778_v1, %v1263_v50  ;;  %v1309_v35 = vadd.f32 %v1303_v60, %v1267_v49  ;;  %v1664_v50 = vmul.f32 %v2809_v14, %v4084_v57  ;;  %v4944_v49 = vld [vmem:[#allocation4_spill] sm:$0xff]  ;;  %v4946_v60 = vld [vmem:[#allocation21_spill] sm:$0xff] }
 0xc76   :  { %v1349_v27 = vadd.f32 %v1343_v56, %v1307_v11  ;;  %v4938_v56 = vld [vmem:[#allocation10_spill] sm:$0xff] }
 0xc77   :  { %1947 = vrot.lane.b32.xlu0 %v2824_v6, %s2875_s16  ;;  %v1308_v30 = vadd.f32 %v1302_v5, %v1266_v0  ;;  %v1351_v61 = vadd.f32 %v1345_v23, %v1309_v35  ;;  %v1505_v11 = vsel %vm59_vm1, %v4939_v43, %v4938_v56  ;;  %v1604_v0 = vsel %vm59_vm1, %v4941_v8, %v4940_v13  ;;  %v4942_v5 = vld [vmem:[#allocation12_spill] sm:$0xff]  ;;  %v2816_v35 = vld [vmem:[%s4848_s1 + $0xd] ss:$0 sm:$0xff]  ;;  %v4961_v43 = vld [vmem:[#allocation25_spill] sm:$0xff] }
 0xc78   :  { %v1366_v25 = vadd.f32 %v1363_v17, %v1349_v27  ;;  %v1566_v7 = vmul.f32 %v2806_v59, %v4942_v5  ;;  %v4943_v17 = vld [vmem:[#allocation7_spill] sm:$0xff]  ;;  %v1670_v23 = vrot.slane %v1664_v50, 1  ;;  %v1796_v50 = vmul.f32 %v2816_v35, %v4168_v34  ;;  %v4960_v56 = vld [vmem:[#allocation28_spill] sm:$0xff]  ;;  %v4964_v34 = vld [vmem:[#allocation26_spill] sm:$0xff] }
 0xc79   :  { %v1350_v53 = vadd.f32 %v1344_v58, %v1308_v30  ;;  %v1368_v6 = vadd.f32 %v1365_v41, %v1351_v61  ;;  %v1547_v21 = vsel %vm91_vm2, %v4944_v49, %v4943_v17  ;;  %v4945_v58 = vld [vmem:[#allocation20_spill] sm:$0xff]  ;;  %v1853_v49 = vpop.permute.xlu0 %1852 }
 0xc7a   :  { %v1408_v47 = vadd.f32 %v1402_v62, %v1366_v25  ;;  %v1666_v18 = vmul.f32 %v2809_v14, %v4945_v58  ;;  %v4947_v62 = vld [vmem:[#allocation17_spill] sm:$0xff]  ;;  %v1671_v25 = vrot.slane %v1665_v9, 1 }
 0xc7b   :  { %v1367_v29 = vadd.f32 %v1364_v46, %v1350_v53  ;;  %v1410_v28 = vadd.f32 %v1404_v19, %v1368_v6  ;;  %v1646_v53 = vsel %vm91_vm2, %v4947_v62, %v4946_v60  ;;  %v4965_v60 = vld [vmem:[#allocation33_spill] sm:$0xff]  ;;  %v4966_v62 = vld [vmem:[#allocation32_spill] sm:$0xff] }
 0xc7c   :  { %v1450_v38 = vadd.f32 %v1444_v51, %v1408_v47  ;;  %v4949_v47 = vld [vmem:[#allocation13_spill] sm:$0xff]  ;;  %v1672_v6 = vsel %vm341_vm0, %v1670_v23, %v1671_v25 }
 0xc7d   :  { %v1409_v32 = vadd.f32 %v1403_v39, %v1367_v29  ;;  %v1452_v33 = vadd.f32 %v1446_v10, %v1410_v28  ;;  %v1605_v61 = vsel %vm59_vm1, %v4949_v47, %v4948_v24  ;;  %v4950_v39 = vld [vmem:[#allocation8_spill] sm:$0xff]  ;;  %v4954_v28 = vld [vmem:[#allocation9_spill] sm:$0xff] }
 0xc7e   :  { %v1467_v48 = vadd.f32 %v1464_v26, %v1450_v38  ;;  %v1567_v41 = vmul.f32 %v2806_v59, %v4950_v39  ;;  %v1673_v26 = vrot.slane %v1666_v18, 1  ;;  %v4955_v59 = vld [vmem:[#allocation27_spill] sm:$0xff] }
 0xc7f   :  { %v1451_v20 = vadd.f32 %v1445_v2, %v1409_v32  ;;  %v1469_v37 = vadd.f32 %v1466_v45, %v1452_v33  ;;  %v4951_v2 = vld [vmem:[#allocation22_spill] sm:$0xff]  ;;  %v4952_v32 = vld [vmem:[#allocation15_spill] sm:$0xff] }
 0xc80   :  { %v1509_v36 = vadd.f32 %v1503_v3, %v1467_v48  ;;  %v1647_v19 = vsel %vm91_vm2, %v4952_v32, %v4951_v2  ;;  %v1794_v3 = vmul.f32 %v2816_v35, %v4160_v55  ;;  %v4958_v45 = vld [vmem:[#allocation19_spill] sm:$0xff]  ;;  %v1674_v55 = vsel %vm341_vm0, %v1671_v25, %v1673_v26  ;;  %v4969_v2 = vld [vmem:[#allocation36_spill] sm:$0xff] }
 0xc81   :  { %v1468_v22 = vadd.f32 %v1465_v16, %v1451_v20  ;;  %v1511_v30 = vadd.f32 %v1505_v11, %v1469_v37  ;;  %v1795_v20 = vmul.f32 %v2816_v35, %v3860_v44  ;;  %v4953_v16 = vld [vmem:[#allocation18_spill] sm:$0xff]  ;;  %v1725_v11 = vsel %vm59_vm1, %v4961_v43, %v4960_v56 }
 0xc82   :  { %v1551_v1 = vadd.f32 %v1545_v4, %v1509_v36  ;;  %v1606_v4 = vsel %vm59_vm1, %v4954_v28, %v4953_v16  ;;  %v4956_v36 = vld [vmem:[#allocation24_spill] sm:$0xff]  ;;  %v4959_v44 = vld [vmem:[#allocation30_spill] sm:$0xff]  ;;  %v1800_v15 = vrot.slane %v1794_v3, 1  ;;  %v1856_v32 = vsel %vm59_vm1, %v4969_v2, %v1853_v49 }
 0xc83   :  { %v1510_v12 = vadd.f32 %v1504_v54, %v1468_v22  ;;  %v1553_v51 = vadd.f32 %v1547_v21, %v1511_v30  ;;  %v1724_v14 = vsel %vm59_vm1, %v4956_v36, %v4955_v59  ;;  %v4957_v54 = vld [vmem:[#allocation23_spill] sm:$0xff]  ;;  %v4963_v21 = vld [vmem:[#allocation29_spill] sm:$0xff] }
 0xc84   :  { %v1568_v57 = vadd.f32 %v1565_v31, %v1551_v1  ;;  %v1648_v22 = vsel %vm91_vm2, %v4958_v45, %v4957_v54  ;;  %v1776_v31 = vsel %vm91_vm2, %v4959_v44, %v4185_v52  ;;  %v1803_v52 = vrot.slane %v1796_v50, 1  ;;  %v4365_v59 = vld [vmem:[%s4849_s0 + $0xe8] sm:$0x7] }
 0xc85   :  { %v1552_v27 = vadd.f32 %v1546_v40, %v1510_v12  ;;  %v1570_v48 = vadd.f32 %v1567_v41, %v1553_v51  ;;  %v1801_v40 = vrot.slane %v1795_v20, 1  ;;  %v4968_v41 = vld [vmem:[#allocation35_spill] sm:$0xff] }
 0xc86   :  { %v1610_v46 = vadd.f32 %v1604_v0, %v1568_v57  ;;  %v4962_v0 = vld [vmem:[#allocation31_spill] sm:$0xff]  ;;  %v1726_v57 = vsel %vm59_vm1, %v4964_v34, %v4963_v21 }
 0xc87   :  { %v1569_v29 = vadd.f32 %v1566_v7, %v1552_v27  ;;  %v1612_v9 = vadd.f32 %v1606_v4, %v1570_v48  ;;  %v1777_v7 = vsel %vm91_vm2, %v4962_v0, %v4187_v63  ;;  %v1802_v27 = vsel %vm341_vm0, %v1800_v15, %v1801_v40  ;;  %v4967_v63 = vld [vmem:[#allocation34_spill] sm:$0xff]  ;;  %v2820_v4 = vld [vmem:[%s4849_s0 + $0xc8] sm:$0xf8]  ;;  %v2831_v0 = vld [vmem:[%s4848_s1 + $0x13] ss:$0 sm:$0xff] }
 0xc88   :  { %v1652_v38 = vadd.f32 %v1646_v53, %v1610_v46  ;;  %v1778_v53 = vsel %vm91_vm2, %v4966_v62, %v4965_v60  ;;  %v1804_v23 = vsel %vm341_vm0, %v1801_v40, %v1803_v52  ;;  %v4970_v54 = vld [vmem:[#allocation3_spill] sm:$0xff] }
 0xc89   :  { %v1611_v10 = vadd.f32 %v1605_v61, %v1569_v29  ;;  %v1654_v37 = vadd.f32 %v1648_v22, %v1612_v9 }
 0xc8a   :  { %v1678_v1 = vadd.f32 %v1672_v6, %v1652_v38 }
 0xc8b   :  { %v1653_v33 = vadd.f32 %v1647_v19, %v1611_v10  ;;  %v1680_v58 = vadd.f32 %v1673_v26, %v1654_v37 }
 0xc8c   :  { %v1730_v12 = vadd.f32 %v1724_v14, %v1678_v1  ;;  %v2819_v14 = vld [vmem:[%s4849_s0 + $0xc0] sm:$0xf8] }
 0xc8d   :  { %v1679_v13 = vadd.f32 %v1674_v55, %v1653_v33  ;;  %v1732_v25 = vadd.f32 %v1726_v57, %v1680_v58  ;;  %v4375_v55 = vld [vmem:[%s4849_s0 + $0xe0] sm:$0x7] }
 0xc8e   :  { %v1782_v8 = vadd.f32 %v1776_v31, %v1730_v12 }
 0xc8f   :  { %v1731_v17 = vadd.f32 %v1725_v11, %v1679_v13  ;;  %v1784_v47 = vadd.f32 %v1778_v53, %v1732_v25 }
 0xc90   :  { %v1808_v30 = vadd.f32 %v1802_v27, %v1782_v8  ;;  %v2825_v8 = vld [vmem:[%s4848_s1 + $0x16] ss:$0 sm:$0xff]  ;;  %v2834_v27 = vld [vmem:[%s4848_s1 + $0x1c] ss:$0 sm:$0xff] }
 0xc91   :  { %v1783_v18 = vadd.f32 %v1777_v7, %v1731_v17  ;;  %v1810_v6 = vadd.f32 %v1803_v52, %v1784_v47  ;;  %v2832_v7 = vld [vmem:[%s4848_s1 + $0x17] ss:$0 sm:$0xff]  ;;  %v2823_v52 = vld [vmem:[%s4848_s1 + $0xe] ss:$0 sm:$0xff] }
 0xc92   :  { %v1860_v46 = vadd.f32 %v4967_v63, %v1808_v30  ;;  %v1924_v17 = vmul.f32 %v2823_v52, %v2819_v14  ;;  %v1925_v49 = vmul.f32 %v2823_v52, %v3938_v42  ;;  %v1926_v57 = vmul.f32 %v2823_v52, %v4375_v55 }
 0xc93   :  { %v1809_v61 = vadd.f32 %v1804_v23, %v1783_v18  ;;  %v1862_v20 = vadd.f32 %v1856_v32, %v1810_v6 }
 0xc94   :  { %v1930_v21 = vrot.slane %v1924_v17, 1  ;;  %v1931_v34 = vrot.slane %v1925_v49, 1  ;;  %v1933_v18 = vrot.slane %v1926_v57, 1 }
 0xc95   :  { %v1861_v29 = vadd.f32 %v4968_v41, %v1809_v61 }
 0xc96   :  { %v1932_v58 = vsel %vm341_vm0, %v1930_v21, %v1931_v34  ;;  %v1934_v23 = vsel %vm341_vm0, %v1931_v34, %v1933_v18 }
 0xcdd   :  { %v1897_v35 = vpop.permute.xlu1 %1896  ;;  %v1895_v51 = vpop.permute.xlu0 %1894 }
 0xcde   :  { %v1906_v24 = vsel %vm91_vm2, %v1895_v51, %v1897_v35 }
 0xcdf   :  { %v1912_v39 = vadd.f32 %v1906_v24, %v1860_v46 }
 0xce1   :  { %v1901_v38 = vpop.permute.xlu1 %1900  ;;  %v1899_v26 = vpop.permute.xlu0 %1898  ;;  %v1938_v60 = vadd.f32 %v1932_v58, %v1912_v39 }
 0xce2   :  { %v1907_v19 = vsel %vm91_vm2, %v1899_v26, %v1901_v38 }
 0xce3   :  { %v1913_v3 = vadd.f32 %v1907_v19, %v1861_v29 }
 0xce5   :  { %v1905_v10 = vpop.permute.xlu1 %1904  ;;  %v1903_v48 = vpop.permute.xlu0 %1902  ;;  %v1939_v46 = vadd.f32 %v1934_v23, %v1913_v3 }
 0xce6   :  { %v1908_v16 = vsel %vm91_vm2, %v1903_v48, %v1905_v10 }
 0xce7   :  { %v4357_v28 = vadd.f32 %v1908_v16, %v1862_v20 }
 0xce9   :  { %v1948_v36 = vpop.permute.xlu0 %1947  ;;  %v1940_v6 = vadd.f32 %v1933_v18, %v4357_v28  ;;  %v2842_v28 = vld [vmem:[%s4848_s1 + $0x21] ss:$0 sm:$0xff] }
 0xcea   :  { %v1951_v33 = vmul.f32 %v2820_v4, %v1948_v36  ;;  %v1953_v45 = vmul.f32 %v4970_v54, %v1948_v36  ;;  %v1950_v22 = vmul.f32 %v2819_v14, %v1948_v36  ;;  %v1952_v1 = vmul.f32 %v3938_v42, %v1948_v36 }
 0xceb   :  { %v1955_v44 = vmul.f32 %v4365_v59, %v1948_v36  ;;  %v1954_v31 = vmul.f32 %v4375_v55, %v1948_v36 }
 0xcec   :  { %v1965_v15 = vrot.slane %v1951_v33, 1  ;;  %v1966_v40 = vrot.slane %v1953_v45, 1  ;;  %v1962_v50 = vrot.slane %v1950_v22, 1  ;;  %v1963_v9 = vrot.slane %v1952_v1, 1  ;;  %v2848_v33 = vld [vmem:[%s4848_s1 + $0x1e] ss:$0 sm:$0xff] }
 0xced   :  { %v1970_v43 = vrot.slane %v1955_v44, 1  ;;  %v1968_v11 = vrot.slane %v1954_v31, 1  ;;  %v2849_v44 = vld [vmem:[%s4848_s1 + $0x22] ss:$0 sm:$0xff]  ;;  %v2856_v31 = vld [vmem:[%s4848_s1 + $0x23] ss:$0 sm:$0xff] }
 0xcee   :  { %v1967_v12 = vsel %vm341_vm0, %v1965_v15, %v1966_v40  ;;  %v1964_v56 = vsel %vm341_vm0, %v1962_v50, %v1963_v9  ;;  %v4462_v15 = vld [vmem:[%s4849_s0 + $0x110] sm:$0xf8]  ;;  %v4971_v50 = vld [vmem:[#allocation11_spill] sm:$0xff] }
 0xcef   :  { %1974 = vrot.lane.b32.xlu0 %v1967_v12, %s2877_s23  ;;  %1972 = vrot.lane.b32.xlu1 %v1964_v56, %s2877_s23  ;;  %v1971_v37 = vsel %vm341_vm0, %v1966_v40, %v1970_v43  ;;  %v1969_v13 = vsel %vm341_vm0, %v1963_v9, %v1968_v11  ;;  %v2829_v12 = vld [vmem:[%s4849_s0 + $0x138] sm:$0x7] }
 0xcf3   :  { %1978 = vrot.lane.b32.xlu0 %v1971_v37, %s2877_s23  ;;  %1976 = vrot.lane.b32.xlu1 %v1969_v13, %s2877_s23 }
 0xcf7   :  { %1999 = vrot.lane.b32.xlu0 %v2825_v8, %s2876_s17  ;;  %1980 = vrot.lane.b32.xlu1 %v1968_v11, %s2877_s23 }
 0xcfb   :  { %1982 = vrot.lane.b32.xlu1 %v1970_v43, %s2877_s23  ;;  %2077 = vrot.lane.b32.xlu0 %v2831_v0, %s2875_s16  ;;  %v2855_v43 = vld [vmem:[%s4848_s1 + $0x1f] ss:$0 sm:$0xff]  ;;  %v4478_v0 = vld [vmem:[%s4849_s0 + $0x130] sm:$0x7] }
 0xcff   :  { %2129 = vrot.lane.b32.xlu1 %v2832_v7, %s2876_s17 }
 0xd03   :  { %2207 = vrot.lane.b32.xlu1 %v2834_v27, %s2875_s16 }
 0xd61   :  { %v1975_v30 = vpop.permute.xlu0 %1974  ;;  %v1973_v62 = vpop.permute.xlu1 %1972 }
 0xd62   :  { %v1984_v53 = vsel %vm59_vm1, %v1973_v62, %v1975_v30 }
 0xd63   :  { %v4413_v25 = vadd.f32 %v1984_v53, %v1938_v60 }
 0xd65   :  { %v1979_v63 = vpop.permute.xlu0 %1978  ;;  %v1977_v35 = vpop.permute.xlu1 %1976 }
 0xd66   :  { %v1985_v51 = vsel %vm59_vm1, %v1977_v35, %v1979_v63 }
 0xd67   :  { %v4416_v24 = vadd.f32 %v1985_v51, %v1939_v46 }
 0xd69   :  { %v2000_v47 = vpop.permute.xlu0 %1999  ;;  %v1981_v61 = vpop.permute.xlu1 %1980 }
 0xd6a   :  { %v2002_v41 = vmul.f32 %v2819_v14, %v2000_v47  ;;  %v2004_v29 = vmul.f32 %v3938_v42, %v2000_v47  ;;  %v2003_v39 = vmul.f32 %v2820_v4, %v2000_v47  ;;  %v2005_v38 = vmul.f32 %v4970_v54, %v2000_v47  ;;  %v2835_v42 = vld [vmem:[%s4848_s1 + $0x20] ss:$0 sm:$0xff]  ;;  %v2841_v14 = vld [vmem:[%s4848_s1 + $0x1d] ss:$0 sm:$0xff] }
 0xd6b   :  { %v2006_v4 = vmul.f32 %v4375_v55, %v2000_v47  ;;  %v2007_v36 = vmul.f32 %v4365_v59, %v2000_v47  ;;  %v2827_v59 = vld [vmem:[%s4849_s0 + $0x118] sm:$0xf8] }
 0xd6c   :  { %v2014_v26 = vrot.slane %v2002_v41, 1  ;;  %v2015_v2 = vrot.slane %v2004_v29, 1  ;;  %v2017_v32 = vrot.slane %v2003_v39, 1  ;;  %v2018_v19 = vrot.slane %v2005_v38, 1  ;;  %v2176_v39 = vld [vmem:[%s4849_s0 + $0x28] sm:$0xf0] }
 0xd6d   :  { %v1983_v3 = vpop.permute.xlu1 %1982  ;;  %v2020_v54 = vrot.slane %v2006_v4, 1  ;;  %v2022_v45 = vrot.slane %v2007_v36, 1  ;;  %v2078_v22 = vpop.permute.xlu0 %2077  ;;  %v4523_v4 = vld [vmem:[%s4849_s0 + $0x30] sm:$0xff] }
 0xd6e   :  { %v1986_v20 = vsel %vm59_vm1, %v1981_v61, %v1983_v3  ;;  %v2016_v10 = vsel %vm341_vm0, %v2014_v26, %v2015_v2  ;;  %v2019_v48 = vsel %vm341_vm0, %v2017_v32, %v2018_v19  ;;  %v2081_v40 = vmul.f32 %v2827_v59, %v2078_v22  ;;  %v4511_v3 = vld [vmem:[%s4849_s0 + $0x20] sm:$0xf0] }
 0xd6f   :  { %v4424_v16 = vadd.f32 %v1986_v20, %v1940_v6  ;;  %2024 = vrot.lane.b32.xlu0 %v2016_v10, %s2878_s24  ;;  %2026 = vrot.lane.b32.xlu1 %v2019_v48, %s2878_s24  ;;  %v2021_v1 = vsel %vm341_vm0, %v2015_v2, %v2020_v54  ;;  %v2023_v55 = vsel %vm341_vm0, %v2018_v19, %v2022_v45  ;;  %v2867_v19 = vld [vmem:[%s4849_s0 + $0x38] sm:$0xff]  ;;  %v2178_v20 = vld [vmem:[%s4849_s0 + $0x48] sm:$0xf] }
 0xd70   :  { %v2083_v9 = vmul.f32 %v4971_v50, %v2078_v22  ;;  %v2080_v56 = vmul.f32 %v4462_v15, %v2078_v22  ;;  %v2082_v11 = vmul.f32 %v4942_v5, %v2078_v22  ;;  %v2095_v37 = vrot.slane %v2081_v40, 1 }
 0xd71   :  { %v2085_v8 = vmul.f32 %v2829_v12, %v2078_v22  ;;  %v2084_v17 = vmul.f32 %v4478_v0, %v2078_v22  ;;  %v2130_v21 = vpop.permute.xlu1 %2129 }
 0xd72   :  { %v2096_v13 = vrot.slane %v2083_v9, 1  ;;  %v2092_v7 = vrot.slane %v2080_v56, 1  ;;  %v2093_v27 = vrot.slane %v2082_v11, 1  ;;  %v2133_v34 = vmul.f32 %v2827_v59, %v2130_v21 }
 0xd73   :  { %2259 = vrot.lane.b32.xlu0 %v2835_v42, %s2876_s17  ;;  %2389 = vrot.lane.b32.xlu1 %v2842_v28, %s2876_s17  ;;  %v2100_v49 = vrot.slane %v2085_v8, 1  ;;  %v2098_v58 = vrot.slane %v2084_v17, 1  ;;  %v2135_v30 = vmul.f32 %v4971_v50, %v2130_v21  ;;  %v2132_v62 = vmul.f32 %v4462_v15, %v2130_v21  ;;  %v2830_v50 = vld [vmem:[%s4848_s1 + $0xf] ss:$0 sm:$0xff] }
 0xd74   :  { %v2097_v52 = vsel %vm341_vm0, %v2095_v37, %v2096_v13  ;;  %v2094_v57 = vsel %vm341_vm0, %v2092_v7, %v2093_v27  ;;  %v2147_v60 = vrot.slane %v2133_v34, 1  ;;  %v2134_v63 = vmul.f32 %v4942_v5, %v2130_v21 }
 0xd75   :  { %v2101_v18 = vsel %vm341_vm0, %v2096_v13, %v2100_v49  ;;  %v2099_v53 = vsel %vm341_vm0, %v2093_v27, %v2098_v58  ;;  %v2148_v23 = vrot.slane %v2135_v30, 1  ;;  %v2137_v46 = vmul.f32 %v2829_v12, %v2130_v21  ;;  %v2208_v29 = vpop.permute.xlu1 %2207 }
 0xd76   :  { %v2144_v35 = vrot.slane %v2132_v62, 1  ;;  %v2145_v47 = vrot.slane %v2134_v63, 1  ;;  %v2136_v41 = vmul.f32 %v4478_v0, %v2130_v21  ;;  %v2211_v38 = vmul.f32 %v2208_v29, %v2176_v39 }
 0xd77   :  { %2337 = vrot.lane.b32.xlu0 %v2841_v14, %s2875_s16  ;;  %2467 = vrot.lane.b32.xlu1 %v2848_v33, %s2875_s16  ;;  %v2149_v51 = vsel %vm341_vm0, %v2147_v60, %v2148_v23  ;;  %v2152_v61 = vrot.slane %v2137_v46, 1  ;;  %v2213_v6 = vmul.f32 %v2867_v19, %v2208_v29  ;;  %v2210_v48 = vmul.f32 %v2208_v29, %v4511_v3  ;;  %v4529_v33 = vld [vmem:[%s4849_s0 + $0x40] sm:$0xf] }
 0xd78   :  { %v2146_v26 = vsel %vm341_vm0, %v2144_v35, %v2145_v47  ;;  %v2150_v32 = vrot.slane %v2136_v41, 1  ;;  %v2225_v10 = vrot.slane %v2211_v38, 2  ;;  %v2212_v36 = vmul.f32 %v4523_v4, %v2208_v29  ;;  %v2869_v41 = vld [vmem:[%s4849_s0 + $0x88] sm:$0xff]  ;;  %v4585_v38 = vld [vmem:[%s4849_s0 + $0x80] sm:$0xff] }
 0xd79   :  { %v2153_v2 = vsel %vm341_vm0, %v2148_v23, %v2152_v61  ;;  %v2226_v28 = vrot.slane %v2213_v6, 2  ;;  %v2215_v14 = vmul.f32 %v2208_v29, %v2178_v20  ;;  %v2054_v9 = vmul.f32 %v2830_v50, %v4462_v15  ;;  %v4571_v23 = vld [vmem:[%s4849_s0 + $0x70] sm:$0xf0] }
 0xd7a   :  { %v2151_v42 = vsel %vm341_vm0, %v2145_v47, %v2150_v32  ;;  %v2223_v22 = vrot.slane %v2212_v36, 2  ;;  %v2055_v12 = vmul.f32 %v2830_v50, %v4942_v5 }
 0xd7b   :  { %2028 = vrot.lane.b32.xlu0 %v2021_v1, %s2878_s24  ;;  %2030 = vrot.lane.b32.xlu1 %v2023_v55, %s2878_s24  ;;  %v2230_v59 = vrot.slane %v2215_v14, 2  ;;  %v2214_v1 = vmul.f32 %v2208_v29, %v4529_v33  ;;  %v2060_v56 = vrot.slane %v2054_v9, 1 }
 0xd7f   :  { %2519 = vrot.lane.b32.xlu0 %v2849_v44, %s2876_s17  ;;  %2649 = vrot.lane.b32.xlu1 %v2856_v31, %s2876_s17  ;;  %v2231_v44 = vsel %vm798_vm3, %v2226_v28, %v2230_v59  ;;  %v2228_v31 = vrot.slane %v2214_v1, 2 }
 0xd81   :  { %v2229_v40 = vsel %vm798_vm3, %v2223_v22, %v2228_v31 }
 0xd83   :  { %2597 = vrot.lane.b32.xlu0 %v2855_v43, %s2875_s16  ;;  %2034 = vrot.lane.b32.xlu1 %v2022_v45, %s2878_s24  ;;  %v2227_v45 = vsel %vm798_vm3, %v2225_v10, %v2226_v28  ;;  %v2061_v43 = vrot.slane %v2055_v12, 1  ;;  %v4601_v28 = vld [vmem:[%s4849_s0 + $0x90] sm:$0xf] }
 0xd85   :  { %v2062_v8 = vsel %vm341_vm0, %v2060_v56, %v2061_v43 }
 0xd87   :  { %2032 = vrot.lane.b32.xlu0 %v2020_v54, %s2878_s24  ;;  %2104 = vrot.lane.b32.xlu1 %v2097_v52, %s2877_s23  ;;  %v2222_v54 = vrot.slane %v2210_v48, 2 }
 0xd89   :  { %v2224_v55 = vsel %vm798_vm3, %v2222_v54, %v2223_v22 }
 0xd8b   :  { %2102 = vrot.lane.b32.xlu0 %v2094_v57, %s2877_s23  ;;  %2108 = vrot.lane.b32.xlu1 %v2101_v18, %s2877_s23 }
 0xd8f   :  { %2106 = vrot.lane.b32.xlu0 %v2099_v53, %s2877_s23  ;;  %2112 = vrot.lane.b32.xlu1 %v2100_v49, %s2877_s23  ;;  %v4558_v49 = vmul.f32 %v2830_v50, %v4478_v0  ;;  %v2837_v0 = vld [vmem:[%s4849_s0 + $0x78] sm:$0xf0] }
 0xd91   :  { %v2063_v63 = vrot.slane %v4558_v49, 1 }
 0xd93   :  { %2110 = vrot.lane.b32.xlu0 %v2098_v58, %s2877_s23  ;;  %2156 = vrot.lane.b32.xlu1 %v2149_v51, %s2878_s24  ;;  %v2064_v10 = vsel %vm341_vm0, %v2061_v43, %v2063_v63 }
 0xd97   :  { %2154 = vrot.lane.b32.xlu0 %v2146_v26, %s2878_s24  ;;  %2160 = vrot.lane.b32.xlu1 %v2153_v2, %s2878_s24 }
 0xd9b   :  { %2158 = vrot.lane.b32.xlu0 %v2151_v42, %s2878_s24  ;;  %2164 = vrot.lane.b32.xlu1 %v2152_v61, %s2878_s24  ;;  %v2839_v42 = vld [vmem:[%s4849_s0 + $0x98] sm:$0xf] }
 0xd9f   :  { %2162 = vrot.lane.b32.xlu0 %v2150_v32, %s2878_s24  ;;  %2234 = vrot.lane.b32.xlu1 %v2227_v45, %s2877_s23 }
 0xda3   :  { %2232 = vrot.lane.b32.xlu0 %v2224_v55, %s2877_s23  ;;  %2238 = vrot.lane.b32.xlu1 %v2231_v44, %s2877_s23 }
 0xda7   :  { %2236 = vrot.lane.b32.xlu0 %v2229_v40, %s2877_s23  ;;  %2242 = vrot.lane.b32.xlu1 %v2230_v59, %s2877_s23 }
 0xdab   :  { %2240 = vrot.lane.b32.xlu0 %v2228_v31, %s2877_s23 }
 0xde1   :  { %v2025_v11 = vpop.permute.xlu0 %2024  ;;  %v2027_v37 = vpop.permute.xlu1 %2026 }
 0xde2   :  { %v2036_v13 = vsel %vm91_vm2, %v2025_v11, %v2027_v37 }
 0xde3   :  { %v2042_v7 = vadd.f32 %v2036_v13, %v4413_v25 }
 0xde5   :  { %v2260_v27 = vpop.permute.xlu0 %2259  ;;  %v4553_v52 = vpop.permute.xlu1 %2389  ;;  %v4555_v17 = vadd.f32 %v2062_v8, %v2042_v7 }
 0xde6   :  { %v2263_v15 = vmul.f32 %v2260_v27, %v2176_v39  ;;  %v2265_v5 = vmul.f32 %v2867_v19, %v2260_v27  ;;  %v2262_v21 = vmul.f32 %v2260_v27, %v4511_v3  ;;  %v2264_v34 = vmul.f32 %v4523_v4, %v2260_v27 }
 0xde7   :  { %v2267_v57 = vmul.f32 %v2260_v27, %v2178_v20  ;;  %v2266_v58 = vmul.f32 %v2260_v27, %v4529_v33  ;;  %v2393_v56 = vmul.f32 %v2837_v0, %v4553_v52  ;;  %v2395_v43 = vmul.f32 %v2869_v41, %v4553_v52 }
 0xde8   :  { %v2277_v18 = vrot.slane %v2263_v15, 2  ;;  %v2278_v30 = vrot.slane %v2265_v5, 2  ;;  %v2274_v25 = vrot.slane %v2262_v21, 2  ;;  %v2275_v60 = vrot.slane %v2264_v34, 2 }
 0xde9   :  { %v2338_v62 = vpop.permute.xlu0 %2337  ;;  %v4563_v53 = vpop.permute.xlu1 %2467  ;;  %v2282_v51 = vrot.slane %v2267_v57, 2  ;;  %v2280_v47 = vrot.slane %v2266_v58, 2  ;;  %v2392_v11 = vmul.f32 %v4571_v23, %v4553_v52  ;;  %v2394_v37 = vmul.f32 %v4585_v38, %v4553_v52 }
 0xdea   :  { %v2279_v46 = vsel %vm798_vm3, %v2277_v18, %v2278_v30  ;;  %v2276_v35 = vsel %vm798_vm3, %v2274_v25, %v2275_v60  ;;  %v2341_v61 = vmul.f32 %v2837_v0, %v2338_v62  ;;  %v2343_v29 = vmul.f32 %v2869_v41, %v2338_v62 }
 0xdeb   :  { %2286 = vrot.lane.b32.xlu1 %v2279_v46, %s2878_s24  ;;  %2284 = vrot.lane.b32.xlu0 %v2276_v35, %s2878_s24  ;;  %v2340_v39 = vmul.f32 %v4571_v23, %v2338_v62  ;;  %v2342_v26 = vmul.f32 %v4585_v38, %v2338_v62  ;;  %v2283_v6 = vsel %vm798_vm3, %v2278_v30, %v2282_v51  ;;  %v2407_v5 = vrot.slane %v2393_v56, 2 }
 0xdec   :  { %v2281_v20 = vsel %vm798_vm3, %v2275_v60, %v2280_v47  ;;  %v2355_v36 = vrot.slane %v2341_v61, 2  ;;  %v2356_v14 = vrot.slane %v2343_v29, 2  ;;  %v2345_v1 = vmul.f32 %v2839_v42, %v2338_v62 }
 0xded   :  { %v2029_v2 = vpop.permute.xlu0 %2028  ;;  %v2031_v32 = vpop.permute.xlu1 %2030  ;;  %v2352_v54 = vrot.slane %v2340_v39, 2  ;;  %v2353_v45 = vrot.slane %v2342_v26, 2  ;;  %v2344_v55 = vmul.f32 %v4601_v28, %v2338_v62  ;;  %v2408_v21 = vrot.slane %v2395_v43, 2  ;;  %v2871_v39 = vld [vmem:[%s4849_s0 + $0xd8] sm:$0xff] }
 0xdee   :  { %v2037_v19 = vsel %vm91_vm2, %v2029_v2, %v2031_v32  ;;  %v2357_v44 = vsel %vm798_vm3, %v2355_v36, %v2356_v14  ;;  %v2360_v9 = vrot.slane %v2345_v1, 2  ;;  %v2404_v34 = vrot.slane %v2392_v11, 2  ;;  %v4658_v32 = vld [vmem:[%s4849_s0 + $0xd0] sm:$0xff]  ;;  %v2833_v36 = vld [vmem:[%s4848_s1 + $0x18] ss:$0 sm:$0xff] }
 0xdef   :  { %v2043_v48 = vadd.f32 %v2037_v19, %v4416_v24  ;;  %2290 = vrot.lane.b32.xlu1 %v2283_v6, %s2878_s24  ;;  %2288 = vrot.lane.b32.xlu0 %v2281_v20, %s2878_s24  ;;  %v2354_v31 = vsel %vm798_vm3, %v2352_v54, %v2353_v45  ;;  %v2358_v12 = vrot.slane %v2344_v55, 2  ;;  %v2405_v57 = vrot.slane %v2394_v37, 2  ;;  %v2846_v54 = vld [vmem:[%s4849_s0 + $0xe8] sm:$0xf] }
 0xdf0   :  { %v2361_v27 = vsel %vm798_vm3, %v2356_v14, %v2360_v9  ;;  %v2397_v60 = vmul.f32 %v2839_v42, %v4553_v52  ;;  %v2396_v62 = vmul.f32 %v4601_v28, %v4553_v52  ;;  %v2409_v0 = vsel %vm798_vm3, %v2407_v5, %v2408_v21  ;;  %v4643_v52 = vld [vmem:[%s4849_s0 + $0xc0] sm:$0xf0] }
 0xdf1   :  { %v4603_v22 = vpop.permute.xlu0 %2519  ;;  %v4605_v24 = vpop.permute.xlu1 %2649  ;;  %v2069_v59 = vadd.f32 %v2064_v10, %v2043_v48  ;;  %v2359_v49 = vsel %vm798_vm3, %v2353_v45, %v2358_v12  ;;  %v2406_v46 = vsel %vm798_vm3, %v2404_v34, %v2405_v57  ;;  %v2473_v26 = vmul.f32 %v2871_v39, %v4563_v53  ;;  %v4676_v45 = vld [vmem:[%s4849_s0 + $0xe0] sm:$0xf] }
 0xdf2   :  { %v2410_v61 = vrot.slane %v2396_v62, 2  ;;  %v2470_v2 = vmul.f32 %v4643_v52, %v4563_v53  ;;  %v2472_v19 = vmul.f32 %v4658_v32, %v4563_v53  ;;  %v2475_v43 = vmul.f32 %v2846_v54, %v4563_v53 }
 0xdf3   :  { %2294 = vrot.lane.b32.xlu1 %v2282_v51, %s2878_s24  ;;  %2292 = vrot.lane.b32.xlu0 %v2280_v47, %s2878_s24  ;;  %v2412_v47 = vrot.slane %v2397_v60, 2  ;;  %v2486_v1 = vrot.slane %v2473_v26, 2  ;;  %v2474_v11 = vmul.f32 %v4676_v45, %v4563_v53  ;;  %v2527_v26 = vmul.f32 %v2846_v54, %v4603_v22 }
 0xdf4   :  { %v2411_v42 = vsel %vm798_vm3, %v2405_v57, %v2410_v61  ;;  %v2482_v55 = vrot.slane %v2470_v2, 2  ;;  %v2525_v57 = vmul.f32 %v2871_v39, %v4603_v22  ;;  %v2526_v2 = vmul.f32 %v4676_v45, %v4603_v22 }
 0xdf5   :  { %v4612_v40 = vpop.permute.xlu0 %2597  ;;  %v2035_v50 = vpop.permute.xlu1 %2034  ;;  %v2413_v48 = vsel %vm798_vm3, %v2408_v21, %v2412_v47  ;;  %v2488_v5 = vrot.slane %v2474_v11, 2  ;;  %v2186_v21 = vmul.f32 %v2833_v36, %v4529_v33 }
 0xdf6   :  { %v2540_v54 = vrot.slane %v2526_v2, 2 }
 0xdf7   :  { %2364 = vrot.lane.b32.xlu1 %v2357_v44, %s2877_s23  ;;  %2362 = vrot.lane.b32.xlu0 %v2354_v31, %s2877_s23  ;;  %v2483_v44 = vrot.slane %v2472_v19, 2 }
 0xdf9   :  { %v2033_v13 = vpop.permute.xlu0 %2032  ;;  %v2105_v8 = vpop.permute.xlu1 %2104 }
 0xdfa   :  { %v2038_v7 = vsel %vm91_vm2, %v2033_v13, %v2035_v50 }
 0xdfb   :  { %v2044_v15 = vadd.f32 %v2038_v7, %v4424_v16  ;;  %2368 = vrot.lane.b32.xlu1 %v2361_v27, %s2877_s23  ;;  %2366 = vrot.lane.b32.xlu0 %v2359_v49, %s2877_s23 }
 0xdfd   :  { %v2103_v58 = vpop.permute.xlu0 %2102  ;;  %v2109_v18 = vpop.permute.xlu1 %2108  ;;  %v2070_v30 = vadd.f32 %v2063_v63, %v2044_v15  ;;  %v2844_v63 = vld [vmem:[%s4849_s0 + $0xc8] sm:$0xf0]  ;;  %v2490_v15 = vrot.slane %v2475_v43, 2 }
 0xdfe   :  { %v2114_v25 = vsel %vm59_vm1, %v2103_v58, %v2105_v8  ;;  %v2471_v29 = vmul.f32 %v2844_v63, %v4563_v53  ;;  %v2484_v8 = vsel %vm798_vm3, %v2482_v55, %v2483_v44  ;;  %v2523_v34 = vmul.f32 %v2844_v63, %v4603_v22 }
 0xdff   :  { %v2120_v16 = vadd.f32 %v2114_v25, %v4555_v17  ;;  %2372 = vrot.lane.b32.xlu1 %v2360_v9, %s2877_s23  ;;  %2370 = vrot.lane.b32.xlu0 %v2358_v12, %s2877_s23  ;;  %v2184_v9 = vmul.f32 %v2833_v36, %v4511_v3  ;;  %v2185_v12 = vmul.f32 %v4523_v4, %v2833_v36 }
 0xe00   :  { %v2522_v58 = vmul.f32 %v4643_v52, %v4603_v22  ;;  %v2491_v62 = vsel %vm798_vm3, %v2486_v1, %v2490_v15 }
 0xe01   :  { %v2107_v35 = vpop.permute.xlu0 %2106  ;;  %v2113_v51 = vpop.permute.xlu1 %2112  ;;  %v2190_v27 = vrot.slane %v2184_v9, 2  ;;  %v2191_v4 = vrot.slane %v2185_v12, 2  ;;  %v4738_v9 = vld [vmem:[%s4849_s0 + $0x120] sm:$0xff] }
 0xe02   :  { %v2115_v17 = vsel %vm59_vm1, %v2107_v35, %v2109_v18  ;;  %v2524_v18 = vmul.f32 %v4658_v32, %v4603_v22  ;;  %v2537_v35 = vrot.slane %v2523_v34, 2  ;;  %v2534_v63 = vrot.slane %v2522_v58, 2  ;;  %v4721_v22 = vld [vmem:[%s4849_s0 + $0x110] sm:$0xf0] }
 0xe03   :  { %v2121_v41 = vadd.f32 %v2115_v17, %v2069_v59  ;;  %2416 = vrot.lane.b32.xlu1 %v2409_v0, %s2878_s24  ;;  %2414 = vrot.lane.b32.xlu0 %v2406_v46, %s2878_s24  ;;  %v2485_v59 = vrot.slane %v2471_v29, 2  ;;  %v2192_v25 = vsel %vm798_vm3, %v2190_v27, %v2191_v4  ;;  %v2193_v0 = vrot.slane %v2186_v21, 2 }
 0xe04   :  { %v2535_v17 = vrot.slane %v2524_v18, 2  ;;  %v2602_v12 = vmul.f32 %v4738_v9, %v4612_v40 }
 0xe05   :  { %v2111_v6 = vpop.permute.xlu0 %2110  ;;  %v2157_v20 = vpop.permute.xlu1 %2156  ;;  %v2487_v13 = vsel %vm798_vm3, %v2485_v59, %v2486_v1  ;;  %v2194_v39 = vsel %vm798_vm3, %v2191_v4, %v2193_v0 }
 0xe06   :  { %v2116_v10 = vsel %vm59_vm1, %v2111_v6, %v2113_v51  ;;  %v2538_v51 = vrot.slane %v2525_v57, 2 }
 0xe07   :  { %v2122_v14 = vadd.f32 %v2116_v10, %v2070_v30  ;;  %2420 = vrot.lane.b32.xlu1 %v2413_v48, %s2878_s24  ;;  %2418 = vrot.lane.b32.xlu0 %v2411_v42, %s2878_s24  ;;  %v2851_v42 = vld [vmem:[%s4849_s0 + $0x118] sm:$0xf0] }
 0xe08   :  { %v2539_v6 = vsel %vm798_vm3, %v2537_v35, %v2538_v51  ;;  %v2601_v55 = vmul.f32 %v2851_v42, %v4612_v40  ;;  %v2653_v18 = vmul.f32 %v2851_v42, %v4605_v24 }
 0xe09   :  { %v2155_v31 = vpop.permute.xlu0 %2154  ;;  %v2161_v50 = vpop.permute.xlu1 %2160 }
 0xe0a   :  { %v2166_v56 = vsel %vm91_vm2, %v2155_v31, %v2157_v20  ;;  %v2536_v20 = vsel %vm798_vm3, %v2534_v63, %v2535_v17  ;;  %v2615_v27 = vrot.slane %v2601_v55, 2 }
 0xe0b   :  { %v2172_v37 = vadd.f32 %v2166_v56, %v2120_v16  ;;  %2424 = vrot.lane.b32.xlu1 %v2412_v47, %s2878_s24  ;;  %2422 = vrot.lane.b32.xlu0 %v2410_v61, %s2878_s24  ;;  %v2489_v16 = vsel %vm798_vm3, %v2483_v44, %v2488_v5  ;;  %v2873_v44 = vld [vmem:[%s4849_s0 + $0x128] sm:$0xff] }
 0xe0c   :  { %v2603_v31 = vmul.f32 %v2873_v44, %v4612_v40 }
 0xe0d   :  { %v2159_v7 = vpop.permute.xlu0 %2158  ;;  %v2165_v3 = vpop.permute.xlu1 %2164  ;;  %v2198_v61 = vadd.f32 %v2192_v25, %v2172_v37  ;;  %v2654_v25 = vmul.f32 %v4738_v9, %v4605_v24 }
 0xe0e   :  { %v2167_v49 = vsel %vm91_vm2, %v2159_v7, %v2161_v50  ;;  %v2600_v50 = vmul.f32 %v4721_v22, %v4612_v40  ;;  %v2853_v7 = vld [vmem:[%s4849_s0 + $0x138] sm:$0xf]  ;;  %v2616_v4 = vrot.slane %v2603_v31, 2 }
 0xe0f   :  { %v2173_v53 = vadd.f32 %v2167_v49, %v2121_v41  ;;  %2494 = vrot.lane.b32.xlu1 %v2487_v13, %s2877_s23  ;;  %2492 = vrot.lane.b32.xlu0 %v2484_v8, %s2877_s23  ;;  %v2541_v13 = vsel %vm798_vm3, %v2535_v17, %v2540_v54  ;;  %v2657_v35 = vmul.f32 %v2853_v7, %v4605_v24 }
 0xe10   :  { %v2612_v49 = vrot.slane %v2600_v50, 2 }
 0xe11   :  { %v2163_v30 = vpop.permute.xlu0 %2162  ;;  %v2235_v60 = vpop.permute.xlu1 %2234  ;;  %v2199_v48 = vadd.f32 %v2194_v39, %v2173_v53  ;;  %v2617_v53 = vsel %vm798_vm3, %v2615_v27, %v2616_v4 }
 0xe12   :  { %v2168_v33 = vsel %vm91_vm2, %v2163_v30, %v2165_v3  ;;  %v4755_v3 = vld [vmem:[%s4849_s0 + $0x130] sm:$0xf]  ;;  %v2655_v30 = vmul.f32 %v2873_v44, %v4605_v24 }
 0xe13   :  { %v2174_v46 = vadd.f32 %v2168_v33, %v2122_v14  ;;  %2498 = vrot.lane.b32.xlu1 %v2491_v62, %s2877_s23  ;;  %2496 = vrot.lane.b32.xlu0 %v2489_v16, %s2877_s23  ;;  %v2542_v14 = vrot.slane %v2527_v26, 2  ;;  %v2604_v21 = vmul.f32 %v4755_v3, %v4612_v40  ;;  %v2667_v62 = vrot.slane %v2653_v18, 2 }
 0xe14   :  { %v2668_v16 = vrot.slane %v2655_v30, 2 }
 0xe15   :  { %v2233_v47 = vpop.permute.xlu0 %2232  ;;  %v2239_v41 = vpop.permute.xlu1 %2238  ;;  %v2200_v43 = vadd.f32 %v2193_v0, %v2174_v46  ;;  %v2543_v37 = vsel %vm798_vm3, %v2538_v51, %v2542_v14  ;;  %v2618_v58 = vrot.slane %v2604_v21, 2  ;;  %v2665_v46 = vrot.slane %v2654_v25, 2 }
 0xe16   :  { %v2244_v29 = vsel %vm59_vm1, %v2233_v47, %v2235_v60  ;;  %v2656_v51 = vmul.f32 %v4755_v3, %v4605_v24  ;;  %v2669_v63 = vsel %vm798_vm3, %v2667_v62, %v2668_v16  ;;  %v2672_v47 = vrot.slane %v2657_v35, 2 }
 0xe17   :  { %v4709_v19 = vadd.f32 %v2244_v29, %v2198_v61  ;;  %2502 = vrot.lane.b32.xlu1 %v2490_v15, %s2877_s23  ;;  %2500 = vrot.lane.b32.xlu0 %v2488_v5, %s2877_s23  ;;  %v2613_v15 = vrot.slane %v2602_v12, 2  ;;  %v2605_v5 = vmul.f32 %v2853_v7, %v4612_v40  ;;  %v2652_v40 = vmul.f32 %v4721_v22, %v4605_v24  ;;  %v2840_v24 = vld [vmem:[%s4848_s1 + $0x19] ss:$0 sm:$0xff] }
 0xe18   :  { %v2670_v61 = vrot.slane %v2656_v51, 2  ;;  %v2314_v39 = vmul.f32 %v2840_v24, %v4571_v23  ;;  %v2315_v26 = vmul.f32 %v4585_v38, %v2840_v24 }
 0xe19   :  { %v2237_v10 = vpop.permute.xlu0 %2236  ;;  %v2243_v1 = vpop.permute.xlu1 %2242  ;;  %v2614_v34 = vsel %vm798_vm3, %v2612_v49, %v2613_v15  ;;  %v2620_v57 = vrot.slane %v2605_v5, 2  ;;  %v2619_v33 = vsel %vm798_vm3, %v2613_v15, %v2618_v58  ;;  %v2664_v0 = vrot.slane %v2652_v40, 2 }
 0xe1a   :  { %v2245_v36 = vsel %vm59_vm1, %v2237_v10, %v2239_v41  ;;  %v2673_v41 = vsel %vm798_vm3, %v2668_v16, %v2672_v47  ;;  %v2671_v29 = vsel %vm798_vm3, %v2665_v46, %v2670_v61  ;;  %v2320_v2 = vrot.slane %v2314_v39, 2  ;;  %v2854_v39 = vld [vmem:[%s4848_s1 + $0x1b] ss:$0 sm:$0xff] }
 0xe1b   :  { %v4724_v59 = vadd.f32 %v2245_v36, %v2199_v48  ;;  %2546 = vrot.lane.b32.xlu1 %v2539_v6, %s2878_s24  ;;  %2544 = vrot.lane.b32.xlu0 %v2536_v20, %s2878_s24  ;;  %v2621_v60 = vsel %vm798_vm3, %v2616_v4, %v2620_v57  ;;  %v2666_v17 = vsel %vm798_vm3, %v2664_v0, %v2665_v46  ;;  %v2321_v6 = vrot.slane %v2315_v26, 2 }
 0xe1c   :  { %v2316_v20 = vmul.f32 %v2840_v24, %v4601_v28 }
 0xe1d   :  { %v2241_v56 = vpop.permute.xlu0 %2240  ;;  %v2322_v36 = vsel %vm798_vm3, %v2320_v2, %v2321_v6 }
 0xe1e   :  { %v2246_v11 = vsel %vm59_vm1, %v2241_v56, %v2243_v1 }
 0xe1f   :  { %v4745_v8 = vadd.f32 %v2246_v11, %v2200_v43  ;;  %2550 = vrot.lane.b32.xlu1 %v2543_v37, %s2878_s24  ;;  %2548 = vrot.lane.b32.xlu0 %v2541_v13, %s2878_s24 }
 0xe23   :  { %2554 = vrot.lane.b32.xlu1 %v2542_v14, %s2878_s24  ;;  %2552 = vrot.lane.b32.xlu0 %v2540_v54, %s2878_s24  ;;  %v2323_v14 = vrot.slane %v2316_v20, 2  ;;  %v2575_v20 = vmul.f32 %v4738_v9, %v2854_v39 }
 0xe25   :  { %v2324_v38 = vsel %vm798_vm3, %v2321_v6, %v2323_v14  ;;  %v2574_v6 = vmul.f32 %v2854_v39, %v4721_v22 }
 0xe27   :  { %2624 = vrot.lane.b32.xlu1 %v2617_v53, %s2877_s23  ;;  %2622 = vrot.lane.b32.xlu0 %v2614_v34, %s2877_s23 }
 0xe2b   :  { %2628 = vrot.lane.b32.xlu1 %v2621_v60, %s2877_s23  ;;  %2626 = vrot.lane.b32.xlu0 %v2619_v33, %s2877_s23 }
 0xe2f   :  { %2632 = vrot.lane.b32.xlu1 %v2620_v57, %s2877_s23  ;;  %2630 = vrot.lane.b32.xlu0 %v2618_v58, %s2877_s23 }
 0xe33   :  { %2676 = vrot.lane.b32.xlu1 %v2669_v63, %s2878_s24  ;;  %2674 = vrot.lane.b32.xlu0 %v2666_v17, %s2878_s24 }
 0xe37   :  { %2680 = vrot.lane.b32.xlu1 %v2673_v41, %s2878_s24  ;;  %2678 = vrot.lane.b32.xlu0 %v2671_v29, %s2878_s24 }
 0xe3b   :  { %2684 = vrot.lane.b32.xlu1 %v2672_v47, %s2878_s24  ;;  %2682 = vrot.lane.b32.xlu0 %v2670_v61, %s2878_s24 }
 0xe5d   :  { %v2285_v10 = vpop.permute.xlu0 %2284  ;;  %v2287_v48 = vpop.permute.xlu1 %2286 }
 0xe5e   :  { %v2296_v42 = vsel %vm91_vm2, %v2285_v10, %v2287_v48 }
 0xe5f   :  { %v2302_v54 = vadd.f32 %v2296_v42, %v4709_v19  ;;  %v2847_v19 = vld [vmem:[%s4848_s1 + $0x1a] ss:$0 sm:$0xff] }
 0xe60   :  { %v2444_v4 = vmul.f32 %v2847_v19, %v4643_v52 }
 0xe61   :  { %v2289_v1 = vpop.permute.xlu0 %2288  ;;  %v2291_v55 = vpop.permute.xlu1 %2290  ;;  %v2328_v44 = vadd.f32 %v2322_v36, %v2302_v54  ;;  %v2580_v36 = vrot.slane %v2574_v6, 2  ;;  %v2576_v54 = vmul.f32 %v2854_v39, %v4755_v3 }
 0xe62   :  { %v2297_v23 = vsel %vm91_vm2, %v2289_v1, %v2291_v55  ;;  %v2450_v21 = vrot.slane %v2444_v4, 2 }
 0xe63   :  { %v2303_v31 = vadd.f32 %v2297_v23, %v4724_v59  ;;  %v2445_v59 = vmul.f32 %v4658_v32, %v2847_v19  ;;  %v2583_v22 = vrot.slane %v2576_v54, 2 }
 0xe65   :  { %v2293_v50 = vpop.permute.xlu0 %2292  ;;  %v2295_v28 = vpop.permute.xlu1 %2294  ;;  %v2329_v12 = vadd.f32 %v2324_v38, %v2303_v31  ;;  %v2451_v53 = vrot.slane %v2445_v59, 2 }
 0xe66   :  { %v2298_v56 = vsel %vm91_vm2, %v2293_v50, %v2295_v28 }
 0xe67   :  { %v2304_v43 = vadd.f32 %v2298_v56, %v4745_v8  ;;  %v2446_v8 = vmul.f32 %v2847_v19, %v4676_v45  ;;  %v2452_v40 = vsel %vm798_vm3, %v2450_v21, %v2451_v53 }
 0xe69   :  { %v2363_v11 = vpop.permute.xlu0 %2362  ;;  %v2365_v37 = vpop.permute.xlu1 %2364  ;;  %v2330_v13 = vadd.f32 %v2323_v14, %v2304_v43  ;;  %v2453_v52 = vrot.slane %v2446_v8, 2  ;;  %v2581_v14 = vrot.slane %v2575_v20, 2 }
 0xe6a   :  { %v2374_v5 = vsel %vm59_vm1, %v2363_v11, %v2365_v37 }
 0xe6b   :  { %v2380_v34 = vadd.f32 %v2374_v5, %v2328_v44  ;;  %v2454_v45 = vsel %vm798_vm3, %v2451_v53, %v2453_v52  ;;  %v2582_v31 = vsel %vm798_vm3, %v2580_v36, %v2581_v14  ;;  %v2584_v3 = vsel %vm798_vm3, %v2581_v14, %v2583_v22 }
 0xe6d   :  { %v2367_v7 = vpop.permute.xlu0 %2366  ;;  %v2369_v27 = vpop.permute.xlu1 %2368 }
 0xe6e   :  { %v2375_v18 = vsel %vm59_vm1, %v2367_v7, %v2369_v27 }
 0xe6f   :  { %v2381_v32 = vadd.f32 %v2375_v18, %v2329_v12 }
 0xe71   :  { %v2371_v49 = vpop.permute.xlu0 %2370  ;;  %v2373_v15 = vpop.permute.xlu1 %2372 }
 0xe72   :  { %v2376_v16 = vsel %vm59_vm1, %v2371_v49, %v2373_v15 }
 0xe73   :  { %v2382_v35 = vadd.f32 %v2376_v16, %v2330_v13 }
 0xe75   :  { %v2415_v57 = vpop.permute.xlu0 %2414  ;;  %v2417_v58 = vpop.permute.xlu1 %2416 }
 0xe76   :  { %v2426_v30 = vsel %vm91_vm2, %v2415_v57, %v2417_v58 }
 0xe77   :  { %v2432_v25 = vadd.f32 %v2426_v30, %v2380_v34 }
 0xe79   :  { %v2419_v60 = vpop.permute.xlu0 %2418  ;;  %v2421_v33 = vpop.permute.xlu1 %2420  ;;  %v2458_v62 = vadd.f32 %v2452_v40, %v2432_v25 }
 0xe7a   :  { %v2427_v0 = vsel %vm91_vm2, %v2419_v60, %v2421_v33 }
 0xe7b   :  { %v2433_v46 = vadd.f32 %v2427_v0, %v2381_v32 }
 0xe7d   :  { %v2423_v51 = vpop.permute.xlu0 %2422  ;;  %v2425_v63 = vpop.permute.xlu1 %2424  ;;  %v2459_v17 = vadd.f32 %v2454_v45, %v2433_v46 }
 0xe7e   :  { %v2428_v47 = vsel %vm91_vm2, %v2423_v51, %v2425_v63 }
 0xe7f   :  { %v2434_v61 = vadd.f32 %v2428_v47, %v2382_v35 }
 0xe81   :  { %v2493_v41 = vpop.permute.xlu0 %2492  ;;  %v2495_v29 = vpop.permute.xlu1 %2494  ;;  %v2460_v24 = vadd.f32 %v2453_v52, %v2434_v61 }
 0xe82   :  { %v2504_v42 = vsel %vm59_vm1, %v2493_v41, %v2495_v29 }
 0xe83   :  { %v2510_v1 = vadd.f32 %v2504_v42, %v2458_v62 }
 0xe85   :  { %v2497_v26 = vpop.permute.xlu0 %2496  ;;  %v2499_v2 = vpop.permute.xlu1 %2498 }
 0xe86   :  { %v2505_v23 = vsel %vm59_vm1, %v2497_v26, %v2499_v2 }
 0xe87   :  { %v2511_v9 = vadd.f32 %v2505_v23, %v2459_v17 }
 0xe89   :  { %v2501_v10 = vpop.permute.xlu0 %2500  ;;  %v2503_v48 = vpop.permute.xlu1 %2502 }
 0xe8a   :  { %v2506_v43 = vsel %vm59_vm1, %v2501_v10, %v2503_v48 }
 0xe8b   :  { %v2512_v13 = vadd.f32 %v2506_v43, %v2460_v24 }
 0xe8d   :  { %v2545_v55 = vpop.permute.xlu0 %2544  ;;  %v2547_v44 = vpop.permute.xlu1 %2546 }
 0xe8e   :  { %v2556_v38 = vsel %vm91_vm2, %v2545_v55, %v2547_v44 }
 0xe8f   :  { %v2562_v50 = vadd.f32 %v2556_v38, %v2510_v1 }
 0xe91   :  { %v2549_v28 = vpop.permute.xlu0 %2548  ;;  %v2551_v12 = vpop.permute.xlu1 %2550  ;;  %v2588_v56 = vadd.f32 %v2582_v31, %v2562_v50 }
 0xe92   :  { %v2557_v11 = vsel %vm91_vm2, %v2549_v28, %v2551_v12 }
 0xe93   :  { %v2563_v37 = vadd.f32 %v2557_v11, %v2511_v9 }
 0xe95   :  { %v2553_v19 = vpop.permute.xlu0 %2552  ;;  %v2555_v7 = vpop.permute.xlu1 %2554  ;;  %v2589_v27 = vadd.f32 %v2584_v3, %v2563_v37 }
 0xe96   :  { %v2558_v4 = vsel %vm91_vm2, %v2553_v19, %v2555_v7 }
 0xe97   :  { %v2564_v59 = vadd.f32 %v2558_v4, %v2512_v13 }
 0xe99   :  { %v2623_v49 = vpop.permute.xlu0 %2622  ;;  %v2625_v15 = vpop.permute.xlu1 %2624  ;;  %v2590_v5 = vadd.f32 %v2583_v22, %v2564_v59 }
 0xe9a   :  { %v2634_v57 = vsel %vm59_vm1, %v2623_v49, %v2625_v15 }
 0xe9b   :  { %v2640_v58 = vadd.f32 %v2634_v57, %v2588_v56 }
 0xe9d   :  { %v2627_v21 = vpop.permute.xlu0 %2626  ;;  %v2629_v53 = vpop.permute.xlu1 %2628 }
 0xe9e   :  { %v2635_v40 = vsel %vm59_vm1, %v2627_v21, %v2629_v53 }
 0xe9f   :  { %v2641_v32 = vadd.f32 %v2635_v40, %v2589_v27 }
 0xea1   :  { %v2631_v8 = vpop.permute.xlu0 %2630  ;;  %v2633_v34 = vpop.permute.xlu1 %2632 }
 0xea2   :  { %v2636_v16 = vsel %vm59_vm1, %v2631_v8, %v2633_v34 }
 0xea3   :  { %v2642_v46 = vadd.f32 %v2636_v16, %v2590_v5 }
 0xea5   :  { %v2675_v18 = vpop.permute.xlu0 %2674  ;;  %v2677_v30 = vpop.permute.xlu1 %2676 }
 0xea6   :  { %v2686_v52 = vsel %vm91_vm2, %v2675_v18, %v2677_v30 }
 0xea7   :  { %v2692_v25 = vadd.f32 %v2686_v52, %v2640_v58 }
 0xea9   :  { %v2695_v60 = vmax.f32 %v2692_v25, 0.0  ;;  %v2679_v33 = vpop.permute.xlu0 %2678  ;;  %v2681_v62 = vpop.permute.xlu1 %2680 }
 0xeaa   :  { %v2687_v0 = vsel %vm91_vm2, %v2679_v33, %v2681_v62 }
 0xeab   :  { %2698 = vst [vmem:[%s4851_s3 + $0xe] sm:$0xfc] %v2695_v60  ;;  %v2693_v45 = vadd.f32 %v2687_v0, %v2641_v32 }
 0xead   :  { %v2696_v35 = vmax.f32 %v2693_v45, 0.0  ;;  %v2683_v51 = vpop.permute.xlu0 %2682  ;;  %v2685_v63 = vpop.permute.xlu1 %2684 }
 0xeae   :  { %v2688_v17 = vsel %vm91_vm2, %v2683_v51, %v2685_v63 }
 0xeaf   :  { %2699 = vst [vmem:[%s4851_s3 + $0x16] sm:$0xff] %v2696_v35  ;;  %v2694_v47 = vadd.f32 %v2688_v17, %v2642_v46 }
 0xeb1   :  { %v2697_v61 = vmax.f32 %v2694_v47, 0.0 }
 0xeb3   :  { %2700 = vst [vmem:[%s4851_s3 + $0x1e] sm:$0x3] %v2697_v61 }

</bundles_post_ra>
